<compile_context>
chip_gen: v7x
topology: tpu7x:2x2x1
jax: 0.10.0
libtpu: 0.0.40
codegen_flags: <defaults>
</compile_context>

<pallas_src>
import functools
import math

import jax
import jax.numpy as jnp
from jax.experimental import pallas as pl
from jax.experimental.pallas import tpu as pltpu


def _round_up(x: int, m: int) -> int:
    return (x + m - 1) // m * m


# ---------------------------------------------------------------------------
# Fused Pallas kernel:
#   h = relu(x @ W0 + b0); repeat n_mid times: h = relu(h @ Wm[l] + bm[l]);
#   out = h @ W_last + b_last
# ---------------------------------------------------------------------------
def _fused_mlp_kernel(x_ref, w0_ref, b0_ref, wm_ref, bm_ref, wl_ref, bl_ref,
                      o_ref, h0_ref, *, n_mid: int, d_in: int):
    d_in_p = h0_ref.shape[1]
    if d_in == d_in_p:
        h = x_ref[...]
    else:
        # K-pad the first-layer activation inside VMEM (no wrapper-side HBM pass).
        # Padded columns must be zeroed: stale scratch could hold NaN and 0 * NaN = NaN.
        h0_ref[...] = jnp.zeros_like(h0_ref)
        h0_ref[:, :d_in] = x_ref[...]
        h = h0_ref[...]

    # bf16 operands on the MXU, f32 accumulation; bias-add / ReLU in f32 on the VPU.
    h = jnp.dot(h.astype(jnp.bfloat16), w0_ref[...],
                preferred_element_type=jnp.float32)
    h = jnp.maximum(h + b0_ref[...], 0.0)

    for l in range(n_mid):  # static unroll; n_mid is small (4 in the module)
        h = jnp.dot(h.astype(jnp.bfloat16), wm_ref[l],
                    preferred_element_type=jnp.float32)
        h = jnp.maximum(h + bm_ref[l], 0.0)

    # Final layer (zero-init in the module): no activation.
    h = jnp.dot(h.astype(jnp.bfloat16), wl_ref[...],
                preferred_element_type=jnp.float32) + bl_ref[...]
    # Output lane dim is a multiple of 128 -> unmasked, lane-dense stores.
    o_ref[...] = h.astype(o_ref.dtype)


def mlp_forward(x, params, *, tile_m: int = 512):
    """x: [..., d_in] -> [..., d_out]; the whole MLP runs in one pallas_call."""
    d_in, d_out = params["d_in"], params["d_out"]
    d_in_p, H, d_out_p = params["d_in_p"], params["H"], params["d_out_p"]
    n_mid = params["n_mid"]
    w0, b0, wm, bm, wl, bl = (params[k] for k in ("w0", "b0", "wm", "bm", "wl", "bl"))

    orig_shape = x.shape
    x2d = x.reshape(-1, d_in).astype(jnp.float32)
    rows = x2d.shape[0]

    # Row tiling: tm must be a multiple of 8 (sublane constraint).  tile_m=512 amortizes
    # per-grid-step overhead and keeps the MXU fed; any batch large enough to be
    # compute-bound (per-tile matmul work > resident-weight DMA) naturally gets >=2 tiles,
    # so the "parallel" axis can shard across both v7x TensorCores.
    tile_m = _round_up(max(tile_m, 8), 8)
    rows_p = _round_up(max(rows, 8), 8)
    if rows_p <= tile_m:
        tm = rows_p
    else:
        tm = tile_m
        rows_p = _round_up(rows, tm)
    if rows_p != rows:
        x2d = jnp.pad(x2d, ((0, rows_p - rows), (0, 0)))  # rows only; feature dim stays d_in

    grid = (rows_p // tm,)

    weight_bytes = 2 * (w0.size + wm.size + wl.size) + 4 * (b0.size + bm.size + bl.size)
    flops = 2 * rows_p * (d_in_p * H + n_mid * H * H + H * d_out_p)
    bytes_accessed = 4 * (x2d.size + rows_p * d_out_p) + weight_bytes

    # Constant index_map => weights stay resident in VMEM across the M grid.  Single-buffer
    # them only when they are big enough for the extra copy to matter (keeps the small-model
    # path identical to the known-good default configuration).
    resident = dict(pipeline_mode=pl.Buffered(1)) if weight_bytes > 8 * 1024 * 1024 else {}

    # VMEM budget: resident weights (1 or 2 buffers) + double-buffered activation/output
    # tiles + the K-padding scratch.  Raise the scoped limit only when actually needed and
    # stay under v7x's 64 MiB physical VMEM.
    weight_buffers = 1 if resident else 2
    vmem_needed = (weight_buffers * weight_bytes
                   + 2 * tm * d_in * 4
                   + tm * d_in_p * 4
                   + 2 * tm * d_out_p * 4)
    compiler_kwargs = dict(dimension_semantics=("parallel",))
    if vmem_needed > 30 * 1024 * 1024:
        # TODO(synk): if the resident weights ever exceed ~60 MiB (v7x physical VMEM),
        # stream the layer stack over an extra grid axis instead of keeping it resident.
        compiler_kwargs["vmem_limit_bytes"] = int(min(vmem_needed * 5 // 4, 64 * 1024 * 1024))

    out = pl.pallas_call(
        functools.partial(_fused_mlp_kernel, n_mid=n_mid, d_in=d_in),
        out_shape=jax.ShapeDtypeStruct((rows_p, d_out_p), jnp.float32),
        grid_spec=pltpu.PrefetchScalarGridSpec(
            num_scalar_prefetch=0,
            grid=grid,
            in_specs=[
                pl.BlockSpec((tm, d_in), lambda i: (i, 0)),                    # activation tile
                pl.BlockSpec((d_in_p, H), lambda i: (0, 0), **resident),       # W0 (bf16)
                pl.BlockSpec((1, H), lambda i: (0, 0), **resident),            # b0 (f32)
                pl.BlockSpec((n_mid, H, H), lambda i: (0, 0, 0), **resident),  # middle W stack
                pl.BlockSpec((n_mid, 1, H), lambda i: (0, 0, 0), **resident),  # middle b stack
                pl.BlockSpec((H, d_out_p), lambda i: (0, 0), **resident),      # W_last
                pl.BlockSpec((1, d_out_p), lambda i: (0, 0), **resident),      # b_last
            ],
            out_specs=pl.BlockSpec((tm, d_out_p), lambda i: (i, 0)),
            scratch_shapes=[pltpu.VMEM((tm, d_in_p), jnp.float32)],
        ),
        compiler_params=pltpu.CompilerParams(**compiler_kwargs),
        cost_estimate=pl.CostEstimate(flops=int(flops), transcendentals=0,
                                      bytes_accessed=int(bytes_accessed)),
    )(x2d, w0, b0, wm, bm, wl, bl)

    out = out[:rows, :d_out]
    return out.reshape(*orig_shape[:-1], d_out)


# ---------------------------------------------------------------------------
# Parameter construction mirroring the PyTorch module
# ---------------------------------------------------------------------------
_TRUNCATED_NORMAL_STDDEV_FACTOR = 0.8796256610342398


def _trunc_normal_weight(key, d_in, d_out):
    # PyTorch Linear weight is [d_out, d_in] with fan_in = d_in; stored here as [d_in, d_out].
    scale = 1.0 / max(1, d_in)
    std = math.sqrt(scale) / _TRUNCATED_NORMAL_STDDEV_FACTOR
    t = jax.random.truncated_normal(
        key, lower=-2.0 / std, upper=2.0 / std, shape=(d_in, d_out), dtype=jnp.float32)
    return t * std


def _pack_params(weights, biases, d_in, n_layers, d_hidden, d_out):
    """Pack per-layer f32 weights/biases into padded, kernel-ready (bf16) tensors."""
    assert n_layers >= 1 and len(weights) == n_layers + 2
    d_in_p = _round_up(d_in, 128)
    H = _round_up(d_hidden, 128)
    d_out_p = _round_up(d_out, 128)

    w0 = jnp.zeros((d_in_p, H), jnp.float32).at[:d_in, :d_hidden].set(weights[0])
    wm = (jnp.zeros((n_layers, H, H), jnp.float32)
          .at[:, :d_hidden, :d_hidden].set(jnp.stack(weights[1:-1])))
    wl = jnp.zeros((H, d_out_p), jnp.float32).at[:d_hidden, :d_out].set(weights[-1])

    b0 = jnp.zeros((1, H), jnp.float32).at[0, :d_hidden].set(biases[0])
    bm = (jnp.zeros((n_layers, 1, H), jnp.float32)
          .at[:, 0, :d_hidden].set(jnp.stack(biases[1:-1])))
    bl = jnp.zeros((1, d_out_p), jnp.float32).at[0, :d_out].set(biases[-1])

    return {
        # Kernel-side tensors: bf16 weights (half the bytes, MXU-native), f32 biases.
        "w0": w0.astype(jnp.bfloat16), "wm": wm.astype(jnp.bfloat16),
        "wl": wl.astype(jnp.bfloat16),
        "b0": b0, "bm": bm, "bl": bl,
        # f32 masters for the pure-JAX reference.
        "layers": list(zip(weights, biases)),
        "d_in": d_in, "d_out": d_out,
        "d_in_p": d_in_p, "H": H, "d_out_p": d_out_p, "n_mid": n_layers,
    }


def init_mlp_params(key, d_in, n_layers, d_hidden, d_out):
    """Module-faithful init: trunc-normal hidden layers, zero bias, zero-init final layer."""
    dims = [(d_in, d_hidden)] + [(d_hidden, d_hidden)] * n_layers + [(d_hidden, d_out)]
    keys = jax.random.split(key, len(dims))
    weights, biases = [], []
    for l, (k, (di, do)) in enumerate(zip(keys, dims)):
        if l < len(dims) - 1:
            weights.append(_trunc_normal_weight(k, di, do))       # init='default'
        else:
            weights.append(jnp.zeros((di, do), jnp.float32))      # init='final' -> zero weight
        biases.append(jnp.zeros((do,), jnp.float32))              # bias.fill_(0)
    return _pack_params(weights, biases, d_in, n_layers, d_hidden, d_out)


def random_mlp_params(key, d_in, n_layers, d_hidden, d_out):
    """Fully random params (incl. final layer & biases) for a non-trivial numeric check."""
    dims = [(d_in, d_hidden)] + [(d_hidden, d_hidden)] * n_layers + [(d_hidden, d_out)]
    keys = jax.random.split(key, 2 * len(dims))
    weights, biases = [], []
    for l, (di, do) in enumerate(dims):
        weights.append(_trunc_normal_weight(keys[2 * l], di, do))
        biases.append(0.1 * jax.random.normal(keys[2 * l + 1], (do,), jnp.float32))
    return _pack_params(weights, biases, d_in, n_layers, d_hidden, d_out)


# ---------------------------------------------------------------------------
# Reference (pure JAX, f32) for sanity checking
# ---------------------------------------------------------------------------
def mlp_reference(x, params):
    h = x.reshape(-1, x.shape[-1]).astype(jnp.float32)
    n = len(params["layers"])
    for l, (w, b) in enumerate(params["layers"]):
        h = h @ w + b
        if l < n - 1:
            h = jnp.maximum(h, 0.0)
    return h.reshape(*x.shape[:-1], h.shape[-1])


if __name__ == "__main__":
    # Module config: Model(..., use_mlp=True) builds MLP(300, 4, 512, d_model) and applies
    # it to en.reshape(batch, reshape_size, 300) with reshape_size=10 (module default).
    d_in, n_layers, d_hidden, d_model = 300, 4, 512, 128
    batch, reshape_size = 2, 10

    key = jax.random.PRNGKey(0)
    k_param, k_x, k_val = jax.random.split(key, 3)

    en = jax.random.normal(k_x, (batch, reshape_size * d_in), dtype=jnp.float32)
    x = en.reshape(batch, reshape_size, d_in)   # Model.forward: en.reshape(B, reshape_size, 300)

    # 1) Module-faithful params (final Linear zero-init -> MLP output is exactly zero).
    params = init_mlp_params(k_param, d_in, n_layers, d_hidden, d_model)
    out = jax.block_until_ready(mlp_forward(x, params))
    ref = mlp_reference(x, params)
    assert out.shape == (batch, reshape_size, d_model), out.shape
    assert jnp.allclose(out, ref, atol=1e-5, rtol=1e-5), float(jnp.max(jnp.abs(out - ref)))

    # 2) Non-trivial numeric check (random weights/biases everywhere), bf16-weight tolerance.
    vparams = random_mlp_params(k_val, d_in, n_layers, d_hidden, d_model)
    out_v = jax.block_until_ready(mlp_forward(x, vparams))
    ref_v = mlp_reference(x, vparams)
    err = float(jnp.max(jnp.abs(out_v - ref_v)))
    scale = float(jnp.max(jnp.abs(ref_v)))
    assert err <= 5e-2 * max(scale, 1.0), (err, scale)

    print("KERNEL_OK")
</pallas_src>

<mosaic_0001>
module attributes {stable_mosaic.version = 11 : i64} {
  func.func @_fused_mlp_kernel(%arg0: i32, %arg1: memref<24x300xf32, #tpu.memory_space<vmem>>, %arg2: memref<384x512xbf16, #tpu.memory_space<vmem>>, %arg3: memref<1x512xf32, #tpu.memory_space<vmem>>, %arg4: memref<4x512x512xbf16, #tpu.memory_space<vmem>>, %arg5: memref<4x1x512xf32, #tpu.memory_space<vmem>>, %arg6: memref<512x128xbf16, #tpu.memory_space<vmem>>, %arg7: memref<1x128xf32, #tpu.memory_space<vmem>>, %arg8: memref<24x128xf32, #tpu.memory_space<vmem>>, %arg9: memref<24x384xf32, #tpu.memory_space<vmem>>) attributes {dimension_semantics = [#tpu.dimension_semantics<parallel>], iteration_bounds = array<i64: 1>, scalar_prefetch = 0 : i64, scratch_operands = 1 : i64, tpu.core_type = #tpu.core_type<tc>, window_params = [{transform_indices = @transform_0, window_bounds = array<i64: 24, 300>}, {pipeline_mode = #tpu.pipeline_mode<synchronous>, transform_indices = @transform_1, window_bounds = array<i64: 384, 512>}, {pipeline_mode = #tpu.pipeline_mode<synchronous>, transform_indices = @transform_2, window_bounds = array<i64: 1, 512>}, {pipeline_mode = #tpu.pipeline_mode<synchronous>, transform_indices = @transform_3, window_bounds = array<i64: 4, 512, 512>}, {pipeline_mode = #tpu.pipeline_mode<synchronous>, transform_indices = @transform_4, window_bounds = array<i64: 4, 1, 512>}, {pipeline_mode = #tpu.pipeline_mode<synchronous>, transform_indices = @transform_5, window_bounds = array<i64: 512, 128>}, {pipeline_mode = #tpu.pipeline_mode<synchronous>, transform_indices = @transform_6, window_bounds = array<i64: 1, 128>}, {transform_indices = @transform_7, window_bounds = array<i64: 24, 128>}]} {
    %cst = arith.constant 0.000000e+00 : f32
    %0 = vector.broadcast %cst : f32 to vector<24x384xf32>
    %c0 = arith.constant 0 : index
    %c0_0 = arith.constant 0 : index
    %1 = vector.load %arg9[%c0, %c0_0] : memref<24x384xf32, #tpu.memory_space<vmem>>, vector<24x384xf32>
    tpu.vector_store %arg9[%c0, %c0_0], %0 {strides = array<i32>} : memref<24x384xf32, #tpu.memory_space<vmem>>, vector<24x384xf32>,
    %c0_1 = arith.constant 0 : index
    %c0_2 = arith.constant 0 : index
    %2 = vector.load %arg1[%c0_1, %c0_2] : memref<24x300xf32, #tpu.memory_space<vmem>>, vector<24x300xf32>
    %c0_3 = arith.constant 0 : index
    %c0_4 = arith.constant 0 : index
    %3 = vector.load %arg9[%c0_3, %c0_4] : memref<24x384xf32, #tpu.memory_space<vmem>>, vector<24x300xf32>
    tpu.vector_store %arg9[%c0_3, %c0_4], %2 {strides = array<i32>} : memref<24x384xf32, #tpu.memory_space<vmem>>, vector<24x300xf32>,
    %c0_5 = arith.constant 0 : index
    %c0_6 = arith.constant 0 : index
    %4 = vector.load %arg9[%c0_5, %c0_6] : memref<24x384xf32, #tpu.memory_space<vmem>>, vector<24x384xf32>
    %5 = arith.truncf %4 : vector<24x384xf32> to vector<24x384xbf16>
    %c0_7 = arith.constant 0 : index
    %c0_8 = arith.constant 0 : index
    %6 = vector.load %arg2[%c0_7, %c0_8] : memref<384x512xbf16, #tpu.memory_space<vmem>>, vector<384x512xbf16>
    %cst_9 = arith.constant dense<0.000000e+00> : vector<24x512xf32>
    %7 = tpu.matmul %5, %6, %cst_9 {dimension_numbers = #tpu.dot_dimension_numbers<[1], [0], [0], [1], [0, 0, 1, 1], [], []>} : vector<24x384xbf16>, vector<384x512xbf16>, vector<24x512xf32> -> vector<24x512xf32>
    %c0_10 = arith.constant 0 : index
    %c0_11 = arith.constant 0 : index
    %8 = vector.load %arg3[%c0_10, %c0_11] : memref<1x512xf32, #tpu.memory_space<vmem>>, vector<1x512xf32>
    %9 = vector.broadcast %8 : vector<1x512xf32> to vector<24x512xf32>
    %10 = arith.addf %7, %9 : vector<24x512xf32>
    %cst_12 = arith.constant 0.000000e+00 : f32
    %11 = vector.broadcast %cst_12 : f32 to vector<24x512xf32>
    %12 = arith.maximumf %10, %11 : vector<24x512xf32>
    %13 = arith.truncf %12 : vector<24x512xf32> to vector<24x512xbf16>
    %c0_13 = arith.constant 0 : index
    %c0_14 = arith.constant 0 : index
    %c0_15 = arith.constant 0 : index
    %14 = vector.load %arg4[%c0_13, %c0_14, %c0_15] : memref<4x512x512xbf16, #tpu.memory_space<vmem>>, vector<1x512x512xbf16>
    %15 = vector.shape_cast %14 : vector<1x512x512xbf16> to vector<512x512xbf16>
    %cst_16 = arith.constant dense<0.000000e+00> : vector<24x512xf32>
    %16 = tpu.matmul %13, %15, %cst_16 {dimension_numbers = #tpu.dot_dimension_numbers<[1], [0], [0], [1], [0, 0, 1, 1], [], []>} : vector<24x512xbf16>, vector<512x512xbf16>, vector<24x512xf32> -> vector<24x512xf32>
    %c0_17 = arith.constant 0 : index
    %c0_18 = arith.constant 0 : index
    %c0_19 = arith.constant 0 : index
    %17 = vector.load %arg5[%c0_17, %c0_18, %c0_19] : memref<4x1x512xf32, #tpu.memory_space<vmem>>, vector<1x1x512xf32>
    %18 = vector.shape_cast %17 : vector<1x1x512xf32> to vector<1x512xf32>
    %19 = vector.broadcast %18 : vector<1x512xf32> to vector<24x512xf32>
    %20 = arith.addf %16, %19 : vector<24x512xf32>
    %cst_20 = arith.constant 0.000000e+00 : f32
    %21 = vector.broadcast %cst_20 : f32 to vector<24x512xf32>
    %22 = arith.maximumf %20, %21 : vector<24x512xf32>
    %23 = arith.truncf %22 : vector<24x512xf32> to vector<24x512xbf16>
    %c1 = arith.constant 1 : index
    %c0_21 = arith.constant 0 : index
    %c0_22 = arith.constant 0 : index
    %24 = vector.load %arg4[%c1, %c0_21, %c0_22] : memref<4x512x512xbf16, #tpu.memory_space<vmem>>, vector<1x512x512xbf16>
    %25 = vector.shape_cast %24 : vector<1x512x512xbf16> to vector<512x512xbf16>
    %cst_23 = arith.constant dense<0.000000e+00> : vector<24x512xf32>
    %26 = tpu.matmul %23, %25, %cst_23 {dimension_numbers = #tpu.dot_dimension_numbers<[1], [0], [0], [1], [0, 0, 1, 1], [], []>} : vector<24x512xbf16>, vector<512x512xbf16>, vector<24x512xf32> -> vector<24x512xf32>
    %c1_24 = arith.constant 1 : index
    %c0_25 = arith.constant 0 : index
    %c0_26 = arith.constant 0 : index
    %27 = vector.load %arg5[%c1_24, %c0_25, %c0_26] : memref<4x1x512xf32, #tpu.memory_space<vmem>>, vector<1x1x512xf32>
    %28 = vector.shape_cast %27 : vector<1x1x512xf32> to vector<1x512xf32>
    %29 = vector.broadcast %28 : vector<1x512xf32> to vector<24x512xf32>
    %30 = arith.addf %26, %29 : vector<24x512xf32>
    %cst_27 = arith.constant 0.000000e+00 : f32
    %31 = vector.broadcast %cst_27 : f32 to vector<24x512xf32>
    %32 = arith.maximumf %30, %31 : vector<24x512xf32>
    %33 = arith.truncf %32 : vector<24x512xf32> to vector<24x512xbf16>
    %c2 = arith.constant 2 : index
    %c0_28 = arith.constant 0 : index
    %c0_29 = arith.constant 0 : index
    %34 = vector.load %arg4[%c2, %c0_28, %c0_29] : memref<4x512x512xbf16, #tpu.memory_space<vmem>>, vector<1x512x512xbf16>
    %35 = vector.shape_cast %34 : vector<1x512x512xbf16> to vector<512x512xbf16>
    %cst_30 = arith.constant dense<0.000000e+00> : vector<24x512xf32>
    %36 = tpu.matmul %33, %35, %cst_30 {dimension_numbers = #tpu.dot_dimension_numbers<[1], [0], [0], [1], [0, 0, 1, 1], [], []>} : vector<24x512xbf16>, vector<512x512xbf16>, vector<24x512xf32> -> vector<24x512xf32>
    %c2_31 = arith.constant 2 : index
    %c0_32 = arith.constant 0 : index
    %c0_33 = arith.constant 0 : index
    %37 = vector.load %arg5[%c2_31, %c0_32, %c0_33] : memref<4x1x512xf32, #tpu.memory_space<vmem>>, vector<1x1x512xf32>
    %38 = vector.shape_cast %37 : vector<1x1x512xf32> to vector<1x512xf32>
    %39 = vector.broadcast %38 : vector<1x512xf32> to vector<24x512xf32>
    %40 = arith.addf %36, %39 : vector<24x512xf32>
    %cst_34 = arith.constant 0.000000e+00 : f32
    %41 = vector.broadcast %cst_34 : f32 to vector<24x512xf32>
    %42 = arith.maximumf %40, %41 : vector<24x512xf32>
    %43 = arith.truncf %42 : vector<24x512xf32> to vector<24x512xbf16>
    %c3 = arith.constant 3 : index
    %c0_35 = arith.constant 0 : index
    %c0_36 = arith.constant 0 : index
    %44 = vector.load %arg4[%c3, %c0_35, %c0_36] : memref<4x512x512xbf16, #tpu.memory_space<vmem>>, vector<1x512x512xbf16>
    %45 = vector.shape_cast %44 : vector<1x512x512xbf16> to vector<512x512xbf16>
    %cst_37 = arith.constant dense<0.000000e+00> : vector<24x512xf32>
    %46 = tpu.matmul %43, %45, %cst_37 {dimension_numbers = #tpu.dot_dimension_numbers<[1], [0], [0], [1], [0, 0, 1, 1], [], []>} : vector<24x512xbf16>, vector<512x512xbf16>, vector<24x512xf32> -> vector<24x512xf32>
    %c3_38 = arith.constant 3 : index
    %c0_39 = arith.constant 0 : index
    %c0_40 = arith.constant 0 : index
    %47 = vector.load %arg5[%c3_38, %c0_39, %c0_40] : memref<4x1x512xf32, #tpu.memory_space<vmem>>, vector<1x1x512xf32>
    %48 = vector.shape_cast %47 : vector<1x1x512xf32> to vector<1x512xf32>
    %49 = vector.broadcast %48 : vector<1x512xf32> to vector<24x512xf32>
    %50 = arith.addf %46, %49 : vector<24x512xf32>
    %cst_41 = arith.constant 0.000000e+00 : f32
    %51 = vector.broadcast %cst_41 : f32 to vector<24x512xf32>
    %52 = arith.maximumf %50, %51 : vector<24x512xf32>
    %53 = arith.truncf %52 : vector<24x512xf32> to vector<24x512xbf16>
    %c0_42 = arith.constant 0 : index
    %c0_43 = arith.constant 0 : index
    %54 = vector.load %arg6[%c0_42, %c0_43] : memref<512x128xbf16, #tpu.memory_space<vmem>>, vector<512x128xbf16>
    %cst_44 = arith.constant dense<0.000000e+00> : vector<24x128xf32>
    %55 = tpu.matmul %53, %54, %cst_44 {dimension_numbers = #tpu.dot_dimension_numbers<[1], [0], [0], [1], [0, 0, 1, 1], [], []>} : vector<24x512xbf16>, vector<512x128xbf16>, vector<24x128xf32> -> vector<24x128xf32>
    %c0_45 = arith.constant 0 : index
    %c0_46 = arith.constant 0 : index
    %56 = vector.load %arg7[%c0_45, %c0_46] : memref<1x128xf32, #tpu.memory_space<vmem>>, vector<1x128xf32>
    %57 = vector.broadcast %56 : vector<1x128xf32> to vector<24x128xf32>
    %58 = arith.addf %55, %57 : vector<24x128xf32>
    %c0_47 = arith.constant 0 : index
    %c0_48 = arith.constant 0 : index
    %59 = vector.load %arg8[%c0_47, %c0_48] : memref<24x128xf32, #tpu.memory_space<vmem>>, vector<24x128xf32>
    tpu.vector_store %arg8[%c0_47, %c0_48], %58 {strides = array<i32>} : memref<24x128xf32, #tpu.memory_space<vmem>>, vector<24x128xf32>,
    return
  }
  func.func @transform_0(%arg0: i32) -> (i32, i32) {
    %c0_i32 = arith.constant 0 : i32
    %c0_i32_0 = arith.constant 0 : i32
    return %arg0, %c0_i32 : i32, i32
  }
  func.func @transform_1(%arg0: i32) -> (i32, i32) {
    %c0_i32 = arith.constant 0 : i32
    %c0_i32_0 = arith.constant 0 : i32
    %c0_i32_1 = arith.constant 0 : i32
    return %c0_i32, %c0_i32_0 : i32, i32
  }
  func.func @transform_2(%arg0: i32) -> (i32, i32) {
    %c0_i32 = arith.constant 0 : i32
    %c0_i32_0 = arith.constant 0 : i32
    %c0_i32_1 = arith.constant 0 : i32
    return %c0_i32, %c0_i32_0 : i32, i32
  }
  func.func @transform_3(%arg0: i32) -> (i32, i32, i32) {
    %c0_i32 = arith.constant 0 : i32
    %c0_i32_0 = arith.constant 0 : i32
    %c0_i32_1 = arith.constant 0 : i32
    %c0_i32_2 = arith.constant 0 : i32
    return %c0_i32, %c0_i32_0, %c0_i32_1 : i32, i32, i32
  }
  func.func @transform_4(%arg0: i32) -> (i32, i32, i32) {
    %c0_i32 = arith.constant 0 : i32
    %c0_i32_0 = arith.constant 0 : i32
    %c0_i32_1 = arith.constant 0 : i32
    %c0_i32_2 = arith.constant 0 : i32
    return %c0_i32, %c0_i32_0, %c0_i32_1 : i32, i32, i32
  }
  func.func @transform_5(%arg0: i32) -> (i32, i32) {
    %c0_i32 = arith.constant 0 : i32
    %c0_i32_0 = arith.constant 0 : i32
    %c0_i32_1 = arith.constant 0 : i32
    return %c0_i32, %c0_i32_0 : i32, i32
  }
  func.func @transform_6(%arg0: i32) -> (i32, i32) {
    %c0_i32 = arith.constant 0 : i32
    %c0_i32_0 = arith.constant 0 : i32
    %c0_i32_1 = arith.constant 0 : i32
    return %c0_i32, %c0_i32_0 : i32, i32
  }
  func.func @transform_7(%arg0: i32) -> (i32, i32) {
    %c0_i32 = arith.constant 0 : i32
    %c0_i32_0 = arith.constant 0 : i32
    return %arg0, %c0_i32 : i32, i32
  }
}

</mosaic_0001>

<bundles_post_ra>
// kernel: tpu_custom_call.1
= control target key start
LH: loop header
LB: loop body
LE: loop exit
PB: predicated region body
PF: predicated region fallthrough
CT: control target
= control target key end

     0   :  { %12 = vsyncpa [#allocation4], 0  ;;  %s7708_s0 = inlined_call_operand.hbm [shape: f32[24,300], index: 0, kind: input, shape index: {}]   ;;  %s7709_s1 = inlined_call_operand.hbm [shape: bf16[384,512], index: 1, kind: input, shape index: {}]   ;;  %s7710_s2 = inlined_call_operand.hbm [shape: f32[1,512], index: 2, kind: input, shape index: {}]   ;;  %s7711_s3 = inlined_call_operand.hbm [shape: bf16[4,512,512], index: 3, kind: input, shape index: {}]   ;;  %s7712_s4 = inlined_call_operand.hbm [shape: f32[4,1,512], index: 4, kind: input, shape index: {}]   ;;  %s7713_s5 = inlined_call_operand.hbm [shape: bf16[512,128], index: 5, kind: input, shape index: {}]   ;;  %s7714_s6 = inlined_call_operand.hbm [shape: f32[1,128], index: 6, kind: input, shape index: {}]   ;;  %s7715_s7 = inlined_call_operand.hbm [shape: f32[24,128], index: 7, kind: output, shape index: {}]  }
   0x1   :  { %13 = vsyncpa [#allocation7], 0 }
   0x2   :  { %14 = vsyncpa [#allocation10], 0 }
   0x3   :  { %15 = vsyncpa [#allocation13], 0 }
   0x4   :  { %16 = vsyncpa [#allocation5], 0  ;;  %s7413_s24 = smov [#allocation6]   ;;  %s7227_s28 = scalar_lea.hbm %s7709_s1, 12288 }
   0x5   :  { %s34_s25 = sshll.u32 %s7413_s24, 4  ;;  %p7228_p0 = scmp.ne.s32.totalorder %s7709_s1, %s7227_s28  ;;  %s35_s25 = int_to_ptr.vmem [resolvable:$true] %s34_s25 }
   0x6   :  { %p7231_p1 = scmp.lt.u32.totalorder %s7227_s28, %s7709_s1 }
   0x8   :  { %p7233_p2 = pnand %p7231_p1, %p7228_p0 }
   0xa   :  { %7236 = shalt.err (!%p7233_p2)
}
   0xb   :  { %s7237_s10 = scalar_lea.vmem %s35_s25, 12288  ;;  %p7242_p4 = scmp.lt.s32.totalorder %s35_s25, %s35_s25 }
   0xc   :  { %p7238_p3 = scmp.ne.s32.totalorder %s35_s25, %s7237_s10  ;;  %p7243_p5 = scmp.lt.s32.totalorder %s7237_s10, %s7237_s10 }
   0xe   :  { %p7244_p6 = por %p7243_p5, %p7242_p4 }
  0x10   :  { %p7245_p7 = pnand %p7244_p6, %p7238_p3 }
  0x12   :  { %7248 = shalt.err (!%p7245_p7)
}
  0x13   :  { %s7414_s11 = smov 256   ;;  %s7415_s12 = smov 16  }
  0x14   :  { %40 = dma.hbm_to_vmem [thread:$0]  %s7709_s1, 12288, %s35_s25, [#allocation7], %s7414_s11, %s7414_s11, %s7415_s12  }
  0x15   :  { %s7416_s15 = smov [#allocation9]   ;;  %s7249_s19 = scalar_lea.hbm %s7711_s3, 65536 }
  0x16   :  { %s56_s16 = sshll.u32 %s7416_s15, 4  ;;  %p7250_p8 = scmp.ne.s32.totalorder %s7711_s3, %s7249_s19  ;;  %s57_s16 = int_to_ptr.vmem [resolvable:$true] %s56_s16 }
  0x17   :  { %p7253_p9 = scmp.lt.u32.totalorder %s7249_s19, %s7711_s3 }
  0x19   :  { %p7255_p10 = pnand %p7253_p9, %p7250_p8 }
  0x1b   :  { %7258 = shalt.err (!%p7255_p10)
}
  0x1c   :  { %s7259_s24 = scalar_lea.vmem %s57_s16, 65536  ;;  %p7264_p12 = scmp.lt.s32.totalorder %s57_s16, %s57_s16 }
  0x1d   :  { %p7260_p11 = scmp.ne.s32.totalorder %s57_s16, %s7259_s24  ;;  %p7265_p13 = scmp.lt.s32.totalorder %s7259_s24, %s7259_s24 }
  0x1f   :  { %p7266_p0 = por %p7265_p13, %p7264_p12 }
  0x21   :  { %p7267_p1 = pnand %p7266_p0, %p7260_p11 }
  0x23   :  { %7270 = shalt.err (!%p7267_p1)
}
  0x24   :  { %62 = dma.hbm_to_vmem [thread:$0]  %s7711_s3, 65536, %s57_s16, [#allocation10], %s7414_s11, %s7414_s11, %s7415_s12  }
  0x25   :  { %s7417_s26 = smov [#allocation12]   ;;  %s7418_s28 = smov [#allocation3]  }
  0x26   :  { %s80_s27 = sshll.u32 %s7417_s26, 4  ;;  %s22_s29 = sshll.u32 %s7418_s28, 4  ;;  %s81_s27 = int_to_ptr.vmem [resolvable:$true] %s80_s27  ;;  %s7495_s29 = int_to_ptr.vmem [resolvable:$true] %s22_s29 }
  0x27   :  { %s7271_s9 = scalar_lea.hbm %s7713_s5, 4096 }
  0x28   :  { %p7272_p2 = scmp.ne.s32.totalorder %s7713_s5, %s7271_s9  ;;  %p7275_p3 = scmp.lt.u32.totalorder %s7271_s9, %s7713_s5 }
  0x2a   :  { %p7277_p4 = pnand %p7275_p3, %p7272_p2 }
  0x2c   :  { %7280 = shalt.err (!%p7277_p4)
}
  0x2d   :  { %s7281_s3 = scalar_lea.vmem %s81_s27, 4096  ;;  %p7286_p6 = scmp.lt.s32.totalorder %s81_s27, %s81_s27 }
  0x2e   :  { %p7282_p5 = scmp.ne.s32.totalorder %s81_s27, %s7281_s3  ;;  %p7287_p7 = scmp.lt.s32.totalorder %s7281_s3, %s7281_s3 }
  0x30   :  { %p7288_p8 = por %p7287_p7, %p7286_p6 }
  0x32   :  { %p7289_p9 = pnand %p7288_p8, %p7282_p5 }
  0x34   :  { %7292 = shalt.err (!%p7289_p9)
}
  0x35   :  { %s7419_s11 = smov 64   ;;  %s7420_s12 = smov 4  }
  0x36   :  { %86 = dma.hbm_to_vmem [thread:$0]  %s7713_s5, 4096, %s81_s27, [#allocation13], %s7419_s11, %s7419_s11, %s7420_s12  }
  0x37   :  { %s7293_s20 = scalar_lea.hbm %s7708_s0, 1152 }
  0x38   :  { %p7294_p10 = scmp.ne.s32.totalorder %s7708_s0, %s7293_s20  ;;  %p7297_p11 = scmp.lt.u32.totalorder %s7293_s20, %s7708_s0 }
  0x3a   :  { %p7299_p12 = pnand %p7297_p11, %p7294_p10 }
  0x3c   :  { %7302 = shalt.err (!%p7299_p12)
}
  0x3d   :  { %s7303_s1 = scalar_lea.vmem %s7495_s29, 1152  ;;  %p7308_p0 = scmp.lt.s32.totalorder %s7495_s29, %s7495_s29 }
  0x3e   :  { %p7304_p13 = scmp.ne.s32.totalorder %s7495_s29, %s7303_s1  ;;  %p7309_p1 = scmp.lt.s32.totalorder %s7303_s1, %s7303_s1 }
  0x40   :  { %p7310_p2 = por %p7309_p1, %p7308_p0 }
  0x42   :  { %p7311_p3 = pnand %p7310_p2, %p7304_p13 }
  0x44   :  { %7314 = shalt.err (!%p7311_p3)
}
  0x45   :  { %s7421_s5 = smov 384   ;;  %s7422_s25 = smov 24  }
  0x46   :  { %28 = dma.hbm_to_vmem [thread:$0]  %s7708_s0, 1152, %s7495_s29, [#allocation4], %s7421_s5, %s7421_s5, %s7422_s25  }
  0x47   :  { %s7423_s28 = smov [#allocation8]   ;;  %s7424_s8 = smov [#allocation11]  }
  0x48   :  { %s47_s30 = sshll.u32 %s7423_s28, 4  ;;  %s68_s9 = sshll.u32 %s7424_s8, 4  ;;  %s48_s30 = int_to_ptr.vmem [resolvable:$true] %s47_s30  ;;  %s7529_s9 = int_to_ptr.vmem [resolvable:$true] %s68_s9 }
  0x49   :  { %s7315_s14 = scalar_lea.hbm %s7710_s2, 64 }
  0x4a   :  { %p7316_p4 = scmp.ne.s32.totalorder %s7710_s2, %s7315_s14  ;;  %p7319_p5 = scmp.lt.u32.totalorder %s7315_s14, %s7710_s2 }
  0x4c   :  { %p7321_p6 = pnand %p7319_p5, %p7316_p4 }
  0x4e   :  { %7324 = shalt.err (!%p7321_p6)
}
  0x4f   :  { %s7325_s0 = scalar_lea.vmem %s48_s30, 64  ;;  %p7330_p8 = scmp.lt.s32.totalorder %s48_s30, %s48_s30 }
  0x50   :  { %p7326_p7 = scmp.ne.s32.totalorder %s48_s30, %s7325_s0  ;;  %p7331_p9 = scmp.lt.s32.totalorder %s7325_s0, %s7325_s0 }
  0x52   :  { %p7332_p10 = por %p7331_p9, %p7330_p8 }
  0x54   :  { %p7333_p11 = pnand %p7332_p10, %p7326_p7 }
  0x56   :  { %7336 = shalt.err (!%p7333_p11)
}
  0x57   :  { %50 = dma.hbm_to_vmem [thread:$0]  %s7710_s2, 64, %s48_s30, [#allocation7]  }
  0x58   :  { %s7337_s21 = scalar_lea.hbm %s7712_s4, 256 }
  0x59   :  { %p7338_p12 = scmp.ne.s32.totalorder %s7712_s4, %s7337_s21  ;;  %p7341_p13 = scmp.lt.u32.totalorder %s7337_s21, %s7712_s4 }
  0x5b   :  { %p7343_p0 = pnand %p7341_p13, %p7338_p12 }
  0x5d   :  { %7346 = shalt.err (!%p7343_p0)
}
  0x5e   :  { %s7347_s5 = scalar_lea.vmem %s7529_s9, 256  ;;  %p7352_p2 = scmp.lt.s32.totalorder %s7529_s9, %s7529_s9 }
  0x5f   :  { %p7348_p1 = scmp.ne.s32.totalorder %s7529_s9, %s7347_s5  ;;  %p7353_p3 = scmp.lt.s32.totalorder %s7347_s5, %s7347_s5 }
  0x61   :  { %p7354_p4 = por %p7353_p3, %p7352_p2 }
  0x63   :  { %p7355_p5 = pnand %p7354_p4, %p7348_p1 }
  0x65   :  { %7358 = shalt.err (!%p7355_p5)
}
  0x66   :  { %74 = dma.hbm_to_vmem [thread:$0]  %s7712_s4, 256, %s7529_s9, [#allocation10], %s7419_s11, %s7419_s11, %s7420_s12  }
  0x67   :  { %s7425_s26 = smov [#allocation14]   ;;  %s7359_s8 = scalar_lea.hbm %s7714_s6, 16 }
  0x68   :  { %s93_s27 = sshll.u32 %s7425_s26, 4  ;;  %p7360_p6 = scmp.ne.s32.totalorder %s7714_s6, %s7359_s8  ;;  %s94_s27 = int_to_ptr.vmem [resolvable:$true] %s93_s27 }
  0x69   :  { %p7363_p7 = scmp.lt.u32.totalorder %s7359_s8, %s7714_s6 }
  0x6b   :  { %p7365_p8 = pnand %p7363_p7, %p7360_p6 }
  0x6d   :  { %7368 = shalt.err (!%p7365_p8)
}
  0x6e   :  { %s7369_s3 = scalar_lea.vmem %s94_s27, 16  ;;  %s7373_s4 = scalar_lea.vmem %s94_s27, 32 }
  0x6f   :  { %p7370_p9 = scmp.ne.s32.totalorder %s94_s27, %s7369_s3  ;;  %p7374_p10 = scmp.lt.s32.totalorder %s94_s27, %s94_s27 }
  0x70   :  { %p7375_p11 = scmp.lt.s32.totalorder %s7373_s4, %s7369_s3 }
  0x72   :  { %p7376_p12 = por %p7375_p11, %p7374_p10 }
  0x74   :  { %p7377_p13 = pnand %p7376_p12, %p7370_p9 }
  0x76   :  { %7380 = shalt.err (!%p7377_p13)
}
  0x77   :  { %96 = dma.hbm_to_vmem [thread:$0]  %s7714_s6, 16, %s94_s27, [#allocation13]  }
  0x78   :  { %7403 = dma.done.wait [#allocation4], 1152  }
  0x79   :  { %7404 = vsyncadd [#allocation4], 4294966144 }
  0x7a   :  { %7405 = dma.done.wait [#allocation7], 12352  }
  0x7b   :  { %7406 = vsyncadd [#allocation7], 4294954944 }
  0x7c   :  { %7407 = dma.done.wait [#allocation10], 65792  }
  0x7d   :  { %7408 = vsyncadd [#allocation10], 4294901504 }
  0x7e   :  { %7409 = dma.done.wait [#allocation13], 4112  }
  0x7f   :  { %7410 = vsyncadd [#allocation13], 4294963184  ;;  %v7426_v0 = vmov 0.0   ;;  %v6283_v1 = vld [vmem:[#allocation6 + $0x4] ss:$16 sps:$4 sm:$0xff]   ;;  %v132_v35 = vld [vmem:[#allocation3 + $0x20] sm:$0xff] }
  0x80   :  { %121 = vst [vmem:[#allocation2 + $0x10] sm:$0xff] %v7426_v0  ;;  %124 = vst [vmem:[#allocation2 + $0x28] sm:$0xff] %v7426_v0  ;;  %v6285_v2 = vld [vmem:[#allocation6] ss:$16 sps:$4 sm:$0xff]   ;;  %760 = vmatprep.subr.bf16.mxu0 %v6283_v1  ;;  %v6286_v3 = vld [vmem:[#allocation6 + $0x24] ss:$16 sps:$4 sm:$0xff]  }
  0x81   :  { %127 = vst [vmem:[#allocation2 + $0x40] sm:$0xff] %v7426_v0  ;;  %761 = vmatpush1.bf16.msra.mxu0 %v6285_v2  ;;  %v6288_v4 = vld [vmem:[#allocation6 + $0x20] ss:$16 sps:$4 sm:$0xff]   ;;  %v6289_v5 = vld [vmem:[#allocation6 + $0x44] ss:$16 sps:$4 sm:$0xff]   ;;  %v7575_v39 = vld [vmem:[#allocation3] sm:$0xff] }
  0x82   :  { %762 = vmatprep.subr.bf16.mxu0 %v6286_v3  ;;  %v6291_v6 = vld [vmem:[#allocation6 + $0x40] ss:$16 sps:$4 sm:$0xff]   ;;  %v6292_v7 = vld [vmem:[#allocation6 + $0x64] ss:$16 sps:$4 sm:$0xff]   ;;  %v6307_v9 = vld [vmem:[#allocation6 + $0xc] ss:$16 sps:$4 sm:$0xff]  }
  0x83   :  { %v6294_v8 = vld [vmem:[#allocation6 + $0x60] ss:$16 sps:$4 sm:$0xff]   ;;  %v6309_v10 = vld [vmem:[#allocation6 + $0x8] ss:$16 sps:$4 sm:$0xff]   ;;  %v6295_v11 = vld [vmem:[#allocation6 + $0x84] ss:$16 sps:$4 sm:$0xff]   ;;  %862 = vmatprep.subr.bf16.mxu1 %v6307_v9 }
  0x84   :  { %863 = vmatpush1.bf16.msra.mxu1 %v6309_v10  ;;  %v6313_v12 = vld [vmem:[#allocation6 + $0x2c] ss:$16 sps:$4 sm:$0xff]   ;;  %v6315_v13 = vld [vmem:[#allocation6 + $0x28] ss:$16 sps:$4 sm:$0xff]   ;;  %v6297_v14 = vld [vmem:[#allocation6 + $0x80] ss:$16 sps:$4 sm:$0xff]  }
  0x85   :  { %763 = vmatpush1.bf16.msra.mxu0 %v6288_v4  ;;  %v6298_v15 = vld [vmem:[#allocation6 + $0xa4] ss:$16 sps:$4 sm:$0xff]   ;;  %864 = vmatprep.subr.bf16.mxu1 %v6313_v12  ;;  %v6319_v16 = vld [vmem:[#allocation6 + $0x4c] ss:$16 sps:$4 sm:$0xff]   ;;  %v6321_v17 = vld [vmem:[#allocation6 + $0x48] ss:$16 sps:$4 sm:$0xff]  }
  0x86   :  { %764 = vmatprep.subr.bf16.mxu0 %v6289_v5  ;;  %v6300_v18 = vld [vmem:[#allocation6 + $0xa0] ss:$16 sps:$4 sm:$0xff]   ;;  %v6325_v19 = vld [vmem:[#allocation6 + $0x6c] ss:$16 sps:$4 sm:$0xff]   ;;  %v6301_v20 = vld [vmem:[#allocation6 + $0xc4] ss:$16 sps:$4 sm:$0xff]  }
  0x87   :  { %v6327_v21 = vld [vmem:[#allocation6 + $0x68] ss:$16 sps:$4 sm:$0xff]   ;;  %v6303_v22 = vld [vmem:[#allocation6 + $0xc0] ss:$16 sps:$4 sm:$0xff]   ;;  %v6331_v23 = vld [vmem:[#allocation6 + $0x8c] ss:$16 sps:$4 sm:$0xff]  }
  0x88   :  { %865 = vmatpush1.bf16.msra.mxu1 %v6315_v13  ;;  %v6304_v24 = vld [vmem:[#allocation6 + $0xe4] ss:$16 sps:$4 sm:$0xff]   ;;  %v6333_v25 = vld [vmem:[#allocation6 + $0x88] ss:$16 sps:$4 sm:$0xff]   ;;  %v6306_v26 = vld [vmem:[#allocation6 + $0xe0] ss:$16 sps:$4 sm:$0xff]  }
  0x89   :  { %765 = vmatpush1.bf16.msra.mxu0 %v6291_v6  ;;  %866 = vmatprep.subr.bf16.mxu1 %v6319_v16  ;;  %v6337_v27 = vld [vmem:[#allocation6 + $0xac] ss:$16 sps:$4 sm:$0xff]   ;;  %v6310_v28 = vld [vmem:[#allocation6 + $0x104] ss:$16 sps:$4 sm:$0xff]   ;;  %v6339_v29 = vld [vmem:[#allocation6 + $0xa8] ss:$16 sps:$4 sm:$0xff]  }
  0x8a   :  { %766 = vmatprep.subr.bf16.mxu0 %v6292_v7  ;;  %v6312_v30 = vld [vmem:[#allocation6 + $0x100] ss:$16 sps:$4 sm:$0xff]   ;;  %v6343_v31 = vld [vmem:[#allocation6 + $0xcc] ss:$16 sps:$4 sm:$0xff]   ;;  %v6316_v32 = vld [vmem:[#allocation6 + $0x124] ss:$16 sps:$4 sm:$0xff]  }
  0x8b   :  { %v6318_v33 = vld [vmem:[#allocation6 + $0x120] ss:$16 sps:$4 sm:$0xff]   ;;  %v6345_v36 = vld [vmem:[#allocation6 + $0xc8] ss:$16 sps:$4 sm:$0xff]   ;;  %v6349_v38 = vld [vmem:[#allocation6 + $0xec] ss:$16 sps:$4 sm:$0xff]  }
  0x8c   :  { %867 = vmatpush1.bf16.msra.mxu1 %v6321_v17  ;;  %v129_v34 = vld [vmem:[#allocation3 + $0x8] sm:$0xff]  ;;  %v7577_v40 = vld [vmem:[#allocation3 + $0x18] sm:$0xff]  ;;  %v6351_v42 = vld [vmem:[#allocation6 + $0xe8] ss:$16 sps:$4 sm:$0xff]   ;;  %vm139_vm0 = vcmask 359424   ;;  %s7428_s6 = smov [#allocation15]  }
  0x8d   :  { %767 = vmatpush1.bf16.msra.mxu0 %v6294_v8  ;;  %868 = vmatprep.subr.bf16.mxu1 %v6325_v19  ;;  %v157_v37 = vpack.c.bf16 %v132_v35, %v129_v34  ;;  %v6322_v41 = vld [vmem:[#allocation6 + $0x144] ss:$16 sps:$4 sm:$0xff]   ;;  %v6324_v43 = vld [vmem:[#allocation6 + $0x140] ss:$16 sps:$4 sm:$0xff]   ;;  %v6355_v44 = vld [vmem:[#allocation6 + $0x10c] ss:$16 sps:$4 sm:$0xff]   ;;  %v156_v8 = vpack.c.bf16 %v7577_v40, %v7575_v39 }
  0x8e   :  { %768 = vmatprep.subr.bf16.mxu0 %v6295_v11  ;;  %v6328_v45 = vld [vmem:[#allocation6 + $0x164] ss:$16 sps:$4 sm:$0xff]   ;;  %v6357_v46 = vld [vmem:[#allocation6 + $0x108] ss:$16 sps:$4 sm:$0xff]   ;;  %v6330_v47 = vld [vmem:[#allocation6 + $0x160] ss:$16 sps:$4 sm:$0xff]  }
  0x8f   :  { %792 = vmatprep.mubr.bf16.mxu0 %v157_v37  ;;  %894 = vmatprep.mubr.bf16.mxu1 %v157_v37  ;;  %v6361_v48 = vld [vmem:[#allocation6 + $0x12c] ss:$16 sps:$4 sm:$0xff]   ;;  %v6334_v49 = vld [vmem:[#allocation6 + $0x184] ss:$16 sps:$4 sm:$0xff]   ;;  %v6363_v50 = vld [vmem:[#allocation6 + $0x128] ss:$16 sps:$4 sm:$0xff]  }
  0x90   :  { %869 = vmatpush1.bf16.msra.mxu1 %v6327_v21  ;;  %v6336_v51 = vld [vmem:[#allocation6 + $0x180] ss:$16 sps:$4 sm:$0xff]   ;;  %v6367_v52 = vld [vmem:[#allocation6 + $0x14c] ss:$16 sps:$4 sm:$0xff]   ;;  %v6340_v53 = vld [vmem:[#allocation6 + $0x1a4] ss:$16 sps:$4 sm:$0xff]  }
  0x91   :  { %769 = vmatpush1.bf16.msra.mxu0 %v6297_v14  ;;  %870 = vmatprep.subr.bf16.mxu1 %v6331_v23  ;;  %v6342_v54 = vld [vmem:[#allocation6 + $0x1a0] ss:$16 sps:$4 sm:$0xff]   ;;  %v6369_v55 = vld [vmem:[#allocation6 + $0x148] ss:$16 sps:$4 sm:$0xff]   ;;  %v6373_v56 = vld [vmem:[#allocation6 + $0x16c] ss:$16 sps:$4 sm:$0xff]  }
  0x92   :  { %770 = vmatprep.subr.bf16.mxu0 %v6298_v15  ;;  %v135_v57 = vld [vmem:[#allocation3 + $0x38] sm:$0xff]  ;;  %v134_v58 = vld [vmem:[#allocation3 + $0x30] sm:$0xff]  ;;  %v133_v1 = vld [vmem:[#allocation3 + $0x28] sm:$0xff]  ;;  %s5413_s9 = sshll.u32 %s7428_s6, 4  ;;  %s5414_s9 = int_to_ptr.vmem [resolvable:$true] %s5413_s9 }
  0x93   :  { %v6346_v59 = vld [vmem:[#allocation6 + $0x1c4] ss:$16 sps:$4 sm:$0xff]   ;;  %v6348_v60 = vld [vmem:[#allocation6 + $0x1c0] ss:$16 sps:$4 sm:$0xff]   ;;  %v6375_v61 = vld [vmem:[#allocation6 + $0x168] ss:$16 sps:$4 sm:$0xff]   ;;  %v160_v12 = vpack.c.bf16 %v135_v57, %v135_v57  ;;  %v159_v17 = vpack.c.bf16 %v134_v58, %v134_v58  ;;  %p7386_p1 = scmp.lt.s32.totalorder %s5414_s9, %s5414_s9 }
  0x94   :  { %871 = vmatpush1.bf16.msra.mxu1 %v6333_v25  ;;  %v6379_v62 = vld [vmem:[#allocation6 + $0x18c] ss:$16 sps:$4 sm:$0xff]   ;;  %v6352_v63 = vld [vmem:[#allocation6 + $0x1e4] ss:$16 sps:$4 sm:$0xff]   ;;  %v6354_v2 = vld [vmem:[#allocation6 + $0x1e0] ss:$16 sps:$4 sm:$0xff]  }
  0x95   :  { %771 = vmatpush1.bf16.msra.mxu0 %v6300_v18  ;;  %872 = vmatprep.subr.bf16.mxu1 %v6337_v27  ;;  %v130_v0 = vld [vmem:[#allocation3 + $0x10] sm:$0xff]  ;;  %143 = vst.msk [vmem:[#allocation2 + $0x28] sm:$0xff] %vm139_vm0, %v133_v1  ;;  %v6360_v4 = vld [vmem:[#allocation6 + $0x204] ss:$16 sps:$4 sm:$0xff]   ;;  %v136_v6 = vld [vmem:[#allocation3 + $0x40] sm:$0xff]  ;;  %s7381_s16 = scalar_lea.vmem %s5414_s9, 384 }
  0x96   :  { %772 = vmatprep.subr.bf16.mxu0 %v6301_v20  ;;  %140 = vst.msk [vmem:[#allocation2 + $0x10] sm:$0xff] %vm139_vm0, %v130_v0  ;;  %v6381_v3 = vld [vmem:[#allocation6 + $0x188] ss:$16 sps:$4 sm:$0xff]   ;;  %v6385_v5 = vld [vmem:[#allocation6 + $0x1ac] ss:$16 sps:$4 sm:$0xff]   ;;  %146 = vst.msk [vmem:[#allocation2 + $0x40] sm:$0xff] %vm139_vm0, %v136_v6  ;;  %p7382_p0 = scmp.ne.s32.totalorder %s5414_s9, %s7381_s16  ;;  %p7387_p2 = scmp.lt.s32.totalorder %s7381_s16, %s7381_s16 }
  0x97   :  { %v6358_v7 = vld [vmem:[#allocation6 + $0x200] ss:$16 sps:$4 sm:$0xff]   ;;  %v6387_v9 = vld [vmem:[#allocation6 + $0x1a8] ss:$16 sps:$4 sm:$0xff]   ;;  %v6391_v10 = vld [vmem:[#allocation6 + $0x1cc] ss:$16 sps:$4 sm:$0xff]  }
  0x98   :  { %873 = vmatpush1.bf16.msra.mxu1 %v6339_v29  ;;  %v6366_v11 = vld [vmem:[#allocation6 + $0x224] ss:$16 sps:$4 sm:$0xff]   ;;  %v6393_v13 = vld [vmem:[#allocation6 + $0x1c8] ss:$16 sps:$4 sm:$0xff]   ;;  %v6364_v14 = vld [vmem:[#allocation6 + $0x220] ss:$16 sps:$4 sm:$0xff]   ;;  %p7388_p3 = por %p7387_p2, %p7386_p1 }
  0x99   :  { %773 = vmatpush1.bf16.msra.mxu0 %v6303_v22  ;;  %874 = vmatprep.subr.bf16.mxu1 %v6343_v31  ;;  %v6397_v15 = vld [vmem:[#allocation6 + $0x1ec] ss:$16 sps:$4 sm:$0xff]   ;;  %v6372_v16 = vld [vmem:[#allocation6 + $0x244] ss:$16 sps:$4 sm:$0xff]   ;;  %v6399_v18 = vld [vmem:[#allocation6 + $0x1e8] ss:$16 sps:$4 sm:$0xff]  }
  0x9a   :  { %774 = vmatprep.subr.bf16.mxu0 %v6304_v24  ;;  %v6370_v19 = vld [vmem:[#allocation6 + $0x240] ss:$16 sps:$4 sm:$0xff]   ;;  %v6405_v20 = vld [vmem:[#allocation6 + $0x20c] ss:$16 sps:$4 sm:$0xff]   ;;  %v6378_v21 = vld [vmem:[#allocation6 + $0x264] ss:$16 sps:$4 sm:$0xff]   ;;  %p7389_p4 = pnand %p7388_p3, %p7382_p0 }
  0x9b   :  { %v6403_v22 = vld [vmem:[#allocation6 + $0x208] ss:$16 sps:$4 sm:$0xff]   ;;  %v6376_v23 = vld [vmem:[#allocation6 + $0x260] ss:$16 sps:$4 sm:$0xff]   ;;  %v6408_v24 = vld [vmem:[#allocation6 + $0x22c] ss:$16 sps:$4 sm:$0xff]  }
  0x9c   :  { %875 = vmatpush1.bf16.msra.mxu1 %v6345_v36  ;;  %v6384_v25 = vld [vmem:[#allocation6 + $0x284] ss:$16 sps:$4 sm:$0xff]   ;;  %v6406_v27 = vld [vmem:[#allocation6 + $0x228] ss:$16 sps:$4 sm:$0xff]   ;;  %v6411_v29 = vld [vmem:[#allocation6 + $0x24c] ss:$16 sps:$4 sm:$0xff]  }
  0x9d   :  { %775 = vmatpush1.bf16.msra.mxu0 %v6306_v26  ;;  %876 = vmatprep.subr.bf16.mxu1 %v6349_v38  ;;  %v7427_v26 = vmov 0   ;;  %v6409_v31 = vld [vmem:[#allocation6 + $0x248] ss:$16 sps:$4 sm:$0xff]   ;;  %v6396_v34 = vld [vmem:[#allocation6 + $0x2c4] ss:$16 sps:$4 sm:$0xff]  }
  0x9e   :  { %776 = vmatprep.subr.bf16.mxu0 %v6310_v28  ;;  %v6382_v28 = vld [vmem:[#allocation6 + $0x280] ss:$16 sps:$4 sm:$0xff]   ;;  %v6412_v35 = vld [vmem:[#allocation6 + $0x268] ss:$16 sps:$4 sm:$0xff]   ;;  %v6417_v37 = vld [vmem:[#allocation6 + $0x28c] ss:$16 sps:$4 sm:$0xff]  }
  0x9f   :  { %v6394_v36 = vld [vmem:[#allocation6 + $0x2c0] ss:$16 sps:$4 sm:$0xff]   ;;  %v6402_v38 = vld [vmem:[#allocation6 + $0x2e4] ss:$16 sps:$4 sm:$0xff]   ;;  %v6430_v58 = vld [vmem:[#allocation9 + $0x8] ss:$16 sps:$4 sm:$0xff]  }
  0xa0   :  { %877 = vmatpush1.bf16.msra.mxu1 %v6351_v42  ;;  %v6400_v39 = vld [vmem:[#allocation6 + $0x2e0] ss:$16 sps:$4 sm:$0xff]   ;;  %v152_v42 = vld [vmem:[#allocation2 + $0x28] sm:$0xff]  ;;  %v6457_v6 = vld [vmem:[#allocation9 + $0xa0] ss:$16 sps:$4 sm:$0xff]  }
  0xa1   :  { %777 = vmatpush1.bf16.msra.mxu0 %v6312_v30  ;;  %878 = vmatprep.subr.bf16.mxu1 %v6355_v44  ;;  %v6390_v30 = vld [vmem:[#allocation6 + $0x2a4] ss:$16 sps:$4 sm:$0xff]   ;;  %v6429_v44 = vld [vmem:[#allocation9 + $0x4] ss:$16 sps:$4 sm:$0xff]   ;;  %v6432_v57 = vld [vmem:[#allocation9 + $0xc] ss:$16 sps:$4 sm:$0xff]  }
  0xa2   :  { %778 = vmatprep.subr.bf16.mxu0 %v6316_v32  ;;  %v6388_v32 = vld [vmem:[#allocation6 + $0x2a0] ss:$16 sps:$4 sm:$0xff]   ;;  %v6436_v0 = vld [vmem:[#allocation9 + $0x28] ss:$16 sps:$4 sm:$0xff]  }
  0xa3   :  { %v149_v40 = vld [vmem:[#allocation2 + $0x10] sm:$0xff] }
  0xa4   :  { %879 = vmatpush1.bf16.msra.mxu1 %v6357_v46  ;;  %v6418_v46 = vld [vmem:[#allocation6 + $0x2a8] ss:$16 sps:$4 sm:$0xff]   ;;  %v6444_v1 = vld [vmem:[#allocation9 + $0x4c] ss:$16 sps:$4 sm:$0xff]  }
  0xa5   :  { %779 = vmatpush1.bf16.msra.mxu0 %v6318_v33  ;;  %880 = vmatprep.subr.bf16.mxu1 %v6361_v48  ;;  %v6414_v33 = vld [vmem:[#allocation6 + $0x26c] ss:$16 sps:$4 sm:$0xff]   ;;  %v6427_v48 = vld [vmem:[#allocation9] ss:$16 sps:$4 sm:$0xff]  }
  0xa6   :  { %780 = vmatprep.subr.bf16.mxu0 %v6322_v41  ;;  %v6415_v41 = vld [vmem:[#allocation6 + $0x288] ss:$16 sps:$4 sm:$0xff]  }
  0xa8   :  { %881 = vmatpush1.bf16.msra.mxu1 %v6363_v50  ;;  %v6421_v50 = vld [vmem:[#allocation6 + $0x2c8] ss:$16 sps:$4 sm:$0xff]  }
  0xa9   :  { %781 = vmatpush1.bf16.msra.mxu0 %v6324_v43  ;;  %882 = vmatprep.subr.bf16.mxu1 %v6367_v52  ;;  %v6420_v43 = vld [vmem:[#allocation6 + $0x2ac] ss:$16 sps:$4 sm:$0xff]  }
  0xaa   :  { %782 = vmatprep.subr.bf16.mxu0 %v6328_v45  ;;  %v158_v45 = vpack.c.bf16 %v152_v42, %v149_v40  ;;  %v6426_v52 = vld [vmem:[#allocation6 + $0x2ec] ss:$16 sps:$4 sm:$0xff]   ;;  %v6504_v40 = vld [vmem:[#allocation9 + $0x18c] ss:$16 sps:$4 sm:$0xff]  }
  0xab   :  { %v6510_v42 = vld [vmem:[#allocation9 + $0x1ac] ss:$16 sps:$4 sm:$0xff]  }
  0xac   :  { %883 = vmatpush1.bf16.msra.mxu1 %v6369_v55 }
  0xad   :  { %783 = vmatpush1.bf16.msra.mxu0 %v6330_v47  ;;  %884 = vmatprep.subr.bf16.mxu1 %v6373_v56  ;;  %v6423_v47 = vld [vmem:[#allocation6 + $0x2cc] ss:$16 sps:$4 sm:$0xff]   ;;  %v6424_v56 = vld [vmem:[#allocation6 + $0x2e8] ss:$16 sps:$4 sm:$0xff]  }
  0xae   :  { %784 = vmatprep.subr.bf16.mxu0 %v6334_v49  ;;  %v6435_v49 = vld [vmem:[#allocation9 + $0x24] ss:$16 sps:$4 sm:$0xff]  }
  0xb0   :  { %885 = vmatpush1.bf16.msra.mxu1 %v6375_v61  ;;  %v6447_v61 = vld [vmem:[#allocation9 + $0x64] ss:$16 sps:$4 sm:$0xff]  }
  0xb1   :  { %785 = vmatpush1.bf16.msra.mxu0 %v6336_v51  ;;  %886 = vmatprep.subr.bf16.mxu1 %v6379_v62  ;;  %v155_v51 = vld [vmem:[#allocation2 + $0x40] sm:$0xff] }
  0xb2   :  { %786 = vmatprep.subr.bf16.mxu0 %v6340_v53  ;;  %v6433_v53 = vld [vmem:[#allocation9 + $0x20] ss:$16 sps:$4 sm:$0xff]   ;;  %v161_v55 = vpack.c.bf16 %v155_v51, %v155_v51  ;;  %v6520_v51 = vld [vmem:[#allocation9 + $0x1e8] ss:$16 sps:$4 sm:$0xff]  }
  0xb3   :  { %v6445_v62 = vld [vmem:[#allocation9 + $0x60] ss:$16 sps:$4 sm:$0xff]  }
  0xb4   :  { %887 = vmatpush1.bf16.msra.mxu1 %v6381_v3  ;;  %v6459_v3 = vld [vmem:[#allocation9 + $0xa4] ss:$16 sps:$4 sm:$0xff]  }
  0xb5   :  { %787 = vmatpush1.bf16.msra.mxu0 %v6342_v54  ;;  %888 = vmatprep.subr.bf16.mxu1 %v6385_v5  ;;  %v6441_v54 = vld [vmem:[#allocation9 + $0x44] ss:$16 sps:$4 sm:$0xff]   ;;  %v6450_v5 = vld [vmem:[#allocation9 + $0x6c] ss:$16 sps:$4 sm:$0xff]  }
  0xb6   :  { %788 = vmatprep.subr.bf16.mxu0 %v6346_v59  ;;  %v6439_v59 = vld [vmem:[#allocation9 + $0x40] ss:$16 sps:$4 sm:$0xff]  }
  0xb8   :  { %889 = vmatpush1.bf16.msra.mxu1 %v6387_v9  ;;  %v6456_v9 = vld [vmem:[#allocation9 + $0x8c] ss:$16 sps:$4 sm:$0xff]  }
  0xb9   :  { %789 = vmatpush1.bf16.msra.mxu0 %v6348_v60  ;;  %890 = vmatprep.subr.bf16.mxu1 %v6391_v10  ;;  %v6438_v60 = vld [vmem:[#allocation9 + $0x2c] ss:$16 sps:$4 sm:$0xff]   ;;  %v6463_v10 = vld [vmem:[#allocation9 + $0xc0] ss:$16 sps:$4 sm:$0xff]  }
  0xba   :  { %790 = vmatprep.subr.bf16.mxu0 %v6352_v63  ;;  %v6453_v63 = vld [vmem:[#allocation9 + $0x84] ss:$16 sps:$4 sm:$0xff]  }
  0xbc   :  { %891 = vmatpush1.bf16.msra.mxu1 %v6393_v13  ;;  %v6462_v13 = vld [vmem:[#allocation9 + $0xac] ss:$16 sps:$4 sm:$0xff]  }
  0xbd   :  { %791 = vmatpush1.bf16.msra.mxu0 %v6354_v2  ;;  %892 = vmatprep.subr.bf16.mxu1 %v6397_v15  ;;  %v6451_v2 = vld [vmem:[#allocation9 + $0x80] ss:$16 sps:$4 sm:$0xff]   ;;  %v6477_v15 = vld [vmem:[#allocation9 + $0x104] ss:$16 sps:$4 sm:$0xff]  }
  0xbe   :  { %811 = vmatprep.subr.bf16.mxu0 %v6360_v4  ;;  %v6442_v4 = vld [vmem:[#allocation9 + $0x48] ss:$16 sps:$4 sm:$0xff]  }
  0xc0   :  { %793 = vmatmul.mubr.bf16.vlgmr.msra.gmra.mrb[0].mxu0 %v156_v8  ;;  %893 = vmatpush1.bf16.msra.mxu1 %v6399_v18  ;;  %v6475_v18 = vld [vmem:[#allocation9 + $0x100] ss:$16 sps:$4 sm:$0xff]  }
  0xc1   :  { %812 = vmatpush1.bf16.msra.mxu0 %v6358_v7  ;;  %802 = vmatprep.mubr.bf16.mxu0 %v160_v12  ;;  %v6465_v7 = vld [vmem:[#allocation9 + $0xc4] ss:$16 sps:$4 sm:$0xff]  }
  0xc2   :  { %813 = vmatprep.subr.bf16.mxu0 %v6366_v11  ;;  %913 = vmatprep.subr.bf16.mxu1 %v6405_v20  ;;  %v6471_v11 = vld [vmem:[#allocation9 + $0xe4] ss:$16 sps:$4 sm:$0xff]   ;;  %v6466_v20 = vld [vmem:[#allocation9 + $0xc8] ss:$16 sps:$4 sm:$0xff]  }
  0xc3   :  { %895 = vmatmul.mubr.bf16.vlgmr.msra.gmra.mrb[0].mxu1 %v156_v8  ;;  %v6448_v8 = vld [vmem:[#allocation9 + $0x68] ss:$16 sps:$4 sm:$0xff]  }
  0xc4   :  { %914 = vmatpush1.bf16.msra.mxu1 %v6403_v22  ;;  %904 = vmatprep.mubr.bf16.mxu1 %v160_v12  ;;  %v6454_v12 = vld [vmem:[#allocation9 + $0x88] ss:$16 sps:$4 sm:$0xff]   ;;  %v6481_v22 = vld [vmem:[#allocation9 + $0x120] ss:$16 sps:$4 sm:$0xff]  }
  0xc5   :  { %814 = vmatpush1.bf16.msra.mxu0 %v6364_v14  ;;  %915 = vmatprep.subr.bf16.mxu1 %v6408_v24  ;;  %v6469_v14 = vld [vmem:[#allocation9 + $0xe0] ss:$16 sps:$4 sm:$0xff]   ;;  %v6472_v24 = vld [vmem:[#allocation9 + $0xe8] ss:$16 sps:$4 sm:$0xff]  }
  0xc6   :  { %815 = vmatprep.subr.bf16.mxu0 %v6372_v16  ;;  %v6460_v16 = vld [vmem:[#allocation9 + $0xa8] ss:$16 sps:$4 sm:$0xff]  }
  0xc8   :  { %803 = vmatmul.mubr.bf16.gmra.mrb[4].mxu0 %v159_v17  ;;  %916 = vmatpush1.bf16.msra.mxu1 %v6406_v27  ;;  %v6495_v27 = vld [vmem:[#allocation9 + $0x164] ss:$16 sps:$4 sm:$0xff]  }
  0xc9   :  { %816 = vmatpush1.bf16.msra.mxu0 %v6370_v19  ;;  %843 = vmatprep.mubr.bf16.mxu0 %v7427_v26  ;;  %v6483_v19 = vld [vmem:[#allocation9 + $0x124] ss:$16 sps:$4 sm:$0xff]  }
  0xca   :  { %817 = vmatprep.subr.bf16.mxu0 %v6378_v21  ;;  %917 = vmatprep.subr.bf16.mxu1 %v6411_v29  ;;  %v6474_v21 = vld [vmem:[#allocation9 + $0xec] ss:$16 sps:$4 sm:$0xff]  }
  0xcb   :  { %905 = vmatmul.mubr.bf16.gmra.mrb[4].mxu1 %v159_v17  ;;  %v6468_v17 = vld [vmem:[#allocation9 + $0xcc] ss:$16 sps:$4 sm:$0xff]  }
  0xcc   :  { %918 = vmatpush1.bf16.msra.mxu1 %v6409_v31  ;;  %945 = vmatprep.mubr.bf16.mxu1 %v7427_v26  ;;  %v6486_v29 = vld [vmem:[#allocation9 + $0x12c] ss:$16 sps:$4 sm:$0xff]   ;;  %v6501_v31 = vld [vmem:[#allocation9 + $0x184] ss:$16 sps:$4 sm:$0xff]  }
  0xcd   :  { %818 = vmatpush1.bf16.msra.mxu0 %v6376_v23  ;;  %919 = vmatprep.subr.bf16.mxu1 %v6414_v33  ;;  %v6489_v23 = vld [vmem:[#allocation9 + $0x144] ss:$16 sps:$4 sm:$0xff]   ;;  %v6492_v33 = vld [vmem:[#allocation9 + $0x14c] ss:$16 sps:$4 sm:$0xff]  }
  0xce   :  { %819 = vmatprep.subr.bf16.mxu0 %v6384_v25  ;;  %v6480_v25 = vld [vmem:[#allocation9 + $0x10c] ss:$16 sps:$4 sm:$0xff]  }
  0xd0   :  { %920 = vmatpush1.bf16.msra.mxu1 %v6412_v35  ;;  %v6507_v35 = vld [vmem:[#allocation9 + $0x1a4] ss:$16 sps:$4 sm:$0xff]  }
  0xd1   :  { %820 = vmatpush1.bf16.msra.mxu0 %v6382_v28  ;;  %921 = vmatprep.subr.bf16.mxu1 %v6417_v37  ;;  %v6478_v28 = vld [vmem:[#allocation9 + $0x108] ss:$16 sps:$4 sm:$0xff]   ;;  %v6498_v37 = vld [vmem:[#allocation9 + $0x16c] ss:$16 sps:$4 sm:$0xff]  }
  0xd2   :  { %821 = vmatprep.subr.bf16.mxu0 %v6390_v30  ;;  %v6493_v30 = vld [vmem:[#allocation9 + $0x160] ss:$16 sps:$4 sm:$0xff]  }
  0xd4   :  { %922 = vmatpush1.bf16.msra.mxu1 %v6415_v41  ;;  %v6502_v41 = vld [vmem:[#allocation9 + $0x188] ss:$16 sps:$4 sm:$0xff]  }
  0xd5   :  { %822 = vmatpush1.bf16.msra.mxu0 %v6388_v32  ;;  %923 = vmatprep.subr.bf16.mxu1 %v6420_v43  ;;  %v6484_v32 = vld [vmem:[#allocation9 + $0x128] ss:$16 sps:$4 sm:$0xff]  }
  0xd6   :  { %823 = vmatprep.subr.bf16.mxu0 %v6396_v34  ;;  %v6499_v34 = vld [vmem:[#allocation9 + $0x180] ss:$16 sps:$4 sm:$0xff]   ;;  %v6508_v43 = vld [vmem:[#allocation9 + $0x1a8] ss:$16 sps:$4 sm:$0xff]  }
  0xd8   :  { %924 = vmatpush1.bf16.msra.mxu1 %v6418_v46  ;;  %v6511_v46 = vld [vmem:[#allocation9 + $0x1c0] ss:$16 sps:$4 sm:$0xff]  }
  0xd9   :  { %824 = vmatpush1.bf16.msra.mxu0 %v6394_v36  ;;  %925 = vmatprep.subr.bf16.mxu1 %v6423_v47  ;;  %v6490_v36 = vld [vmem:[#allocation9 + $0x148] ss:$16 sps:$4 sm:$0xff]  }
  0xda   :  { %825 = vmatprep.subr.bf16.mxu0 %v6402_v38  ;;  %v6505_v38 = vld [vmem:[#allocation9 + $0x1a0] ss:$16 sps:$4 sm:$0xff]   ;;  %v6514_v47 = vld [vmem:[#allocation9 + $0x1c8] ss:$16 sps:$4 sm:$0xff]  }
  0xdc   :  { %926 = vmatpush1.bf16.msra.mxu1 %v6421_v50  ;;  %v6517_v50 = vld [vmem:[#allocation9 + $0x1e0] ss:$16 sps:$4 sm:$0xff]  }
  0xdd   :  { %826 = vmatpush1.bf16.msra.mxu0 %v6400_v39  ;;  %927 = vmatprep.subr.bf16.mxu1 %v6426_v52  ;;  %v6496_v39 = vld [vmem:[#allocation9 + $0x168] ss:$16 sps:$4 sm:$0xff]   ;;  %v6525_v52 = vld [vmem:[#allocation9 + $0x204] ss:$16 sps:$4 sm:$0xff]  }
  0xde   :  { %1774 = vmatprep.subr.bf16.mxu0 %v6429_v44  ;;  %v6513_v44 = vld [vmem:[#allocation9 + $0x1c4] ss:$16 sps:$4 sm:$0xff]  }
  0xe0   :  { %844 = vmatmul.mubr.bf16.vlgmr.msra.gmra.mrb[0].mxu0 %v158_v45  ;;  %928 = vmatpush1.bf16.msra.mxu1 %v6424_v56 }
  0xe1   :  { %853 = vmatprep.mubr.bf16.mxu0 %v7427_v26  ;;  %1775 = vmatpush1.bf16.msra.mxu0 %v6427_v48  ;;  %v6519_v48 = vld [vmem:[#allocation9 + $0x1e4] ss:$16 sps:$4 sm:$0xff]  }
  0xe2   :  { %1776 = vmatprep.subr.bf16.mxu0 %v6435_v49  ;;  %1876 = vmatprep.subr.bf16.mxu1 %v6432_v57  ;;  %v6522_v49 = vld [vmem:[#allocation9 + $0x1ec] ss:$16 sps:$4 sm:$0xff]  }
  0xe3   :  { %946 = vmatmul.mubr.bf16.vlgmr.msra.gmra.mrb[0].mxu1 %v158_v45  ;;  %v6516_v45 = vld [vmem:[#allocation9 + $0x1cc] ss:$16 sps:$4 sm:$0xff]  }
  0xe4   :  { %955 = vmatprep.mubr.bf16.mxu1 %v7427_v26  ;;  %1877 = vmatpush1.bf16.msra.mxu1 %v6430_v58  ;;  %v6487_v26 = vld [vmem:[#allocation9 + $0x140] ss:$16 sps:$4 sm:$0xff]   ;;  %v258_v57 = vld [vmem:[#allocation8] sm:$0xf] }
  0xe5   :  { %1777 = vmatpush1.bf16.msra.mxu0 %v6433_v53  ;;  %1878 = vmatprep.subr.bf16.mxu1 %v6438_v60  ;;  %v6528_v53 = vld [vmem:[#allocation9 + $0x20c] ss:$16 sps:$4 sm:$0xff]  }
  0xe6   :  { %1778 = vmatprep.subr.bf16.mxu0 %v6441_v54  ;;  %v260_v54 = vlaneseq }
  0xe8   :  { %854 = vmatmul.mubr.bf16.gmra.mrb[4].mxu0 %v161_v55  ;;  %1879 = vmatpush1.bf16.msra.mxu1 %v6436_v0 }
  0xe9   :  { %1779 = vmatpush1.bf16.msra.mxu0 %v6439_v59  ;;  %1880 = vmatprep.subr.bf16.mxu1 %v6444_v1 }
  0xea   :  { %1780 = vmatprep.subr.bf16.mxu0 %v6447_v61 }
  0xeb   :  { %956 = vmatmul.mubr.bf16.gmra.mrb[4].mxu1 %v161_v55  ;;  %v261_v55 = vshrl.u32 %v260_v54, 7 }
  0xec   :  { %1881 = vmatpush1.bf16.msra.mxu1 %v6442_v4 }
  0xed   :  { %1781 = vmatpush1.bf16.msra.mxu0 %v6445_v62  ;;  %1882 = vmatprep.subr.bf16.mxu1 %v6450_v5  ;;  %v7588_v56 = vsub.s32 0, %v261_v55  ;;  %v7590_v58 = vsub.s32 1, %v261_v55  ;;  %v7594_v5 = vsub.s32 2, %v261_v55 }
  0xee   :  { %1782 = vmatprep.subr.bf16.mxu0 %v6453_v63 }
  0xef   :  { %v263_v59 = vrot.slane %v258_v57, %v7588_v56  ;;  %v267_v60 = vrot.slane %v258_v57, %v7590_v58 }
  0xf0   :  { %1883 = vmatpush1.bf16.msra.mxu1 %v6448_v8 }
  0xf1   :  { %1783 = vmatpush1.bf16.msra.mxu0 %v6451_v2  ;;  %1884 = vmatprep.subr.bf16.mxu1 %v6456_v9 }
  0xf2   :  { %1784 = vmatprep.subr.bf16.mxu0 %v6459_v3 }
  0xf4   :  { %1885 = vmatpush1.bf16.msra.mxu1 %v6454_v12  ;;  %v6526_v12 = vld [vmem:[#allocation9 + $0x208] ss:$16 sps:$4 sm:$0xff]  }
  0xf5   :  { %1785 = vmatpush1.bf16.msra.mxu0 %v6457_v6  ;;  %1886 = vmatprep.subr.bf16.mxu1 %v6462_v13  ;;  %v7596_v6 = vsub.s32 3, %v261_v55  ;;  %v6549_v55 = vld [vmem:[#allocation9 + $0x284] ss:$16 sps:$4 sm:$0xff]  }
  0xf6   :  { %1786 = vmatprep.subr.bf16.mxu0 %v6465_v7 }
  0xf8   :  { %1887 = vmatpush1.bf16.msra.mxu1 %v6460_v16 }
  0xf9   :  { %1787 = vmatpush1.bf16.msra.mxu0 %v6463_v10  ;;  %1888 = vmatprep.subr.bf16.mxu1 %v6468_v17 }
  0xfa   :  { %1788 = vmatprep.subr.bf16.mxu0 %v6471_v11  ;;  %v6523_v11 = vld [vmem:[#allocation9 + $0x200] ss:$16 sps:$4 sm:$0xff]  }
  0xfc   :  { %1889 = vmatpush1.bf16.msra.mxu1 %v6466_v20 }
  0xfd   :  { %1789 = vmatpush1.bf16.msra.mxu0 %v6469_v14  ;;  %1890 = vmatprep.subr.bf16.mxu1 %v6474_v21  ;;  %v6531_v14 = vld [vmem:[#allocation9 + $0x224] ss:$16 sps:$4 sm:$0xff]   ;;  %v7602_v21 = vrot.slane %v258_v57, %v7596_v6 }
  0xfe   :  { %1790 = vmatprep.subr.bf16.mxu0 %v6477_v15  ;;  %v6534_v15 = vld [vmem:[#allocation9 + $0x22c] ss:$16 sps:$4 sm:$0xff]  }
 0x100   :  { %1891 = vmatpush1.bf16.msra.mxu1 %v6472_v24  ;;  %v6529_v24 = vld [vmem:[#allocation9 + $0x220] ss:$16 sps:$4 sm:$0xff]  }
 0x101   :  { %1791 = vmatpush1.bf16.msra.mxu0 %v6475_v18  ;;  %1892 = vmatprep.subr.bf16.mxu1 %v6480_v25  ;;  %v7599_v18 = vrot.slane %v258_v57, %v7594_v5  ;;  %v6552_v57 = vld [vmem:[#allocation9 + $0x28c] ss:$16 sps:$4 sm:$0xff]  }
 0x102   :  { %1792 = vmatprep.subr.bf16.mxu0 %v6483_v19 }
 0x104   :  { %1893 = vmatpush1.bf16.msra.mxu1 %v6478_v28 }
 0x105   :  { %1793 = vmatpush1.bf16.msra.mxu0 %v6481_v22  ;;  %1894 = vmatprep.subr.bf16.mxu1 %v6486_v29  ;;  %v6537_v29 = vld [vmem:[#allocation9 + $0x244] ss:$16 sps:$4 sm:$0xff]  }
 0x106   :  { %1794 = vmatprep.subr.bf16.mxu0 %v6489_v23 }
 0x108   :  { %1895 = vmatpush1.bf16.msra.mxu1 %v6484_v32 }
 0x109   :  { %1795 = vmatpush1.bf16.msra.mxu0 %v6487_v26  ;;  %1896 = vmatprep.subr.bf16.mxu1 %v6492_v33  ;;  %v6532_v26 = vld [vmem:[#allocation9 + $0x228] ss:$16 sps:$4 sm:$0xff]  }
 0x10a   :  { %1796 = vmatprep.subr.bf16.mxu0 %v6495_v27 }
 0x10c   :  { %1897 = vmatpush1.bf16.msra.mxu1 %v6490_v36 }
 0x10d   :  { %1797 = vmatpush1.bf16.msra.mxu0 %v6493_v30  ;;  %1898 = vmatprep.subr.bf16.mxu1 %v6498_v37  ;;  %v6540_v30 = vld [vmem:[#allocation9 + $0x24c] ss:$16 sps:$4 sm:$0xff]   ;;  %v6535_v37 = vld [vmem:[#allocation9 + $0x240] ss:$16 sps:$4 sm:$0xff]  }
 0x10e   :  { %1798 = vmatprep.subr.bf16.mxu0 %v6501_v31 }
 0x110   :  { %1899 = vmatpush1.bf16.msra.mxu1 %v6496_v39 }
 0x111   :  { %1799 = vmatpush1.bf16.msra.mxu0 %v6499_v34  ;;  %1900 = vmatprep.subr.bf16.mxu1 %v6504_v40 }
 0x112   :  { %1800 = vmatprep.subr.bf16.mxu0 %v6507_v35 }
 0x114   :  { %1901 = vmatpush1.bf16.msra.mxu1 %v6502_v41 }
 0x115   :  { %1801 = vmatpush1.bf16.msra.mxu0 %v6505_v38  ;;  %1902 = vmatprep.subr.bf16.mxu1 %v6510_v42  ;;  %v6538_v38 = vld [vmem:[#allocation9 + $0x248] ss:$16 sps:$4 sm:$0xff]   ;;  %v6543_v42 = vld [vmem:[#allocation9 + $0x264] ss:$16 sps:$4 sm:$0xff]  }
 0x116   :  { %1802 = vmatprep.subr.bf16.mxu0 %v6513_v44 }
 0x118   :  { %1903 = vmatpush1.bf16.msra.mxu1 %v6508_v43  ;;  %v6546_v43 = vld [vmem:[#allocation9 + $0x26c] ss:$16 sps:$4 sm:$0xff]  }
 0x119   :  { %1904 = vmatprep.subr.bf16.mxu1 %v6516_v45  ;;  %1803 = vmatpush1.bf16.msra.mxu0 %v6511_v46 }
 0x11a   :  { %1804 = vmatprep.subr.bf16.mxu0 %v6519_v48 }
 0x11c   :  { %1905 = vmatpush1.bf16.msra.mxu1 %v6514_v47 }
 0x11d   :  { %1906 = vmatprep.subr.bf16.mxu1 %v6522_v49  ;;  %1805 = vmatpush1.bf16.msra.mxu0 %v6517_v50 }
 0x11e   :  { %1825 = vmatprep.subr.bf16.mxu0 %v6525_v52  ;;  %v6541_v52 = vld [vmem:[#allocation9 + $0x260] ss:$16 sps:$4 sm:$0xff]  }
 0x120   :  { %1907 = vmatpush1.bf16.msra.mxu1 %v6520_v51 }
 0x121   :  { %1927 = vmatprep.subr.bf16.mxu1 %v6528_v53  ;;  %v6544_v53 = vld [vmem:[#allocation9 + $0x268] ss:$16 sps:$4 sm:$0xff]  }
 0x1b3   :  { %v845_v61 = vpop.f32.mrb[0].mxu0 }
 0x1b4   :  { %v6125_v62 = vadd.f32 %v845_v61, %v263_v59  ;;  %v847_v63 = vpop.f32.mrb[1].mxu0  ;;  %v6547_v61 = vld [vmem:[#allocation9 + $0x280] ss:$16 sps:$4 sm:$0xff]  }
 0x1b5   :  { %v6126_v0 = vadd.f32 %v847_v63, %v267_v60  ;;  %v849_v1 = vpop.f32.mrb[2].mxu0  ;;  %v6555_v63 = vld [vmem:[#allocation9 + $0x2a4] ss:$16 sps:$4 sm:$0xff]  }
 0x1b6   :  { %v6127_v2 = vadd.f32 %v849_v1, %v263_v59  ;;  %v851_v3 = vpop.f32.mrb[3].mxu0  ;;  %v964_v7 = vmax.f32 %v6125_v62, 0.0  ;;  %v947_v27 = vpop.f32.mrb[0].mxu1  ;;  %v6550_v62 = vld [vmem:[#allocation9 + $0x288] ss:$16 sps:$4 sm:$0xff]  }
 0x1b7   :  { %v6128_v4 = vadd.f32 %v851_v3, %v267_v60  ;;  %v965_v9 = vmax.f32 %v6126_v0, 0.0  ;;  %v6131_v31 = vadd.f32 %v947_v27, %v7599_v18  ;;  %v949_v32 = vpop.f32.mrb[1].mxu1  ;;  %v6558_v0 = vld [vmem:[#allocation9 + $0x2ac] ss:$16 sps:$4 sm:$0xff]   ;;  %v6553_v1 = vld [vmem:[#allocation9 + $0x2a0] ss:$16 sps:$4 sm:$0xff]  }
 0x1b8   :  { %v968_v8 = vmax.f32 %v6127_v2, 0.0  ;;  %v6132_v34 = vadd.f32 %v949_v32, %v7602_v21  ;;  %v951_v35 = vpop.f32.mrb[2].mxu1  ;;  %v6556_v2 = vld [vmem:[#allocation9 + $0x2a8] ss:$16 sps:$4 sm:$0xff]   ;;  %v6561_v3 = vld [vmem:[#allocation9 + $0x2c4] ss:$16 sps:$4 sm:$0xff]  }
 0x1b9   :  { %v969_v10 = vmax.f32 %v6128_v4, 0.0  ;;  %v966_v39 = vmax.f32 %v6131_v31, 0.0  ;;  %v6133_v40 = vadd.f32 %v951_v35, %v7599_v18  ;;  %v953_v41 = vpop.f32.mrb[3].mxu1  ;;  %v6564_v4 = vld [vmem:[#allocation9 + $0x2cc] ss:$16 sps:$4 sm:$0xff]  }
 0x1ba   :  { %v976_v13 = vpack.c.bf16 %v968_v8, %v964_v7  ;;  %v967_v44 = vmax.f32 %v6132_v34, 0.0  ;;  %v6134_v45 = vadd.f32 %v953_v41, %v7602_v21  ;;  %v6559_v7 = vld [vmem:[#allocation9 + $0x2c0] ss:$16 sps:$4 sm:$0xff]   ;;  %v6562_v8 = vld [vmem:[#allocation9 + $0x2c8] ss:$16 sps:$4 sm:$0xff]  }
 0x1bb   :  { %v977_v16 = vpack.c.bf16 %v969_v10, %v965_v9  ;;  %v855_v17 = vpop.f32.mrb[4].mxu0  ;;  %v970_v46 = vmax.f32 %v6133_v40, 0.0  ;;  %v6567_v9 = vld [vmem:[#allocation9 + $0x2e4] ss:$16 sps:$4 sm:$0xff]   ;;  %v6570_v10 = vld [vmem:[#allocation9 + $0x2ec] ss:$16 sps:$4 sm:$0xff]  }
 0x1bc   :  { %v6129_v19 = vadd.f32 %v855_v17, %v263_v59  ;;  %v857_v20 = vpop.f32.mrb[5].mxu0  ;;  %v971_v48 = vmax.f32 %v6134_v45, 0.0  ;;  %v6579_v17 = vld [vmem:[#allocation9 + $0x324] ss:$16 sps:$4 sm:$0xff]   ;;  %v6600_v32 = vld [vmem:[#allocation9 + $0x38c] ss:$16 sps:$4 sm:$0xff]  }
 0x1bd   :  { %v6130_v22 = vadd.f32 %v857_v20, %v267_v60  ;;  %v859_v23 = vpop.f32.mrb[6].mxu0  ;;  %1806 = vmatprep.mubr.bf16.mxu0 %v977_v16  ;;  %1908 = vmatprep.mubr.bf16.mxu1 %v977_v16  ;;  %v7608_v49 = vpack.c.bf16 %v970_v46, %v966_v39  ;;  %v6574_v16 = vld [vmem:[#allocation9 + $0x308] ss:$16 sps:$4 sm:$0xff]   ;;  %v6577_v20 = vld [vmem:[#allocation9 + $0x320] ss:$16 sps:$4 sm:$0xff]  }
 0x1be   :  { %v860_v25 = vpop.f32.mrb[7].mxu0  ;;  %1807 = vmatmul.mubr.bf16.vlgmr.msra.gmra.mrb[8].mxu0 %v976_v13  ;;  %1909 = vmatmul.mubr.bf16.vlgmr.msra.gmra.mrb[8].mxu1 %v976_v13  ;;  %v972_v33 = vmax.f32 %v6129_v19, 0.0  ;;  %v979_v50 = vpack.c.bf16 %v971_v48, %v967_v44  ;;  %v7610_v51 = vpop.f32.mrb[4].mxu1  ;;  %v6573_v13 = vld [vmem:[#allocation9 + $0x304] ss:$16 sps:$4 sm:$0xff]  }
 0x1bf   :  { %v973_v28 = vmax.f32 %v6130_v22, 0.0  ;;  %1826 = vmatpush1.bf16.msra.mxu0 %v6523_v11  ;;  %1928 = vmatpush1.bf16.msra.mxu1 %v6526_v12  ;;  %v7612_v54 = vpop.f32.mrb[5].mxu1  ;;  %v6565_v11 = vld [vmem:[#allocation9 + $0x2e0] ss:$16 sps:$4 sm:$0xff]   ;;  %v6568_v12 = vld [vmem:[#allocation9 + $0x2e8] ss:$16 sps:$4 sm:$0xff]  }
 0x1c0   :  { %1827 = vmatprep.subr.bf16.mxu0 %v6531_v14  ;;  %1929 = vmatprep.subr.bf16.mxu1 %v6534_v15  ;;  %v980_v47 = vpack.c.bf16 %v972_v33, %v972_v33  ;;  %v961_v59 = vpop.f32.mrb[6].mxu1  ;;  %v6576_v14 = vld [vmem:[#allocation9 + $0x30c] ss:$16 sps:$4 sm:$0xff]   ;;  %v6571_v15 = vld [vmem:[#allocation9 + $0x300] ss:$16 sps:$4 sm:$0xff]   ;;  %v6136_v45 = vadd.f32 %v7612_v54, %v7602_v21 }
 0x1c1   :  { %v981_v36 = vpack.c.bf16 %v973_v28, %v973_v28  ;;  %v962_v60 = vpop.f32.mrb[7].mxu1  ;;  %v6582_v19 = vld [vmem:[#allocation9 + $0x32c] ss:$16 sps:$4 sm:$0xff]   ;;  %v6580_v22 = vld [vmem:[#allocation9 + $0x328] ss:$16 sps:$4 sm:$0xff]  }
 0x1c2   :  { %v6585_v23 = vld [vmem:[#allocation9 + $0x344] ss:$16 sps:$4 sm:$0xff]   ;;  %v6583_v25 = vld [vmem:[#allocation9 + $0x340] ss:$16 sps:$4 sm:$0xff]   ;;  %v6594_v28 = vld [vmem:[#allocation9 + $0x36c] ss:$16 sps:$4 sm:$0xff]  }
 0x1c3   :  { %1828 = vmatpush1.bf16.msra.mxu0 %v6529_v24  ;;  %1930 = vmatpush1.bf16.msra.mxu1 %v6532_v26  ;;  %v6588_v24 = vld [vmem:[#allocation9 + $0x34c] ss:$16 sps:$4 sm:$0xff]   ;;  %v6586_v26 = vld [vmem:[#allocation9 + $0x348] ss:$16 sps:$4 sm:$0xff]   ;;  %v6591_v27 = vld [vmem:[#allocation9 + $0x364] ss:$16 sps:$4 sm:$0xff]  }
 0x1c4   :  { %1816 = vmatprep.mubr.bf16.mxu0 %v981_v36  ;;  %1918 = vmatprep.mubr.bf16.mxu1 %v981_v36  ;;  %v6597_v31 = vld [vmem:[#allocation9 + $0x384] ss:$16 sps:$4 sm:$0xff]   ;;  %v6595_v33 = vld [vmem:[#allocation9 + $0x380] ss:$16 sps:$4 sm:$0xff]   ;;  %v6598_v34 = vld [vmem:[#allocation9 + $0x388] ss:$16 sps:$4 sm:$0xff]  }
 0x1c5   :  { %1829 = vmatprep.subr.bf16.mxu0 %v6537_v29  ;;  %1931 = vmatprep.subr.bf16.mxu1 %v6540_v30  ;;  %v6589_v29 = vld [vmem:[#allocation9 + $0x360] ss:$16 sps:$4 sm:$0xff]   ;;  %v6592_v30 = vld [vmem:[#allocation9 + $0x368] ss:$16 sps:$4 sm:$0xff]   ;;  %v6603_v35 = vld [vmem:[#allocation9 + $0x3a4] ss:$16 sps:$4 sm:$0xff]  }
 0x1c6   :  { %1817 = vmatmul.mubr.bf16.gmra.mrb[12].mxu0 %v980_v47  ;;  %1919 = vmatmul.mubr.bf16.gmra.mrb[12].mxu1 %v980_v47  ;;  %v6606_v36 = vld [vmem:[#allocation9 + $0x3ac] ss:$16 sps:$4 sm:$0xff]   ;;  %v6609_v39 = vld [vmem:[#allocation9 + $0x3c4] ss:$16 sps:$4 sm:$0xff]   ;;  %v6607_v41 = vld [vmem:[#allocation9 + $0x3c0] ss:$16 sps:$4 sm:$0xff]  }
 0x1c7   :  { %1830 = vmatpush1.bf16.msra.mxu0 %v6535_v37  ;;  %1932 = vmatpush1.bf16.msra.mxu1 %v6538_v38  ;;  %v6601_v37 = vld [vmem:[#allocation9 + $0x3a0] ss:$16 sps:$4 sm:$0xff]   ;;  %v6604_v38 = vld [vmem:[#allocation9 + $0x3a8] ss:$16 sps:$4 sm:$0xff]   ;;  %v6612_v40 = vld [vmem:[#allocation9 + $0x3cc] ss:$16 sps:$4 sm:$0xff]  }
 0x1c8   :  { %1831 = vmatprep.subr.bf16.mxu0 %v6543_v42  ;;  %1933 = vmatprep.subr.bf16.mxu1 %v6546_v43  ;;  %v6610_v42 = vld [vmem:[#allocation9 + $0x3c8] ss:$16 sps:$4 sm:$0xff]   ;;  %v6615_v43 = vld [vmem:[#allocation9 + $0x3e4] ss:$16 sps:$4 sm:$0xff]   ;;  %v6618_v44 = vld [vmem:[#allocation9 + $0x3ec] ss:$16 sps:$4 sm:$0xff]  }
 0x1c9   :  { %1857 = vmatprep.mubr.bf16.mxu0 %v979_v50  ;;  %1959 = vmatprep.mubr.bf16.mxu1 %v979_v50  ;;  %v6613_v46 = vld [vmem:[#allocation9 + $0x3e0] ss:$16 sps:$4 sm:$0xff]   ;;  %v6616_v47 = vld [vmem:[#allocation9 + $0x3e8] ss:$16 sps:$4 sm:$0xff]   ;;  %v6621_v48 = vld [vmem:[#allocation9 + $0x404] ss:$16 sps:$4 sm:$0xff]  }
 0x1ca   :  { %v6624_v50 = vld [vmem:[#allocation9 + $0x40c] ss:$16 sps:$4 sm:$0xff]   ;;  %v6627_v21 = vld [vmem:[#allocation9 + $0x424] ss:$16 sps:$4 sm:$0xff]  }
 0x1cb   :  { %1832 = vmatpush1.bf16.msra.mxu0 %v6541_v52  ;;  %1934 = vmatpush1.bf16.msra.mxu1 %v6544_v53  ;;  %v975_v52 = vmax.f32 %v6136_v45, 0.0  ;;  %v6135_v53 = vadd.f32 %v7610_v51, %v7599_v18  ;;  %v6630_v54 = vld [vmem:[#allocation9 + $0x42c] ss:$16 sps:$4 sm:$0xff]   ;;  %v6633_v18 = vld [vmem:[#allocation9 + $0x444] ss:$16 sps:$4 sm:$0xff]  }
 0x1cc   :  { %1833 = vmatprep.subr.bf16.mxu0 %v6549_v55  ;;  %1935 = vmatprep.subr.bf16.mxu1 %v6552_v57  ;;  %v6619_v55 = vld [vmem:[#allocation9 + $0x400] ss:$16 sps:$4 sm:$0xff]   ;;  %v6622_v57 = vld [vmem:[#allocation9 + $0x408] ss:$16 sps:$4 sm:$0xff]   ;;  %v6636_v51 = vld [vmem:[#allocation9 + $0x44c] ss:$16 sps:$4 sm:$0xff]  }
 0x1cd   :  { %v983_v59 = vpack.c.bf16 %v975_v52, %v975_v52  ;;  %v974_v60 = vmax.f32 %v6135_v53, 0.0  ;;  %v6699_v45 = vld [vmem:[#allocation9 + $0x5a4] ss:$16 sps:$4 sm:$0xff]   ;;  %v6708_v52 = vld [vmem:[#allocation9 + $0x5cc] ss:$16 sps:$4 sm:$0xff]  }
 0x1ce   :  { %v6703_v53 = vld [vmem:[#allocation9 + $0x5c0] ss:$16 sps:$4 sm:$0xff]  }
 0x1cf   :  { %1834 = vmatpush1.bf16.msra.mxu0 %v6547_v61  ;;  %1936 = vmatpush1.bf16.msra.mxu1 %v6550_v62  ;;  %v6625_v61 = vld [vmem:[#allocation9 + $0x420] ss:$16 sps:$4 sm:$0xff]   ;;  %v6628_v62 = vld [vmem:[#allocation9 + $0x428] ss:$16 sps:$4 sm:$0xff]  }
 0x1d0   :  { %1835 = vmatprep.subr.bf16.mxu0 %v6555_v63  ;;  %1937 = vmatprep.subr.bf16.mxu1 %v6558_v0  ;;  %v982_v63 = vpack.c.bf16 %v974_v60, %v974_v60  ;;  %v6631_v0 = vld [vmem:[#allocation9 + $0x440] ss:$16 sps:$4 sm:$0xff]   ;;  %v6717_v60 = vld [vmem:[#allocation9 + $0x604] ss:$16 sps:$4 sm:$0xff]  }
 0x1d3   :  { %1836 = vmatpush1.bf16.msra.mxu0 %v6553_v1  ;;  %1938 = vmatpush1.bf16.msra.mxu1 %v6556_v2  ;;  %v6634_v1 = vld [vmem:[#allocation9 + $0x448] ss:$16 sps:$4 sm:$0xff]   ;;  %v6639_v2 = vld [vmem:[#allocation9 + $0x464] ss:$16 sps:$4 sm:$0xff]  }
 0x1d4   :  { %1837 = vmatprep.subr.bf16.mxu0 %v6561_v3  ;;  %1939 = vmatprep.subr.bf16.mxu1 %v6564_v4  ;;  %v6637_v3 = vld [vmem:[#allocation9 + $0x460] ss:$16 sps:$4 sm:$0xff]   ;;  %v6640_v4 = vld [vmem:[#allocation9 + $0x468] ss:$16 sps:$4 sm:$0xff]  }
 0x1d7   :  { %1838 = vmatpush1.bf16.msra.mxu0 %v6559_v7  ;;  %1940 = vmatpush1.bf16.msra.mxu1 %v6562_v8  ;;  %v6645_v7 = vld [vmem:[#allocation9 + $0x484] ss:$16 sps:$4 sm:$0xff]   ;;  %v6648_v8 = vld [vmem:[#allocation9 + $0x48c] ss:$16 sps:$4 sm:$0xff]  }
 0x1d8   :  { %1839 = vmatprep.subr.bf16.mxu0 %v6567_v9  ;;  %1941 = vmatprep.subr.bf16.mxu1 %v6570_v10  ;;  %v6643_v9 = vld [vmem:[#allocation9 + $0x480] ss:$16 sps:$4 sm:$0xff]   ;;  %v6646_v10 = vld [vmem:[#allocation9 + $0x488] ss:$16 sps:$4 sm:$0xff]  }
 0x1db   :  { %1840 = vmatpush1.bf16.msra.mxu0 %v6565_v11  ;;  %1942 = vmatpush1.bf16.msra.mxu1 %v6568_v12  ;;  %v6651_v11 = vld [vmem:[#allocation9 + $0x4a4] ss:$16 sps:$4 sm:$0xff]   ;;  %v6654_v12 = vld [vmem:[#allocation9 + $0x4ac] ss:$16 sps:$4 sm:$0xff]  }
 0x1dc   :  { %1841 = vmatprep.subr.bf16.mxu0 %v6573_v13  ;;  %1943 = vmatprep.subr.bf16.mxu1 %v6576_v14  ;;  %v6649_v13 = vld [vmem:[#allocation9 + $0x4a0] ss:$16 sps:$4 sm:$0xff]   ;;  %v6652_v14 = vld [vmem:[#allocation9 + $0x4a8] ss:$16 sps:$4 sm:$0xff]  }
 0x1df   :  { %1842 = vmatpush1.bf16.msra.mxu0 %v6571_v15  ;;  %1944 = vmatpush1.bf16.msra.mxu1 %v6574_v16  ;;  %v6657_v15 = vld [vmem:[#allocation9 + $0x4c4] ss:$16 sps:$4 sm:$0xff]   ;;  %v6660_v16 = vld [vmem:[#allocation9 + $0x4cc] ss:$16 sps:$4 sm:$0xff]  }
 0x1e0   :  { %1843 = vmatprep.subr.bf16.mxu0 %v6579_v17  ;;  %1945 = vmatprep.subr.bf16.mxu1 %v6582_v19  ;;  %v6655_v17 = vld [vmem:[#allocation9 + $0x4c0] ss:$16 sps:$4 sm:$0xff]   ;;  %v6658_v19 = vld [vmem:[#allocation9 + $0x4c8] ss:$16 sps:$4 sm:$0xff]  }
 0x1e3   :  { %1844 = vmatpush1.bf16.msra.mxu0 %v6577_v20  ;;  %1946 = vmatpush1.bf16.msra.mxu1 %v6580_v22  ;;  %v6663_v20 = vld [vmem:[#allocation9 + $0x4e4] ss:$16 sps:$4 sm:$0xff]   ;;  %v6666_v22 = vld [vmem:[#allocation9 + $0x4ec] ss:$16 sps:$4 sm:$0xff]  }
 0x1e4   :  { %1845 = vmatprep.subr.bf16.mxu0 %v6585_v23  ;;  %1947 = vmatprep.subr.bf16.mxu1 %v6588_v24  ;;  %v6661_v23 = vld [vmem:[#allocation9 + $0x4e0] ss:$16 sps:$4 sm:$0xff]   ;;  %v6664_v24 = vld [vmem:[#allocation9 + $0x4e8] ss:$16 sps:$4 sm:$0xff]  }
 0x1e7   :  { %1846 = vmatpush1.bf16.msra.mxu0 %v6583_v25  ;;  %1948 = vmatpush1.bf16.msra.mxu1 %v6586_v26  ;;  %v6669_v25 = vld [vmem:[#allocation9 + $0x504] ss:$16 sps:$4 sm:$0xff]   ;;  %v6672_v26 = vld [vmem:[#allocation9 + $0x50c] ss:$16 sps:$4 sm:$0xff]  }
 0x1e8   :  { %1847 = vmatprep.subr.bf16.mxu0 %v6591_v27  ;;  %1949 = vmatprep.subr.bf16.mxu1 %v6594_v28  ;;  %v6667_v27 = vld [vmem:[#allocation9 + $0x500] ss:$16 sps:$4 sm:$0xff]   ;;  %v6670_v28 = vld [vmem:[#allocation9 + $0x508] ss:$16 sps:$4 sm:$0xff]  }
 0x1eb   :  { %1848 = vmatpush1.bf16.msra.mxu0 %v6589_v29  ;;  %1950 = vmatpush1.bf16.msra.mxu1 %v6592_v30  ;;  %v6675_v29 = vld [vmem:[#allocation9 + $0x524] ss:$16 sps:$4 sm:$0xff]   ;;  %v6678_v30 = vld [vmem:[#allocation9 + $0x52c] ss:$16 sps:$4 sm:$0xff]  }
 0x1ec   :  { %1849 = vmatprep.subr.bf16.mxu0 %v6597_v31  ;;  %1951 = vmatprep.subr.bf16.mxu1 %v6600_v32  ;;  %v6673_v31 = vld [vmem:[#allocation9 + $0x520] ss:$16 sps:$4 sm:$0xff]   ;;  %v6676_v32 = vld [vmem:[#allocation9 + $0x528] ss:$16 sps:$4 sm:$0xff]  }
 0x1ef   :  { %1850 = vmatpush1.bf16.msra.mxu0 %v6595_v33  ;;  %1952 = vmatpush1.bf16.msra.mxu1 %v6598_v34  ;;  %v6681_v33 = vld [vmem:[#allocation9 + $0x544] ss:$16 sps:$4 sm:$0xff]   ;;  %v6684_v34 = vld [vmem:[#allocation9 + $0x54c] ss:$16 sps:$4 sm:$0xff]  }
 0x1f0   :  { %1851 = vmatprep.subr.bf16.mxu0 %v6603_v35  ;;  %1953 = vmatprep.subr.bf16.mxu1 %v6606_v36  ;;  %v6679_v35 = vld [vmem:[#allocation9 + $0x540] ss:$16 sps:$4 sm:$0xff]   ;;  %v6682_v36 = vld [vmem:[#allocation9 + $0x548] ss:$16 sps:$4 sm:$0xff]  }
 0x1f3   :  { %1852 = vmatpush1.bf16.msra.mxu0 %v6601_v37  ;;  %1954 = vmatpush1.bf16.msra.mxu1 %v6604_v38  ;;  %v6687_v37 = vld [vmem:[#allocation9 + $0x564] ss:$16 sps:$4 sm:$0xff]   ;;  %v6690_v38 = vld [vmem:[#allocation9 + $0x56c] ss:$16 sps:$4 sm:$0xff]  }
 0x1f4   :  { %1853 = vmatprep.subr.bf16.mxu0 %v6609_v39  ;;  %1955 = vmatprep.subr.bf16.mxu1 %v6612_v40  ;;  %v6685_v39 = vld [vmem:[#allocation9 + $0x560] ss:$16 sps:$4 sm:$0xff]   ;;  %v6688_v40 = vld [vmem:[#allocation9 + $0x568] ss:$16 sps:$4 sm:$0xff]  }
 0x1f7   :  { %1854 = vmatpush1.bf16.msra.mxu0 %v6607_v41  ;;  %1956 = vmatpush1.bf16.msra.mxu1 %v6610_v42  ;;  %v6693_v41 = vld [vmem:[#allocation9 + $0x584] ss:$16 sps:$4 sm:$0xff]   ;;  %v6696_v42 = vld [vmem:[#allocation9 + $0x58c] ss:$16 sps:$4 sm:$0xff]  }
 0x1f8   :  { %1855 = vmatprep.subr.bf16.mxu0 %v6615_v43  ;;  %1957 = vmatprep.subr.bf16.mxu1 %v6618_v44  ;;  %v6691_v43 = vld [vmem:[#allocation9 + $0x580] ss:$16 sps:$4 sm:$0xff]   ;;  %v6694_v44 = vld [vmem:[#allocation9 + $0x588] ss:$16 sps:$4 sm:$0xff]  }
 0x1fb   :  { %1856 = vmatpush1.bf16.msra.mxu0 %v6613_v46  ;;  %1958 = vmatpush1.bf16.msra.mxu1 %v6616_v47  ;;  %v6702_v46 = vld [vmem:[#allocation9 + $0x5ac] ss:$16 sps:$4 sm:$0xff]   ;;  %v6697_v47 = vld [vmem:[#allocation9 + $0x5a0] ss:$16 sps:$4 sm:$0xff]  }
 0x1fc   :  { %2790 = vmatprep.subr.bf16.mxu0 %v6621_v48  ;;  %2892 = vmatprep.subr.bf16.mxu1 %v6624_v50  ;;  %v6700_v48 = vld [vmem:[#allocation9 + $0x5a8] ss:$16 sps:$4 sm:$0xff]   ;;  %v6705_v50 = vld [vmem:[#allocation9 + $0x5c4] ss:$16 sps:$4 sm:$0xff]  }
 0x1fe   :  { %1858 = vmatmul.mubr.bf16.vlgmr.msra.gmra.mrb[8].mxu0 %v7608_v49  ;;  %1960 = vmatmul.mubr.bf16.vlgmr.msra.gmra.mrb[8].mxu1 %v7608_v49  ;;  %v6642_v49 = vld [vmem:[#allocation9 + $0x46c] ss:$16 sps:$4 sm:$0xff]  }
 0x1ff   :  { %1867 = vmatprep.mubr.bf16.mxu0 %v983_v59  ;;  %1969 = vmatprep.mubr.bf16.mxu1 %v983_v59  ;;  %v6714_v59 = vld [vmem:[#allocation9 + $0x5ec] ss:$16 sps:$4 sm:$0xff]  }
 0x200   :  { %2791 = vmatpush1.bf16.msra.mxu0 %v6619_v55  ;;  %2893 = vmatpush1.bf16.msra.mxu1 %v6622_v57  ;;  %v6706_v55 = vld [vmem:[#allocation9 + $0x5c8] ss:$16 sps:$4 sm:$0xff]   ;;  %v6711_v57 = vld [vmem:[#allocation9 + $0x5e4] ss:$16 sps:$4 sm:$0xff]  }
 0x201   :  { %2792 = vmatprep.subr.bf16.mxu0 %v6627_v21  ;;  %2894 = vmatprep.subr.bf16.mxu1 %v6630_v54  ;;  %v6709_v21 = vld [vmem:[#allocation9 + $0x5e0] ss:$16 sps:$4 sm:$0xff]   ;;  %v6712_v54 = vld [vmem:[#allocation9 + $0x5e8] ss:$16 sps:$4 sm:$0xff]  }
 0x204   :  { %2793 = vmatpush1.bf16.msra.mxu0 %v6625_v61  ;;  %2895 = vmatpush1.bf16.msra.mxu1 %v6628_v62  ;;  %v6720_v61 = vld [vmem:[#allocation9 + $0x60c] ss:$16 sps:$4 sm:$0xff]   ;;  %v1112_v62 = vld [vmem:[#allocation11] sm:$0xf] }
 0x205   :  { %2794 = vmatprep.subr.bf16.mxu0 %v6633_v18  ;;  %2896 = vmatprep.subr.bf16.mxu1 %v6636_v51  ;;  %v1117_v18 = vrot.slane %v1112_v62, %v7588_v56  ;;  %v7622_v51 = vrot.slane %v1112_v62, %v7594_v5 }
 0x206   :  { %1868 = vmatmul.mubr.bf16.gmra.mrb[12].mxu0 %v982_v63  ;;  %1970 = vmatmul.mubr.bf16.gmra.mrb[12].mxu1 %v982_v63  ;;  %v1121_v63 = vrot.slane %v1112_v62, %v7590_v58 }
 0x208   :  { %2795 = vmatpush1.bf16.msra.mxu0 %v6631_v0  ;;  %2897 = vmatpush1.bf16.msra.mxu1 %v6634_v1  ;;  %v7626_v0 = vrot.slane %v1112_v62, %v7596_v6  ;;  %v6736_v62 = vld [vmem:[#allocation9 + $0x668] ss:$16 sps:$4 sm:$0xff]  }
 0x209   :  { %2796 = vmatprep.subr.bf16.mxu0 %v6639_v2  ;;  %2898 = vmatprep.subr.bf16.mxu1 %v6642_v49 }
 0x20c   :  { %2797 = vmatpush1.bf16.msra.mxu0 %v6637_v3  ;;  %2899 = vmatpush1.bf16.msra.mxu1 %v6640_v4 }
 0x20d   :  { %2798 = vmatprep.subr.bf16.mxu0 %v6645_v7  ;;  %2900 = vmatprep.subr.bf16.mxu1 %v6648_v8 }
 0x210   :  { %2799 = vmatpush1.bf16.msra.mxu0 %v6643_v9  ;;  %2901 = vmatpush1.bf16.msra.mxu1 %v6646_v10 }
 0x211   :  { %2800 = vmatprep.subr.bf16.mxu0 %v6651_v11  ;;  %2902 = vmatprep.subr.bf16.mxu1 %v6654_v12 }
 0x214   :  { %2801 = vmatpush1.bf16.msra.mxu0 %v6649_v13  ;;  %2903 = vmatpush1.bf16.msra.mxu1 %v6652_v14 }
 0x215   :  { %2802 = vmatprep.subr.bf16.mxu0 %v6657_v15  ;;  %2904 = vmatprep.subr.bf16.mxu1 %v6660_v16 }
 0x218   :  { %2803 = vmatpush1.bf16.msra.mxu0 %v6655_v17  ;;  %2905 = vmatpush1.bf16.msra.mxu1 %v6658_v19 }
 0x219   :  { %2804 = vmatprep.subr.bf16.mxu0 %v6663_v20  ;;  %2906 = vmatprep.subr.bf16.mxu1 %v6666_v22 }
 0x21c   :  { %2805 = vmatpush1.bf16.msra.mxu0 %v6661_v23  ;;  %2907 = vmatpush1.bf16.msra.mxu1 %v6664_v24 }
 0x21d   :  { %2806 = vmatprep.subr.bf16.mxu0 %v6669_v25  ;;  %2908 = vmatprep.subr.bf16.mxu1 %v6672_v26 }
 0x220   :  { %2807 = vmatpush1.bf16.msra.mxu0 %v6667_v27  ;;  %2909 = vmatpush1.bf16.msra.mxu1 %v6670_v28 }
 0x221   :  { %2808 = vmatprep.subr.bf16.mxu0 %v6675_v29  ;;  %2910 = vmatprep.subr.bf16.mxu1 %v6678_v30 }
 0x224   :  { %2809 = vmatpush1.bf16.msra.mxu0 %v6673_v31  ;;  %2911 = vmatpush1.bf16.msra.mxu1 %v6676_v32 }
 0x225   :  { %2810 = vmatprep.subr.bf16.mxu0 %v6681_v33  ;;  %2912 = vmatprep.subr.bf16.mxu1 %v6684_v34  ;;  %v6715_v34 = vld [vmem:[#allocation9 + $0x600] ss:$16 sps:$4 sm:$0xff]  }
 0x228   :  { %2811 = vmatpush1.bf16.msra.mxu0 %v6679_v35  ;;  %2913 = vmatpush1.bf16.msra.mxu1 %v6682_v36  ;;  %v6718_v35 = vld [vmem:[#allocation9 + $0x608] ss:$16 sps:$4 sm:$0xff]  }
 0x229   :  { %2812 = vmatprep.subr.bf16.mxu0 %v6687_v37  ;;  %2914 = vmatprep.subr.bf16.mxu1 %v6690_v38 }
 0x22c   :  { %2813 = vmatpush1.bf16.msra.mxu0 %v6685_v39  ;;  %2915 = vmatpush1.bf16.msra.mxu1 %v6688_v40  ;;  %v6723_v39 = vld [vmem:[#allocation9 + $0x624] ss:$16 sps:$4 sm:$0xff]   ;;  %v6726_v40 = vld [vmem:[#allocation9 + $0x62c] ss:$16 sps:$4 sm:$0xff]  }
 0x22d   :  { %2814 = vmatprep.subr.bf16.mxu0 %v6693_v41  ;;  %2916 = vmatprep.subr.bf16.mxu1 %v6696_v42 }
 0x230   :  { %2815 = vmatpush1.bf16.msra.mxu0 %v6691_v43  ;;  %2917 = vmatpush1.bf16.msra.mxu1 %v6694_v44 }
 0x231   :  { %2816 = vmatprep.subr.bf16.mxu0 %v6699_v45  ;;  %2918 = vmatprep.subr.bf16.mxu1 %v6702_v46 }
 0x234   :  { %2817 = vmatpush1.bf16.msra.mxu0 %v6697_v47  ;;  %2919 = vmatpush1.bf16.msra.mxu1 %v6700_v48  ;;  %v6721_v47 = vld [vmem:[#allocation9 + $0x620] ss:$16 sps:$4 sm:$0xff]   ;;  %v6724_v48 = vld [vmem:[#allocation9 + $0x628] ss:$16 sps:$4 sm:$0xff]  }
 0x235   :  { %2818 = vmatprep.subr.bf16.mxu0 %v6705_v50  ;;  %2920 = vmatprep.subr.bf16.mxu1 %v6708_v52 }
 0x238   :  { %2819 = vmatpush1.bf16.msra.mxu0 %v6703_v53  ;;  %2921 = vmatpush1.bf16.msra.mxu1 %v6706_v55  ;;  %v6729_v53 = vld [vmem:[#allocation9 + $0x644] ss:$16 sps:$4 sm:$0xff]   ;;  %v6732_v55 = vld [vmem:[#allocation9 + $0x64c] ss:$16 sps:$4 sm:$0xff]  }
 0x239   :  { %2820 = vmatprep.subr.bf16.mxu0 %v6711_v57  ;;  %2922 = vmatprep.subr.bf16.mxu1 %v6714_v59  ;;  %v6727_v57 = vld [vmem:[#allocation9 + $0x640] ss:$16 sps:$4 sm:$0xff]   ;;  %v6730_v59 = vld [vmem:[#allocation9 + $0x648] ss:$16 sps:$4 sm:$0xff]  }
 0x23c   :  { %2821 = vmatpush1.bf16.msra.mxu0 %v6709_v21  ;;  %2923 = vmatpush1.bf16.msra.mxu1 %v6712_v54  ;;  %v6735_v54 = vld [vmem:[#allocation9 + $0x664] ss:$16 sps:$4 sm:$0xff]  }
 0x23d   :  { %2841 = vmatprep.subr.bf16.mxu0 %v6717_v60  ;;  %2943 = vmatprep.subr.bf16.mxu1 %v6720_v61  ;;  %v6738_v60 = vld [vmem:[#allocation9 + $0x66c] ss:$16 sps:$4 sm:$0xff]   ;;  %v6733_v61 = vld [vmem:[#allocation9 + $0x660] ss:$16 sps:$4 sm:$0xff]  }
 0x2d1   :  { %v1859_v1 = vpop.f32.mrb[8].mxu0  ;;  %v1961_v2 = vpop.f32.mrb[8].mxu1 }
 0x2d2   :  { %v6137_v49 = vadd.f32 %v1859_v1, %v1117_v18  ;;  %v6143_v3 = vadd.f32 %v1961_v2, %v7622_v51  ;;  %v1861_v4 = vpop.f32.mrb[9].mxu0  ;;  %v1963_v7 = vpop.f32.mrb[9].mxu1  ;;  %v6739_v1 = vld [vmem:[#allocation9 + $0x680] ss:$16 sps:$4 sm:$0xff]   ;;  %v6742_v2 = vld [vmem:[#allocation9 + $0x688] ss:$16 sps:$4 sm:$0xff]  }
 0x2d3   :  { %v6138_v8 = vadd.f32 %v1861_v4, %v1121_v63  ;;  %v6144_v9 = vadd.f32 %v1963_v7, %v7626_v0  ;;  %v1863_v10 = vpop.f32.mrb[10].mxu0  ;;  %v1965_v11 = vpop.f32.mrb[10].mxu1  ;;  %v6745_v4 = vld [vmem:[#allocation9 + $0x6a0] ss:$16 sps:$4 sm:$0xff]   ;;  %v6748_v7 = vld [vmem:[#allocation9 + $0x6a8] ss:$16 sps:$4 sm:$0xff]  }
 0x2d4   :  { %v6139_v12 = vadd.f32 %v1863_v10, %v1117_v18  ;;  %v6145_v13 = vadd.f32 %v1965_v11, %v7622_v51  ;;  %v1865_v14 = vpop.f32.mrb[11].mxu0  ;;  %v1967_v15 = vpop.f32.mrb[11].mxu1  ;;  %v1978_v19 = vmax.f32 %v6137_v49, 0.0  ;;  %v1980_v20 = vmax.f32 %v6143_v3, 0.0  ;;  %v6747_v49 = vld [vmem:[#allocation9 + $0x6a4] ss:$16 sps:$4 sm:$0xff]  }
 0x2d5   :  { %v6140_v16 = vadd.f32 %v1865_v14, %v1121_v63  ;;  %v6146_v17 = vadd.f32 %v1967_v15, %v7626_v0  ;;  %v1979_v24 = vmax.f32 %v6138_v8, 0.0  ;;  %v1981_v25 = vmax.f32 %v6144_v9, 0.0  ;;  %v6750_v3 = vld [vmem:[#allocation9 + $0x6ac] ss:$16 sps:$4 sm:$0xff]   ;;  %v6753_v8 = vld [vmem:[#allocation9 + $0x6c4] ss:$16 sps:$4 sm:$0xff]  }
 0x2d6   :  { %v1982_v22 = vmax.f32 %v6139_v12, 0.0  ;;  %v1984_v23 = vmax.f32 %v6145_v13, 0.0  ;;  %v6756_v9 = vld [vmem:[#allocation9 + $0x6cc] ss:$16 sps:$4 sm:$0xff]   ;;  %v6751_v10 = vld [vmem:[#allocation9 + $0x6c0] ss:$16 sps:$4 sm:$0xff]  }
 0x2d7   :  { %v1983_v26 = vmax.f32 %v6140_v16, 0.0  ;;  %v1985_v27 = vmax.f32 %v6146_v17, 0.0  ;;  %v6754_v11 = vld [vmem:[#allocation9 + $0x6c8] ss:$16 sps:$4 sm:$0xff]   ;;  %v6759_v12 = vld [vmem:[#allocation9 + $0x6e4] ss:$16 sps:$4 sm:$0xff]  }
 0x2d8   :  { %v1990_v28 = vpack.c.bf16 %v1982_v22, %v1978_v19  ;;  %v7632_v29 = vpack.c.bf16 %v1984_v23, %v1980_v20  ;;  %v6762_v13 = vld [vmem:[#allocation9 + $0x6ec] ss:$16 sps:$4 sm:$0xff]   ;;  %v6757_v14 = vld [vmem:[#allocation9 + $0x6e0] ss:$16 sps:$4 sm:$0xff]   ;;  %v6760_v15 = vld [vmem:[#allocation9 + $0x6e8] ss:$16 sps:$4 sm:$0xff]  }
 0x2d9   :  { %v1991_v30 = vpack.c.bf16 %v1983_v26, %v1979_v24  ;;  %v1993_v31 = vpack.c.bf16 %v1985_v27, %v1981_v25  ;;  %v1869_v32 = vpop.f32.mrb[12].mxu0  ;;  %v7634_v33 = vpop.f32.mrb[12].mxu1  ;;  %v6765_v16 = vld [vmem:[#allocation9 + $0x704] ss:$16 sps:$4 sm:$0xff]   ;;  %v6768_v17 = vld [vmem:[#allocation9 + $0x70c] ss:$16 sps:$4 sm:$0xff]  }
 0x2da   :  { %v6141_v36 = vadd.f32 %v1869_v32, %v1117_v18  ;;  %v1871_v37 = vpop.f32.mrb[13].mxu0  ;;  %v7636_v38 = vpop.f32.mrb[13].mxu1  ;;  %v6741_v18 = vld [vmem:[#allocation9 + $0x684] ss:$16 sps:$4 sm:$0xff]   ;;  %v6763_v19 = vld [vmem:[#allocation9 + $0x700] ss:$16 sps:$4 sm:$0xff]  }
 0x2db   :  { %v6142_v41 = vadd.f32 %v1871_v37, %v1121_v63  ;;  %v1873_v42 = vpop.f32.mrb[14].mxu0  ;;  %v1975_v43 = vpop.f32.mrb[14].mxu1  ;;  %2822 = vmatprep.mubr.bf16.mxu0 %v1991_v30  ;;  %2924 = vmatprep.mubr.bf16.mxu1 %v1991_v30  ;;  %v6744_v63 = vld [vmem:[#allocation9 + $0x68c] ss:$16 sps:$4 sm:$0xff]   ;;  %v6766_v20 = vld [vmem:[#allocation9 + $0x708] ss:$16 sps:$4 sm:$0xff]  }
 0x2dc   :  { %v1874_v44 = vpop.f32.mrb[15].mxu0  ;;  %v1976_v45 = vpop.f32.mrb[15].mxu1  ;;  %2823 = vmatmul.mubr.bf16.vlgmr.msra.gmra.mrb[16].mxu0 %v1990_v28  ;;  %2925 = vmatmul.mubr.bf16.vlgmr.msra.gmra.mrb[16].mxu1 %v1990_v28  ;;  %v1986_v50 = vmax.f32 %v6141_v36, 0.0  ;;  %v6771_v22 = vld [vmem:[#allocation9 + $0x724] ss:$16 sps:$4 sm:$0xff]  }
 0x2dd   :  { %v1987_v46 = vmax.f32 %v6142_v41, 0.0  ;;  %2842 = vmatpush1.bf16.msra.mxu0 %v6715_v34  ;;  %2944 = vmatpush1.bf16.msra.mxu1 %v6718_v35  ;;  %v6774_v23 = vld [vmem:[#allocation9 + $0x72c] ss:$16 sps:$4 sm:$0xff]   ;;  %v6769_v24 = vld [vmem:[#allocation9 + $0x720] ss:$16 sps:$4 sm:$0xff]  }
 0x2de   :  { %2843 = vmatprep.subr.bf16.mxu0 %v6723_v39  ;;  %2945 = vmatprep.subr.bf16.mxu1 %v6726_v40  ;;  %v1994_v21 = vpack.c.bf16 %v1986_v50, %v1986_v50  ;;  %v6772_v25 = vld [vmem:[#allocation9 + $0x728] ss:$16 sps:$4 sm:$0xff]   ;;  %v6777_v26 = vld [vmem:[#allocation9 + $0x744] ss:$16 sps:$4 sm:$0xff]   ;;  %v6780_v27 = vld [vmem:[#allocation9 + $0x74c] ss:$16 sps:$4 sm:$0xff]  }
 0x2df   :  { %v1995_v52 = vpack.c.bf16 %v1987_v46, %v1987_v46  ;;  %v6775_v28 = vld [vmem:[#allocation9 + $0x740] ss:$16 sps:$4 sm:$0xff]   ;;  %v6778_v30 = vld [vmem:[#allocation9 + $0x748] ss:$16 sps:$4 sm:$0xff]   ;;  %v6786_v32 = vld [vmem:[#allocation9 + $0x76c] ss:$16 sps:$4 sm:$0xff]  }
 0x2e0   :  { %v6781_v34 = vld [vmem:[#allocation9 + $0x760] ss:$16 sps:$4 sm:$0xff]   ;;  %v6784_v35 = vld [vmem:[#allocation9 + $0x768] ss:$16 sps:$4 sm:$0xff]   ;;  %v6789_v36 = vld [vmem:[#allocation9 + $0x784] ss:$16 sps:$4 sm:$0xff]  }
 0x2e1   :  { %2844 = vmatpush1.bf16.msra.mxu0 %v6721_v47  ;;  %2946 = vmatpush1.bf16.msra.mxu1 %v6724_v48  ;;  %v6792_v37 = vld [vmem:[#allocation9 + $0x78c] ss:$16 sps:$4 sm:$0xff]   ;;  %v6787_v39 = vld [vmem:[#allocation9 + $0x780] ss:$16 sps:$4 sm:$0xff]   ;;  %v6790_v40 = vld [vmem:[#allocation9 + $0x788] ss:$16 sps:$4 sm:$0xff]  }
 0x2e2   :  { %2832 = vmatprep.mubr.bf16.mxu0 %v1995_v52  ;;  %2934 = vmatprep.mubr.bf16.mxu1 %v1995_v52  ;;  %v6795_v41 = vld [vmem:[#allocation9 + $0x7a4] ss:$16 sps:$4 sm:$0xff]   ;;  %v6798_v42 = vld [vmem:[#allocation9 + $0x7ac] ss:$16 sps:$4 sm:$0xff]   ;;  %v6793_v43 = vld [vmem:[#allocation9 + $0x7a0] ss:$16 sps:$4 sm:$0xff]  }
 0x2e3   :  { %2845 = vmatprep.subr.bf16.mxu0 %v6729_v53  ;;  %2947 = vmatprep.subr.bf16.mxu1 %v6732_v55  ;;  %v6796_v44 = vld [vmem:[#allocation9 + $0x7a8] ss:$16 sps:$4 sm:$0xff]   ;;  %v6801_v45 = vld [vmem:[#allocation9 + $0x7c4] ss:$16 sps:$4 sm:$0xff]   ;;  %v6804_v46 = vld [vmem:[#allocation9 + $0x7cc] ss:$16 sps:$4 sm:$0xff]   ;;  %v6148_v53 = vadd.f32 %v7636_v38, %v7626_v0 }
 0x2e4   :  { %2833 = vmatmul.mubr.bf16.gmra.mrb[20].mxu0 %v1994_v21  ;;  %2935 = vmatmul.mubr.bf16.gmra.mrb[20].mxu1 %v1994_v21  ;;  %v6799_v47 = vld [vmem:[#allocation9 + $0x7c0] ss:$16 sps:$4 sm:$0xff]   ;;  %v6802_v48 = vld [vmem:[#allocation9 + $0x7c8] ss:$16 sps:$4 sm:$0xff]   ;;  %v6807_v50 = vld [vmem:[#allocation9 + $0x7e4] ss:$16 sps:$4 sm:$0xff]  }
 0x2e5   :  { %2846 = vmatpush1.bf16.msra.mxu0 %v6727_v57  ;;  %2948 = vmatpush1.bf16.msra.mxu1 %v6730_v59  ;;  %v6810_v52 = vld [vmem:[#allocation9 + $0x7ec] ss:$16 sps:$4 sm:$0xff]   ;;  %v6805_v55 = vld [vmem:[#allocation9 + $0x7e0] ss:$16 sps:$4 sm:$0xff]   ;;  %v6808_v57 = vld [vmem:[#allocation9 + $0x7e8] ss:$16 sps:$4 sm:$0xff]  }
 0x2e6   :  { %2873 = vmatprep.mubr.bf16.mxu0 %v1993_v31  ;;  %2975 = vmatprep.mubr.bf16.mxu1 %v1993_v31  ;;  %v6783_v31 = vld [vmem:[#allocation9 + $0x764] ss:$16 sps:$4 sm:$0xff]   ;;  %v6816_v21 = vld [vmem:[#allocation9 + $0x80c] ss:$16 sps:$4 sm:$0xff]  }
 0x2e7   :  { %2847 = vmatprep.subr.bf16.mxu0 %v6735_v54  ;;  %2949 = vmatprep.subr.bf16.mxu1 %v6738_v60  ;;  %v6813_v59 = vld [vmem:[#allocation9 + $0x804] ss:$16 sps:$4 sm:$0xff]   ;;  %v1989_v54 = vmax.f32 %v6148_v53, 0.0  ;;  %v6147_v60 = vadd.f32 %v7634_v33, %v7622_v51  ;;  %v6822_v38 = vld [vmem:[#allocation9 + $0x82c] ss:$16 sps:$4 sm:$0xff]  }
 0x2e8   :  { %v6819_v0 = vld [vmem:[#allocation9 + $0x824] ss:$16 sps:$4 sm:$0xff]   ;;  %v6828_v33 = vld [vmem:[#allocation9 + $0x84c] ss:$16 sps:$4 sm:$0xff]  }
 0x2e9   :  { %2848 = vmatpush1.bf16.msra.mxu0 %v6733_v61  ;;  %2950 = vmatpush1.bf16.msra.mxu1 %v6736_v62  ;;  %v6811_v61 = vld [vmem:[#allocation9 + $0x800] ss:$16 sps:$4 sm:$0xff]   ;;  %v6814_v62 = vld [vmem:[#allocation9 + $0x808] ss:$16 sps:$4 sm:$0xff]   ;;  %v6825_v51 = vld [vmem:[#allocation9 + $0x844] ss:$16 sps:$4 sm:$0xff]  }
 0x2ea   :  { %2849 = vmatprep.subr.bf16.mxu0 %v6741_v18  ;;  %2951 = vmatprep.subr.bf16.mxu1 %v6744_v63  ;;  %v1997_v18 = vpack.c.bf16 %v1989_v54, %v1989_v54  ;;  %v1988_v63 = vmax.f32 %v6147_v60, 0.0  ;;  %v6891_v53 = vld [vmem:[#allocation9 + $0x9a4] ss:$16 sps:$4 sm:$0xff]   ;;  %v6900_v54 = vld [vmem:[#allocation9 + $0x9cc] ss:$16 sps:$4 sm:$0xff]  }
 0x2eb   :  { %v6895_v60 = vld [vmem:[#allocation9 + $0x9c0] ss:$16 sps:$4 sm:$0xff]  }
 0x2ed   :  { %2850 = vmatpush1.bf16.msra.mxu0 %v6739_v1  ;;  %2952 = vmatpush1.bf16.msra.mxu1 %v6742_v2  ;;  %v6817_v1 = vld [vmem:[#allocation9 + $0x820] ss:$16 sps:$4 sm:$0xff]   ;;  %v6820_v2 = vld [vmem:[#allocation9 + $0x828] ss:$16 sps:$4 sm:$0xff]  }
 0x2ee   :  { %2851 = vmatprep.subr.bf16.mxu0 %v6747_v49  ;;  %2953 = vmatprep.subr.bf16.mxu1 %v6750_v3  ;;  %v1996_v49 = vpack.c.bf16 %v1988_v63, %v1988_v63  ;;  %v6823_v3 = vld [vmem:[#allocation9 + $0x840] ss:$16 sps:$4 sm:$0xff]   ;;  %v6909_v63 = vld [vmem:[#allocation9 + $0xa04] ss:$16 sps:$4 sm:$0xff]  }
 0x2f1   :  { %2852 = vmatpush1.bf16.msra.mxu0 %v6745_v4  ;;  %2954 = vmatpush1.bf16.msra.mxu1 %v6748_v7  ;;  %v6826_v4 = vld [vmem:[#allocation9 + $0x848] ss:$16 sps:$4 sm:$0xff]   ;;  %v6831_v7 = vld [vmem:[#allocation9 + $0x864] ss:$16 sps:$4 sm:$0xff]  }
 0x2f2   :  { %2853 = vmatprep.subr.bf16.mxu0 %v6753_v8  ;;  %2955 = vmatprep.subr.bf16.mxu1 %v6756_v9  ;;  %v6829_v8 = vld [vmem:[#allocation9 + $0x860] ss:$16 sps:$4 sm:$0xff]   ;;  %v6832_v9 = vld [vmem:[#allocation9 + $0x868] ss:$16 sps:$4 sm:$0xff]  }
 0x2f5   :  { %2854 = vmatpush1.bf16.msra.mxu0 %v6751_v10  ;;  %2956 = vmatpush1.bf16.msra.mxu1 %v6754_v11  ;;  %v6837_v10 = vld [vmem:[#allocation9 + $0x884] ss:$16 sps:$4 sm:$0xff]   ;;  %v6840_v11 = vld [vmem:[#allocation9 + $0x88c] ss:$16 sps:$4 sm:$0xff]  }
 0x2f6   :  { %2855 = vmatprep.subr.bf16.mxu0 %v6759_v12  ;;  %2957 = vmatprep.subr.bf16.mxu1 %v6762_v13  ;;  %v6835_v12 = vld [vmem:[#allocation9 + $0x880] ss:$16 sps:$4 sm:$0xff]   ;;  %v6838_v13 = vld [vmem:[#allocation9 + $0x888] ss:$16 sps:$4 sm:$0xff]  }
 0x2f9   :  { %2856 = vmatpush1.bf16.msra.mxu0 %v6757_v14  ;;  %2958 = vmatpush1.bf16.msra.mxu1 %v6760_v15  ;;  %v6843_v14 = vld [vmem:[#allocation9 + $0x8a4] ss:$16 sps:$4 sm:$0xff]   ;;  %v6846_v15 = vld [vmem:[#allocation9 + $0x8ac] ss:$16 sps:$4 sm:$0xff]  }
 0x2fa   :  { %2857 = vmatprep.subr.bf16.mxu0 %v6765_v16  ;;  %2959 = vmatprep.subr.bf16.mxu1 %v6768_v17  ;;  %v6841_v16 = vld [vmem:[#allocation9 + $0x8a0] ss:$16 sps:$4 sm:$0xff]   ;;  %v6844_v17 = vld [vmem:[#allocation9 + $0x8a8] ss:$16 sps:$4 sm:$0xff]  }
 0x2fd   :  { %2858 = vmatpush1.bf16.msra.mxu0 %v6763_v19  ;;  %2960 = vmatpush1.bf16.msra.mxu1 %v6766_v20  ;;  %v6849_v19 = vld [vmem:[#allocation9 + $0x8c4] ss:$16 sps:$4 sm:$0xff]   ;;  %v6852_v20 = vld [vmem:[#allocation9 + $0x8cc] ss:$16 sps:$4 sm:$0xff]  }
 0x2fe   :  { %2859 = vmatprep.subr.bf16.mxu0 %v6771_v22  ;;  %2961 = vmatprep.subr.bf16.mxu1 %v6774_v23  ;;  %v6847_v22 = vld [vmem:[#allocation9 + $0x8c0] ss:$16 sps:$4 sm:$0xff]   ;;  %v6850_v23 = vld [vmem:[#allocation9 + $0x8c8] ss:$16 sps:$4 sm:$0xff]  }
 0x301   :  { %2860 = vmatpush1.bf16.msra.mxu0 %v6769_v24  ;;  %2962 = vmatpush1.bf16.msra.mxu1 %v6772_v25  ;;  %v6855_v24 = vld [vmem:[#allocation9 + $0x8e4] ss:$16 sps:$4 sm:$0xff]   ;;  %v6858_v25 = vld [vmem:[#allocation9 + $0x8ec] ss:$16 sps:$4 sm:$0xff]  }
 0x302   :  { %2861 = vmatprep.subr.bf16.mxu0 %v6777_v26  ;;  %2963 = vmatprep.subr.bf16.mxu1 %v6780_v27  ;;  %v6853_v26 = vld [vmem:[#allocation9 + $0x8e0] ss:$16 sps:$4 sm:$0xff]   ;;  %v6856_v27 = vld [vmem:[#allocation9 + $0x8e8] ss:$16 sps:$4 sm:$0xff]  }
 0x305   :  { %2862 = vmatpush1.bf16.msra.mxu0 %v6775_v28  ;;  %2964 = vmatpush1.bf16.msra.mxu1 %v6778_v30  ;;  %v6861_v28 = vld [vmem:[#allocation9 + $0x904] ss:$16 sps:$4 sm:$0xff]   ;;  %v6864_v30 = vld [vmem:[#allocation9 + $0x90c] ss:$16 sps:$4 sm:$0xff]  }
 0x306   :  { %2863 = vmatprep.subr.bf16.mxu0 %v6783_v31  ;;  %2965 = vmatprep.subr.bf16.mxu1 %v6786_v32  ;;  %v6859_v31 = vld [vmem:[#allocation9 + $0x900] ss:$16 sps:$4 sm:$0xff]   ;;  %v6862_v32 = vld [vmem:[#allocation9 + $0x908] ss:$16 sps:$4 sm:$0xff]  }
 0x309   :  { %2864 = vmatpush1.bf16.msra.mxu0 %v6781_v34  ;;  %2966 = vmatpush1.bf16.msra.mxu1 %v6784_v35  ;;  %v6867_v34 = vld [vmem:[#allocation9 + $0x924] ss:$16 sps:$4 sm:$0xff]   ;;  %v6870_v35 = vld [vmem:[#allocation9 + $0x92c] ss:$16 sps:$4 sm:$0xff]  }
 0x30a   :  { %2865 = vmatprep.subr.bf16.mxu0 %v6789_v36  ;;  %2967 = vmatprep.subr.bf16.mxu1 %v6792_v37  ;;  %v6865_v36 = vld [vmem:[#allocation9 + $0x920] ss:$16 sps:$4 sm:$0xff]   ;;  %v6868_v37 = vld [vmem:[#allocation9 + $0x928] ss:$16 sps:$4 sm:$0xff]  }
 0x30d   :  { %2866 = vmatpush1.bf16.msra.mxu0 %v6787_v39  ;;  %2968 = vmatpush1.bf16.msra.mxu1 %v6790_v40  ;;  %v6873_v39 = vld [vmem:[#allocation9 + $0x944] ss:$16 sps:$4 sm:$0xff]   ;;  %v6876_v40 = vld [vmem:[#allocation9 + $0x94c] ss:$16 sps:$4 sm:$0xff]  }
 0x30e   :  { %2867 = vmatprep.subr.bf16.mxu0 %v6795_v41  ;;  %2969 = vmatprep.subr.bf16.mxu1 %v6798_v42  ;;  %v6871_v41 = vld [vmem:[#allocation9 + $0x940] ss:$16 sps:$4 sm:$0xff]   ;;  %v6874_v42 = vld [vmem:[#allocation9 + $0x948] ss:$16 sps:$4 sm:$0xff]  }
 0x311   :  { %2868 = vmatpush1.bf16.msra.mxu0 %v6793_v43  ;;  %2970 = vmatpush1.bf16.msra.mxu1 %v6796_v44  ;;  %v6879_v43 = vld [vmem:[#allocation9 + $0x964] ss:$16 sps:$4 sm:$0xff]   ;;  %v6882_v44 = vld [vmem:[#allocation9 + $0x96c] ss:$16 sps:$4 sm:$0xff]  }
 0x312   :  { %2869 = vmatprep.subr.bf16.mxu0 %v6801_v45  ;;  %2971 = vmatprep.subr.bf16.mxu1 %v6804_v46  ;;  %v6877_v45 = vld [vmem:[#allocation9 + $0x960] ss:$16 sps:$4 sm:$0xff]   ;;  %v6880_v46 = vld [vmem:[#allocation9 + $0x968] ss:$16 sps:$4 sm:$0xff]  }
 0x315   :  { %2870 = vmatpush1.bf16.msra.mxu0 %v6799_v47  ;;  %2972 = vmatpush1.bf16.msra.mxu1 %v6802_v48  ;;  %v6885_v47 = vld [vmem:[#allocation9 + $0x984] ss:$16 sps:$4 sm:$0xff]   ;;  %v6888_v48 = vld [vmem:[#allocation9 + $0x98c] ss:$16 sps:$4 sm:$0xff]  }
 0x316   :  { %2871 = vmatprep.subr.bf16.mxu0 %v6807_v50  ;;  %2973 = vmatprep.subr.bf16.mxu1 %v6810_v52  ;;  %v6883_v50 = vld [vmem:[#allocation9 + $0x980] ss:$16 sps:$4 sm:$0xff]   ;;  %v6886_v52 = vld [vmem:[#allocation9 + $0x988] ss:$16 sps:$4 sm:$0xff]  }
 0x319   :  { %2872 = vmatpush1.bf16.msra.mxu0 %v6805_v55  ;;  %2974 = vmatpush1.bf16.msra.mxu1 %v6808_v57  ;;  %v6894_v55 = vld [vmem:[#allocation9 + $0x9ac] ss:$16 sps:$4 sm:$0xff]   ;;  %v6889_v57 = vld [vmem:[#allocation9 + $0x9a0] ss:$16 sps:$4 sm:$0xff]  }
 0x31a   :  { %3806 = vmatprep.subr.bf16.mxu0 %v6813_v59  ;;  %3908 = vmatprep.subr.bf16.mxu1 %v6816_v21  ;;  %v6892_v59 = vld [vmem:[#allocation9 + $0x9a8] ss:$16 sps:$4 sm:$0xff]   ;;  %v6897_v21 = vld [vmem:[#allocation9 + $0x9c4] ss:$16 sps:$4 sm:$0xff]  }
 0x31c   :  { %2874 = vmatmul.mubr.bf16.vlgmr.msra.gmra.mrb[16].mxu0 %v7632_v29  ;;  %2976 = vmatmul.mubr.bf16.vlgmr.msra.gmra.mrb[16].mxu1 %v7632_v29  ;;  %v6834_v29 = vld [vmem:[#allocation9 + $0x86c] ss:$16 sps:$4 sm:$0xff]  }
 0x31d   :  { %2883 = vmatprep.mubr.bf16.mxu0 %v1997_v18  ;;  %2985 = vmatprep.mubr.bf16.mxu1 %v1997_v18  ;;  %v6906_v18 = vld [vmem:[#allocation9 + $0x9ec] ss:$16 sps:$4 sm:$0xff]  }
 0x31e   :  { %3807 = vmatpush1.bf16.msra.mxu0 %v6811_v61  ;;  %3909 = vmatpush1.bf16.msra.mxu1 %v6814_v62  ;;  %v6898_v61 = vld [vmem:[#allocation9 + $0x9c8] ss:$16 sps:$4 sm:$0xff]   ;;  %v6903_v62 = vld [vmem:[#allocation9 + $0x9e4] ss:$16 sps:$4 sm:$0xff]  }
 0x31f   :  { %3808 = vmatprep.subr.bf16.mxu0 %v6819_v0  ;;  %3910 = vmatprep.subr.bf16.mxu1 %v6822_v38  ;;  %v6901_v0 = vld [vmem:[#allocation9 + $0x9e0] ss:$16 sps:$4 sm:$0xff]   ;;  %v6904_v38 = vld [vmem:[#allocation9 + $0x9e8] ss:$16 sps:$4 sm:$0xff]  }
 0x322   :  { %3809 = vmatpush1.bf16.msra.mxu0 %v6817_v1  ;;  %3911 = vmatpush1.bf16.msra.mxu1 %v6820_v2  ;;  %v6912_v1 = vld [vmem:[#allocation9 + $0xa0c] ss:$16 sps:$4 sm:$0xff]   ;;  %v2128_v2 = vld [vmem:[#allocation11 + $0x4] sm:$0xf] }
 0x323   :  { %3810 = vmatprep.subr.bf16.mxu0 %v6825_v51  ;;  %3912 = vmatprep.subr.bf16.mxu1 %v6828_v33  ;;  %v2133_v51 = vrot.slane %v2128_v2, %v7588_v56  ;;  %v7646_v33 = vrot.slane %v2128_v2, %v7594_v5 }
 0x324   :  { %2884 = vmatmul.mubr.bf16.gmra.mrb[20].mxu0 %v1996_v49  ;;  %2986 = vmatmul.mubr.bf16.gmra.mrb[20].mxu1 %v1996_v49  ;;  %v2137_v49 = vrot.slane %v2128_v2, %v7590_v58 }
 0x326   :  { %3811 = vmatpush1.bf16.msra.mxu0 %v6823_v3  ;;  %3913 = vmatpush1.bf16.msra.mxu1 %v6826_v4  ;;  %v7650_v3 = vrot.slane %v2128_v2, %v7596_v6  ;;  %v6928_v2 = vld [vmem:[#allocation9 + $0xa68] ss:$16 sps:$4 sm:$0xff]  }
 0x327   :  { %3812 = vmatprep.subr.bf16.mxu0 %v6831_v7  ;;  %3914 = vmatprep.subr.bf16.mxu1 %v6834_v29 }
 0x32a   :  { %3813 = vmatpush1.bf16.msra.mxu0 %v6829_v8  ;;  %3915 = vmatpush1.bf16.msra.mxu1 %v6832_v9 }
 0x32b   :  { %3814 = vmatprep.subr.bf16.mxu0 %v6837_v10  ;;  %3916 = vmatprep.subr.bf16.mxu1 %v6840_v11 }
 0x32e   :  { %3815 = vmatpush1.bf16.msra.mxu0 %v6835_v12  ;;  %3917 = vmatpush1.bf16.msra.mxu1 %v6838_v13 }
 0x32f   :  { %3816 = vmatprep.subr.bf16.mxu0 %v6843_v14  ;;  %3918 = vmatprep.subr.bf16.mxu1 %v6846_v15 }
 0x332   :  { %3817 = vmatpush1.bf16.msra.mxu0 %v6841_v16  ;;  %3919 = vmatpush1.bf16.msra.mxu1 %v6844_v17 }
 0x333   :  { %3818 = vmatprep.subr.bf16.mxu0 %v6849_v19  ;;  %3920 = vmatprep.subr.bf16.mxu1 %v6852_v20 }
 0x336   :  { %3819 = vmatpush1.bf16.msra.mxu0 %v6847_v22  ;;  %3921 = vmatpush1.bf16.msra.mxu1 %v6850_v23 }
 0x337   :  { %3820 = vmatprep.subr.bf16.mxu0 %v6855_v24  ;;  %3922 = vmatprep.subr.bf16.mxu1 %v6858_v25 }
 0x33a   :  { %3821 = vmatpush1.bf16.msra.mxu0 %v6853_v26  ;;  %3923 = vmatpush1.bf16.msra.mxu1 %v6856_v27 }
 0x33b   :  { %3822 = vmatprep.subr.bf16.mxu0 %v6861_v28  ;;  %3924 = vmatprep.subr.bf16.mxu1 %v6864_v30 }
 0x33e   :  { %3823 = vmatpush1.bf16.msra.mxu0 %v6859_v31  ;;  %3925 = vmatpush1.bf16.msra.mxu1 %v6862_v32 }
 0x33f   :  { %3824 = vmatprep.subr.bf16.mxu0 %v6867_v34  ;;  %3926 = vmatprep.subr.bf16.mxu1 %v6870_v35 }
 0x342   :  { %3825 = vmatpush1.bf16.msra.mxu0 %v6865_v36  ;;  %3927 = vmatpush1.bf16.msra.mxu1 %v6868_v37 }
 0x343   :  { %3826 = vmatprep.subr.bf16.mxu0 %v6873_v39  ;;  %3928 = vmatprep.subr.bf16.mxu1 %v6876_v40  ;;  %v6907_v40 = vld [vmem:[#allocation9 + $0xa00] ss:$16 sps:$4 sm:$0xff]  }
 0x346   :  { %3827 = vmatpush1.bf16.msra.mxu0 %v6871_v41  ;;  %3929 = vmatpush1.bf16.msra.mxu1 %v6874_v42  ;;  %v6910_v41 = vld [vmem:[#allocation9 + $0xa08] ss:$16 sps:$4 sm:$0xff]  }
 0x347   :  { %3828 = vmatprep.subr.bf16.mxu0 %v6879_v43  ;;  %3930 = vmatprep.subr.bf16.mxu1 %v6882_v44 }
 0x34a   :  { %3829 = vmatpush1.bf16.msra.mxu0 %v6877_v45  ;;  %3931 = vmatpush1.bf16.msra.mxu1 %v6880_v46  ;;  %v6915_v45 = vld [vmem:[#allocation9 + $0xa24] ss:$16 sps:$4 sm:$0xff]   ;;  %v6918_v46 = vld [vmem:[#allocation9 + $0xa2c] ss:$16 sps:$4 sm:$0xff]  }
 0x34b   :  { %3830 = vmatprep.subr.bf16.mxu0 %v6885_v47  ;;  %3932 = vmatprep.subr.bf16.mxu1 %v6888_v48 }
 0x34e   :  { %3831 = vmatpush1.bf16.msra.mxu0 %v6883_v50  ;;  %3933 = vmatpush1.bf16.msra.mxu1 %v6886_v52 }
 0x34f   :  { %3832 = vmatprep.subr.bf16.mxu0 %v6891_v53  ;;  %3934 = vmatprep.subr.bf16.mxu1 %v6894_v55 }
 0x352   :  { %3833 = vmatpush1.bf16.msra.mxu0 %v6889_v57  ;;  %3935 = vmatpush1.bf16.msra.mxu1 %v6892_v59  ;;  %v6913_v57 = vld [vmem:[#allocation9 + $0xa20] ss:$16 sps:$4 sm:$0xff]   ;;  %v6916_v59 = vld [vmem:[#allocation9 + $0xa28] ss:$16 sps:$4 sm:$0xff]  }
 0x353   :  { %3834 = vmatprep.subr.bf16.mxu0 %v6897_v21  ;;  %3936 = vmatprep.subr.bf16.mxu1 %v6900_v54 }
 0x356   :  { %3835 = vmatpush1.bf16.msra.mxu0 %v6895_v60  ;;  %3937 = vmatpush1.bf16.msra.mxu1 %v6898_v61  ;;  %v6921_v60 = vld [vmem:[#allocation9 + $0xa44] ss:$16 sps:$4 sm:$0xff]   ;;  %v6924_v61 = vld [vmem:[#allocation9 + $0xa4c] ss:$16 sps:$4 sm:$0xff]  }
 0x357   :  { %3836 = vmatprep.subr.bf16.mxu0 %v6903_v62  ;;  %3938 = vmatprep.subr.bf16.mxu1 %v6906_v18  ;;  %v6919_v62 = vld [vmem:[#allocation9 + $0xa40] ss:$16 sps:$4 sm:$0xff]   ;;  %v6922_v18 = vld [vmem:[#allocation9 + $0xa48] ss:$16 sps:$4 sm:$0xff]  }
 0x35a   :  { %3837 = vmatpush1.bf16.msra.mxu0 %v6901_v0  ;;  %3939 = vmatpush1.bf16.msra.mxu1 %v6904_v38  ;;  %v6927_v38 = vld [vmem:[#allocation9 + $0xa64] ss:$16 sps:$4 sm:$0xff]  }
 0x35b   :  { %3857 = vmatprep.subr.bf16.mxu0 %v6909_v63  ;;  %3959 = vmatprep.subr.bf16.mxu1 %v6912_v1  ;;  %v6930_v63 = vld [vmem:[#allocation9 + $0xa6c] ss:$16 sps:$4 sm:$0xff]   ;;  %v6925_v1 = vld [vmem:[#allocation9 + $0xa60] ss:$16 sps:$4 sm:$0xff]  }
 0x3ef   :  { %v2875_v4 = vpop.f32.mrb[16].mxu0  ;;  %v2977_v7 = vpop.f32.mrb[16].mxu1 }
 0x3f0   :  { %v6149_v29 = vadd.f32 %v2875_v4, %v2133_v51  ;;  %v6155_v8 = vadd.f32 %v2977_v7, %v7646_v33  ;;  %v2877_v9 = vpop.f32.mrb[17].mxu0  ;;  %v2979_v10 = vpop.f32.mrb[17].mxu1  ;;  %v6931_v4 = vld [vmem:[#allocation9 + $0xa80] ss:$16 sps:$4 sm:$0xff]   ;;  %v6934_v7 = vld [vmem:[#allocation9 + $0xa88] ss:$16 sps:$4 sm:$0xff]  }
 0x3f1   :  { %v6150_v11 = vadd.f32 %v2877_v9, %v2137_v49  ;;  %v6156_v12 = vadd.f32 %v2979_v10, %v7650_v3  ;;  %v2879_v13 = vpop.f32.mrb[18].mxu0  ;;  %v2981_v14 = vpop.f32.mrb[18].mxu1  ;;  %v6937_v9 = vld [vmem:[#allocation9 + $0xaa0] ss:$16 sps:$4 sm:$0xff]   ;;  %v6940_v10 = vld [vmem:[#allocation9 + $0xaa8] ss:$16 sps:$4 sm:$0xff]  }
 0x3f2   :  { %v6151_v15 = vadd.f32 %v2879_v13, %v2133_v51  ;;  %v6157_v16 = vadd.f32 %v2981_v14, %v7646_v33  ;;  %v2881_v17 = vpop.f32.mrb[19].mxu0  ;;  %v2983_v19 = vpop.f32.mrb[19].mxu1  ;;  %v2994_v23 = vmax.f32 %v6149_v29, 0.0  ;;  %v2996_v24 = vmax.f32 %v6155_v8, 0.0  ;;  %v6939_v29 = vld [vmem:[#allocation9 + $0xaa4] ss:$16 sps:$4 sm:$0xff]  }
 0x3f3   :  { %v6152_v20 = vadd.f32 %v2881_v17, %v2137_v49  ;;  %v6158_v22 = vadd.f32 %v2983_v19, %v7650_v3  ;;  %v2995_v27 = vmax.f32 %v6150_v11, 0.0  ;;  %v2997_v28 = vmax.f32 %v6156_v12, 0.0  ;;  %v6942_v8 = vld [vmem:[#allocation9 + $0xaac] ss:$16 sps:$4 sm:$0xff]   ;;  %v6945_v11 = vld [vmem:[#allocation9 + $0xac4] ss:$16 sps:$4 sm:$0xff]  }
 0x3f4   :  { %v2998_v25 = vmax.f32 %v6151_v15, 0.0  ;;  %v3000_v26 = vmax.f32 %v6157_v16, 0.0  ;;  %v6948_v12 = vld [vmem:[#allocation9 + $0xacc] ss:$16 sps:$4 sm:$0xff]   ;;  %v6943_v13 = vld [vmem:[#allocation9 + $0xac0] ss:$16 sps:$4 sm:$0xff]  }
 0x3f5   :  { %v2999_v30 = vmax.f32 %v6152_v20, 0.0  ;;  %v3001_v31 = vmax.f32 %v6158_v22, 0.0  ;;  %v6946_v14 = vld [vmem:[#allocation9 + $0xac8] ss:$16 sps:$4 sm:$0xff]   ;;  %v6951_v15 = vld [vmem:[#allocation9 + $0xae4] ss:$16 sps:$4 sm:$0xff]  }
 0x3f6   :  { %v3006_v32 = vpack.c.bf16 %v2998_v25, %v2994_v23  ;;  %v7656_v34 = vpack.c.bf16 %v3000_v26, %v2996_v24  ;;  %v6954_v16 = vld [vmem:[#allocation9 + $0xaec] ss:$16 sps:$4 sm:$0xff]   ;;  %v6949_v17 = vld [vmem:[#allocation9 + $0xae0] ss:$16 sps:$4 sm:$0xff]   ;;  %v6952_v19 = vld [vmem:[#allocation9 + $0xae8] ss:$16 sps:$4 sm:$0xff]  }
 0x3f7   :  { %v3007_v35 = vpack.c.bf16 %v2999_v30, %v2995_v27  ;;  %v3009_v36 = vpack.c.bf16 %v3001_v31, %v2997_v28  ;;  %v2885_v37 = vpop.f32.mrb[20].mxu0  ;;  %v7658_v39 = vpop.f32.mrb[20].mxu1  ;;  %v6957_v20 = vld [vmem:[#allocation9 + $0xb04] ss:$16 sps:$4 sm:$0xff]   ;;  %v6960_v22 = vld [vmem:[#allocation9 + $0xb0c] ss:$16 sps:$4 sm:$0xff]  }
 0x3f8   :  { %v6153_v42 = vadd.f32 %v2885_v37, %v2133_v51  ;;  %v2887_v43 = vpop.f32.mrb[21].mxu0  ;;  %v7660_v44 = vpop.f32.mrb[21].mxu1  ;;  %v6933_v51 = vld [vmem:[#allocation9 + $0xa84] ss:$16 sps:$4 sm:$0xff]   ;;  %v6955_v23 = vld [vmem:[#allocation9 + $0xb00] ss:$16 sps:$4 sm:$0xff]  }
 0x3f9   :  { %v6154_v47 = vadd.f32 %v2887_v43, %v2137_v49  ;;  %v2889_v48 = vpop.f32.mrb[22].mxu0  ;;  %v2991_v50 = vpop.f32.mrb[22].mxu1  ;;  %3838 = vmatprep.mubr.bf16.mxu0 %v3007_v35  ;;  %3940 = vmatprep.mubr.bf16.mxu1 %v3007_v35  ;;  %v6936_v49 = vld [vmem:[#allocation9 + $0xa8c] ss:$16 sps:$4 sm:$0xff]   ;;  %v6958_v24 = vld [vmem:[#allocation9 + $0xb08] ss:$16 sps:$4 sm:$0xff]  }
 0x3fa   :  { %v2890_v52 = vpop.f32.mrb[23].mxu0  ;;  %v2992_v53 = vpop.f32.mrb[23].mxu1  ;;  %3839 = vmatmul.mubr.bf16.vlgmr.msra.gmra.mrb[24].mxu0 %v3006_v32  ;;  %3941 = vmatmul.mubr.bf16.vlgmr.msra.gmra.mrb[24].mxu1 %v3006_v32  ;;  %v3002_v21 = vmax.f32 %v6153_v42, 0.0  ;;  %v6963_v25 = vld [vmem:[#allocation9 + $0xb24] ss:$16 sps:$4 sm:$0xff]  }
 0x3fb   :  { %v3003_v55 = vmax.f32 %v6154_v47, 0.0  ;;  %3858 = vmatpush1.bf16.msra.mxu0 %v6907_v40  ;;  %3960 = vmatpush1.bf16.msra.mxu1 %v6910_v41  ;;  %v6966_v26 = vld [vmem:[#allocation9 + $0xb2c] ss:$16 sps:$4 sm:$0xff]   ;;  %v6961_v27 = vld [vmem:[#allocation9 + $0xb20] ss:$16 sps:$4 sm:$0xff]  }
 0x3fc   :  { %3859 = vmatprep.subr.bf16.mxu0 %v6915_v45  ;;  %3961 = vmatprep.subr.bf16.mxu1 %v6918_v46  ;;  %v3010_v0 = vpack.c.bf16 %v3002_v21, %v3002_v21  ;;  %v6964_v28 = vld [vmem:[#allocation9 + $0xb28] ss:$16 sps:$4 sm:$0xff]   ;;  %v6969_v30 = vld [vmem:[#allocation9 + $0xb44] ss:$16 sps:$4 sm:$0xff]   ;;  %v6972_v31 = vld [vmem:[#allocation9 + $0xb4c] ss:$16 sps:$4 sm:$0xff]  }
 0x3fd   :  { %v3011_v54 = vpack.c.bf16 %v3003_v55, %v3003_v55  ;;  %v6967_v32 = vld [vmem:[#allocation9 + $0xb40] ss:$16 sps:$4 sm:$0xff]   ;;  %v6970_v35 = vld [vmem:[#allocation9 + $0xb48] ss:$16 sps:$4 sm:$0xff]   ;;  %v6978_v37 = vld [vmem:[#allocation9 + $0xb6c] ss:$16 sps:$4 sm:$0xff]  }
 0x3fe   :  { %v6973_v40 = vld [vmem:[#allocation9 + $0xb60] ss:$16 sps:$4 sm:$0xff]   ;;  %v6976_v41 = vld [vmem:[#allocation9 + $0xb68] ss:$16 sps:$4 sm:$0xff]   ;;  %v6981_v42 = vld [vmem:[#allocation9 + $0xb84] ss:$16 sps:$4 sm:$0xff]  }
 0x3ff   :  { %3860 = vmatpush1.bf16.msra.mxu0 %v6913_v57  ;;  %3962 = vmatpush1.bf16.msra.mxu1 %v6916_v59  ;;  %v6984_v43 = vld [vmem:[#allocation9 + $0xb8c] ss:$16 sps:$4 sm:$0xff]   ;;  %v6979_v45 = vld [vmem:[#allocation9 + $0xb80] ss:$16 sps:$4 sm:$0xff]   ;;  %v6982_v46 = vld [vmem:[#allocation9 + $0xb88] ss:$16 sps:$4 sm:$0xff]  }
 0x400   :  { %3848 = vmatprep.mubr.bf16.mxu0 %v3011_v54  ;;  %3950 = vmatprep.mubr.bf16.mxu1 %v3011_v54  ;;  %v6987_v47 = vld [vmem:[#allocation9 + $0xba4] ss:$16 sps:$4 sm:$0xff]   ;;  %v6990_v48 = vld [vmem:[#allocation9 + $0xbac] ss:$16 sps:$4 sm:$0xff]   ;;  %v6985_v50 = vld [vmem:[#allocation9 + $0xba0] ss:$16 sps:$4 sm:$0xff]  }
 0x401   :  { %3861 = vmatprep.subr.bf16.mxu0 %v6921_v60  ;;  %3963 = vmatprep.subr.bf16.mxu1 %v6924_v61  ;;  %v6988_v52 = vld [vmem:[#allocation9 + $0xba8] ss:$16 sps:$4 sm:$0xff]   ;;  %v6993_v53 = vld [vmem:[#allocation9 + $0xbc4] ss:$16 sps:$4 sm:$0xff]   ;;  %v6996_v55 = vld [vmem:[#allocation9 + $0xbcc] ss:$16 sps:$4 sm:$0xff]   ;;  %v6160_v60 = vadd.f32 %v7660_v44, %v7650_v3 }
 0x402   :  { %3849 = vmatmul.mubr.bf16.gmra.mrb[28].mxu0 %v3010_v0  ;;  %3951 = vmatmul.mubr.bf16.gmra.mrb[28].mxu1 %v3010_v0  ;;  %v6991_v57 = vld [vmem:[#allocation9 + $0xbc0] ss:$16 sps:$4 sm:$0xff]   ;;  %v6994_v59 = vld [vmem:[#allocation9 + $0xbc8] ss:$16 sps:$4 sm:$0xff]   ;;  %v6999_v21 = vld [vmem:[#allocation9 + $0xbe4] ss:$16 sps:$4 sm:$0xff]  }
 0x403   :  { %3862 = vmatpush1.bf16.msra.mxu0 %v6919_v62  ;;  %3964 = vmatpush1.bf16.msra.mxu1 %v6922_v18  ;;  %v7002_v54 = vld [vmem:[#allocation9 + $0xbec] ss:$16 sps:$4 sm:$0xff]   ;;  %v6997_v61 = vld [vmem:[#allocation9 + $0xbe0] ss:$16 sps:$4 sm:$0xff]   ;;  %v7000_v62 = vld [vmem:[#allocation9 + $0xbe8] ss:$16 sps:$4 sm:$0xff]  }
 0x404   :  { %3889 = vmatprep.mubr.bf16.mxu0 %v3009_v36  ;;  %3991 = vmatprep.mubr.bf16.mxu1 %v3009_v36  ;;  %v6975_v36 = vld [vmem:[#allocation9 + $0xb64] ss:$16 sps:$4 sm:$0xff]   ;;  %v7008_v0 = vld [vmem:[#allocation9 + $0xc0c] ss:$16 sps:$4 sm:$0xff]  }
 0x405   :  { %3863 = vmatprep.subr.bf16.mxu0 %v6927_v38  ;;  %3965 = vmatprep.subr.bf16.mxu1 %v6930_v63  ;;  %v7005_v18 = vld [vmem:[#allocation9 + $0xc04] ss:$16 sps:$4 sm:$0xff]   ;;  %v3005_v38 = vmax.f32 %v6160_v60, 0.0  ;;  %v6159_v63 = vadd.f32 %v7658_v39, %v7646_v33  ;;  %v7014_v44 = vld [vmem:[#allocation9 + $0xc2c] ss:$16 sps:$4 sm:$0xff]  }
 0x406   :  { %v7011_v3 = vld [vmem:[#allocation9 + $0xc24] ss:$16 sps:$4 sm:$0xff]   ;;  %v7020_v39 = vld [vmem:[#allocation9 + $0xc4c] ss:$16 sps:$4 sm:$0xff]  }
 0x407   :  { %3864 = vmatpush1.bf16.msra.mxu0 %v6925_v1  ;;  %3966 = vmatpush1.bf16.msra.mxu1 %v6928_v2  ;;  %v7003_v1 = vld [vmem:[#allocation9 + $0xc00] ss:$16 sps:$4 sm:$0xff]   ;;  %v7006_v2 = vld [vmem:[#allocation9 + $0xc08] ss:$16 sps:$4 sm:$0xff]   ;;  %v7017_v33 = vld [vmem:[#allocation9 + $0xc44] ss:$16 sps:$4 sm:$0xff]  }
 0x408   :  { %3865 = vmatprep.subr.bf16.mxu0 %v6933_v51  ;;  %3967 = vmatprep.subr.bf16.mxu1 %v6936_v49  ;;  %v3013_v51 = vpack.c.bf16 %v3005_v38, %v3005_v38  ;;  %v3004_v49 = vmax.f32 %v6159_v63, 0.0  ;;  %v7083_v60 = vld [vmem:[#allocation9 + $0xda4] ss:$16 sps:$4 sm:$0xff]   ;;  %v7092_v38 = vld [vmem:[#allocation9 + $0xdcc] ss:$16 sps:$4 sm:$0xff]  }
 0x409   :  { %v7087_v63 = vld [vmem:[#allocation9 + $0xdc0] ss:$16 sps:$4 sm:$0xff]  }
 0x40b   :  { %3866 = vmatpush1.bf16.msra.mxu0 %v6931_v4  ;;  %3968 = vmatpush1.bf16.msra.mxu1 %v6934_v7  ;;  %v7009_v4 = vld [vmem:[#allocation9 + $0xc20] ss:$16 sps:$4 sm:$0xff]   ;;  %v7012_v7 = vld [vmem:[#allocation9 + $0xc28] ss:$16 sps:$4 sm:$0xff]  }
 0x40c   :  { %3867 = vmatprep.subr.bf16.mxu0 %v6939_v29  ;;  %3969 = vmatprep.subr.bf16.mxu1 %v6942_v8  ;;  %v3012_v29 = vpack.c.bf16 %v3004_v49, %v3004_v49  ;;  %v7015_v8 = vld [vmem:[#allocation9 + $0xc40] ss:$16 sps:$4 sm:$0xff]   ;;  %v7101_v49 = vld [vmem:[#allocation9 + $0xe04] ss:$16 sps:$4 sm:$0xff]  }
 0x40f   :  { %3868 = vmatpush1.bf16.msra.mxu0 %v6937_v9  ;;  %3970 = vmatpush1.bf16.msra.mxu1 %v6940_v10  ;;  %v7018_v9 = vld [vmem:[#allocation9 + $0xc48] ss:$16 sps:$4 sm:$0xff]   ;;  %v7023_v10 = vld [vmem:[#allocation9 + $0xc64] ss:$16 sps:$4 sm:$0xff]  }
 0x410   :  { %3869 = vmatprep.subr.bf16.mxu0 %v6945_v11  ;;  %3971 = vmatprep.subr.bf16.mxu1 %v6948_v12  ;;  %v7021_v11 = vld [vmem:[#allocation9 + $0xc60] ss:$16 sps:$4 sm:$0xff]   ;;  %v7024_v12 = vld [vmem:[#allocation9 + $0xc68] ss:$16 sps:$4 sm:$0xff]  }
 0x413   :  { %3870 = vmatpush1.bf16.msra.mxu0 %v6943_v13  ;;  %3972 = vmatpush1.bf16.msra.mxu1 %v6946_v14  ;;  %v7029_v13 = vld [vmem:[#allocation9 + $0xc84] ss:$16 sps:$4 sm:$0xff]   ;;  %v7032_v14 = vld [vmem:[#allocation9 + $0xc8c] ss:$16 sps:$4 sm:$0xff]  }
 0x414   :  { %3871 = vmatprep.subr.bf16.mxu0 %v6951_v15  ;;  %3973 = vmatprep.subr.bf16.mxu1 %v6954_v16  ;;  %v7027_v15 = vld [vmem:[#allocation9 + $0xc80] ss:$16 sps:$4 sm:$0xff]   ;;  %v7030_v16 = vld [vmem:[#allocation9 + $0xc88] ss:$16 sps:$4 sm:$0xff]  }
 0x417   :  { %3872 = vmatpush1.bf16.msra.mxu0 %v6949_v17  ;;  %3974 = vmatpush1.bf16.msra.mxu1 %v6952_v19  ;;  %v7035_v17 = vld [vmem:[#allocation9 + $0xca4] ss:$16 sps:$4 sm:$0xff]   ;;  %v7038_v19 = vld [vmem:[#allocation9 + $0xcac] ss:$16 sps:$4 sm:$0xff]  }
 0x418   :  { %3873 = vmatprep.subr.bf16.mxu0 %v6957_v20  ;;  %3975 = vmatprep.subr.bf16.mxu1 %v6960_v22  ;;  %v7033_v20 = vld [vmem:[#allocation9 + $0xca0] ss:$16 sps:$4 sm:$0xff]   ;;  %v7036_v22 = vld [vmem:[#allocation9 + $0xca8] ss:$16 sps:$4 sm:$0xff]  }
 0x41b   :  { %3874 = vmatpush1.bf16.msra.mxu0 %v6955_v23  ;;  %3976 = vmatpush1.bf16.msra.mxu1 %v6958_v24  ;;  %v7041_v23 = vld [vmem:[#allocation9 + $0xcc4] ss:$16 sps:$4 sm:$0xff]   ;;  %v7044_v24 = vld [vmem:[#allocation9 + $0xccc] ss:$16 sps:$4 sm:$0xff]  }
 0x41c   :  { %3875 = vmatprep.subr.bf16.mxu0 %v6963_v25  ;;  %3977 = vmatprep.subr.bf16.mxu1 %v6966_v26  ;;  %v7039_v25 = vld [vmem:[#allocation9 + $0xcc0] ss:$16 sps:$4 sm:$0xff]   ;;  %v7042_v26 = vld [vmem:[#allocation9 + $0xcc8] ss:$16 sps:$4 sm:$0xff]  }
 0x41f   :  { %3876 = vmatpush1.bf16.msra.mxu0 %v6961_v27  ;;  %3978 = vmatpush1.bf16.msra.mxu1 %v6964_v28  ;;  %v7047_v27 = vld [vmem:[#allocation9 + $0xce4] ss:$16 sps:$4 sm:$0xff]   ;;  %v7050_v28 = vld [vmem:[#allocation9 + $0xcec] ss:$16 sps:$4 sm:$0xff]  }
 0x420   :  { %3877 = vmatprep.subr.bf16.mxu0 %v6969_v30  ;;  %3979 = vmatprep.subr.bf16.mxu1 %v6972_v31  ;;  %v7045_v30 = vld [vmem:[#allocation9 + $0xce0] ss:$16 sps:$4 sm:$0xff]   ;;  %v7048_v31 = vld [vmem:[#allocation9 + $0xce8] ss:$16 sps:$4 sm:$0xff]  }
 0x423   :  { %3878 = vmatpush1.bf16.msra.mxu0 %v6967_v32  ;;  %3980 = vmatpush1.bf16.msra.mxu1 %v6970_v35  ;;  %v7053_v32 = vld [vmem:[#allocation9 + $0xd04] ss:$16 sps:$4 sm:$0xff]   ;;  %v7056_v35 = vld [vmem:[#allocation9 + $0xd0c] ss:$16 sps:$4 sm:$0xff]  }
 0x424   :  { %3879 = vmatprep.subr.bf16.mxu0 %v6975_v36  ;;  %3981 = vmatprep.subr.bf16.mxu1 %v6978_v37  ;;  %v7051_v36 = vld [vmem:[#allocation9 + $0xd00] ss:$16 sps:$4 sm:$0xff]   ;;  %v7054_v37 = vld [vmem:[#allocation9 + $0xd08] ss:$16 sps:$4 sm:$0xff]  }
 0x427   :  { %3880 = vmatpush1.bf16.msra.mxu0 %v6973_v40  ;;  %3982 = vmatpush1.bf16.msra.mxu1 %v6976_v41  ;;  %v7059_v40 = vld [vmem:[#allocation9 + $0xd24] ss:$16 sps:$4 sm:$0xff]   ;;  %v7062_v41 = vld [vmem:[#allocation9 + $0xd2c] ss:$16 sps:$4 sm:$0xff]  }
 0x428   :  { %3881 = vmatprep.subr.bf16.mxu0 %v6981_v42  ;;  %3983 = vmatprep.subr.bf16.mxu1 %v6984_v43  ;;  %v7057_v42 = vld [vmem:[#allocation9 + $0xd20] ss:$16 sps:$4 sm:$0xff]   ;;  %v7060_v43 = vld [vmem:[#allocation9 + $0xd28] ss:$16 sps:$4 sm:$0xff]  }
 0x42b   :  { %3882 = vmatpush1.bf16.msra.mxu0 %v6979_v45  ;;  %3984 = vmatpush1.bf16.msra.mxu1 %v6982_v46  ;;  %v7065_v45 = vld [vmem:[#allocation9 + $0xd44] ss:$16 sps:$4 sm:$0xff]   ;;  %v7068_v46 = vld [vmem:[#allocation9 + $0xd4c] ss:$16 sps:$4 sm:$0xff]  }
 0x42c   :  { %3883 = vmatprep.subr.bf16.mxu0 %v6987_v47  ;;  %3985 = vmatprep.subr.bf16.mxu1 %v6990_v48  ;;  %v7063_v47 = vld [vmem:[#allocation9 + $0xd40] ss:$16 sps:$4 sm:$0xff]   ;;  %v7066_v48 = vld [vmem:[#allocation9 + $0xd48] ss:$16 sps:$4 sm:$0xff]  }
 0x42f   :  { %3884 = vmatpush1.bf16.msra.mxu0 %v6985_v50  ;;  %3986 = vmatpush1.bf16.msra.mxu1 %v6988_v52  ;;  %v7071_v50 = vld [vmem:[#allocation9 + $0xd64] ss:$16 sps:$4 sm:$0xff]   ;;  %v7074_v52 = vld [vmem:[#allocation9 + $0xd6c] ss:$16 sps:$4 sm:$0xff]  }
 0x430   :  { %3885 = vmatprep.subr.bf16.mxu0 %v6993_v53  ;;  %3987 = vmatprep.subr.bf16.mxu1 %v6996_v55  ;;  %v7069_v53 = vld [vmem:[#allocation9 + $0xd60] ss:$16 sps:$4 sm:$0xff]   ;;  %v7072_v55 = vld [vmem:[#allocation9 + $0xd68] ss:$16 sps:$4 sm:$0xff]  }
 0x433   :  { %3886 = vmatpush1.bf16.msra.mxu0 %v6991_v57  ;;  %3988 = vmatpush1.bf16.msra.mxu1 %v6994_v59  ;;  %v7077_v57 = vld [vmem:[#allocation9 + $0xd84] ss:$16 sps:$4 sm:$0xff]   ;;  %v7080_v59 = vld [vmem:[#allocation9 + $0xd8c] ss:$16 sps:$4 sm:$0xff]  }
 0x434   :  { %3887 = vmatprep.subr.bf16.mxu0 %v6999_v21  ;;  %3989 = vmatprep.subr.bf16.mxu1 %v7002_v54  ;;  %v7075_v21 = vld [vmem:[#allocation9 + $0xd80] ss:$16 sps:$4 sm:$0xff]   ;;  %v7078_v54 = vld [vmem:[#allocation9 + $0xd88] ss:$16 sps:$4 sm:$0xff]  }
 0x437   :  { %3888 = vmatpush1.bf16.msra.mxu0 %v6997_v61  ;;  %3990 = vmatpush1.bf16.msra.mxu1 %v7000_v62  ;;  %v7086_v61 = vld [vmem:[#allocation9 + $0xdac] ss:$16 sps:$4 sm:$0xff]   ;;  %v7081_v62 = vld [vmem:[#allocation9 + $0xda0] ss:$16 sps:$4 sm:$0xff]  }
 0x438   :  { %4822 = vmatprep.subr.bf16.mxu0 %v7005_v18  ;;  %4924 = vmatprep.subr.bf16.mxu1 %v7008_v0  ;;  %v7084_v18 = vld [vmem:[#allocation9 + $0xda8] ss:$16 sps:$4 sm:$0xff]   ;;  %v7089_v0 = vld [vmem:[#allocation9 + $0xdc4] ss:$16 sps:$4 sm:$0xff]  }
 0x43a   :  { %3890 = vmatmul.mubr.bf16.vlgmr.msra.gmra.mrb[24].mxu0 %v7656_v34  ;;  %3992 = vmatmul.mubr.bf16.vlgmr.msra.gmra.mrb[24].mxu1 %v7656_v34  ;;  %v7026_v34 = vld [vmem:[#allocation9 + $0xc6c] ss:$16 sps:$4 sm:$0xff]  }
 0x43b   :  { %3899 = vmatprep.mubr.bf16.mxu0 %v3013_v51  ;;  %4001 = vmatprep.mubr.bf16.mxu1 %v3013_v51  ;;  %v7098_v51 = vld [vmem:[#allocation9 + $0xdec] ss:$16 sps:$4 sm:$0xff]  }
 0x43c   :  { %4823 = vmatpush1.bf16.msra.mxu0 %v7003_v1  ;;  %4925 = vmatpush1.bf16.msra.mxu1 %v7006_v2  ;;  %v7090_v1 = vld [vmem:[#allocation9 + $0xdc8] ss:$16 sps:$4 sm:$0xff]   ;;  %v7095_v2 = vld [vmem:[#allocation9 + $0xde4] ss:$16 sps:$4 sm:$0xff]  }
 0x43d   :  { %4824 = vmatprep.subr.bf16.mxu0 %v7011_v3  ;;  %4926 = vmatprep.subr.bf16.mxu1 %v7014_v44  ;;  %v7093_v3 = vld [vmem:[#allocation9 + $0xde0] ss:$16 sps:$4 sm:$0xff]   ;;  %v7096_v44 = vld [vmem:[#allocation9 + $0xde8] ss:$16 sps:$4 sm:$0xff]  }
 0x440   :  { %4825 = vmatpush1.bf16.msra.mxu0 %v7009_v4  ;;  %4927 = vmatpush1.bf16.msra.mxu1 %v7012_v7  ;;  %v7104_v4 = vld [vmem:[#allocation9 + $0xe0c] ss:$16 sps:$4 sm:$0xff]   ;;  %v3144_v7 = vld [vmem:[#allocation11 + $0x8] sm:$0xf] }
 0x441   :  { %4826 = vmatprep.subr.bf16.mxu0 %v7017_v33  ;;  %4928 = vmatprep.subr.bf16.mxu1 %v7020_v39  ;;  %v3149_v33 = vrot.slane %v3144_v7, %v7588_v56  ;;  %v7670_v39 = vrot.slane %v3144_v7, %v7594_v5 }
 0x442   :  { %3900 = vmatmul.mubr.bf16.gmra.mrb[28].mxu0 %v3012_v29  ;;  %4002 = vmatmul.mubr.bf16.gmra.mrb[28].mxu1 %v3012_v29  ;;  %v3153_v29 = vrot.slane %v3144_v7, %v7590_v58 }
 0x444   :  { %4827 = vmatpush1.bf16.msra.mxu0 %v7015_v8  ;;  %4929 = vmatpush1.bf16.msra.mxu1 %v7018_v9  ;;  %v7674_v8 = vrot.slane %v3144_v7, %v7596_v6  ;;  %v7120_v7 = vld [vmem:[#allocation9 + $0xe68] ss:$16 sps:$4 sm:$0xff]  }
 0x445   :  { %4828 = vmatprep.subr.bf16.mxu0 %v7023_v10  ;;  %4930 = vmatprep.subr.bf16.mxu1 %v7026_v34 }
 0x448   :  { %4829 = vmatpush1.bf16.msra.mxu0 %v7021_v11  ;;  %4931 = vmatpush1.bf16.msra.mxu1 %v7024_v12 }
 0x449   :  { %4830 = vmatprep.subr.bf16.mxu0 %v7029_v13  ;;  %4932 = vmatprep.subr.bf16.mxu1 %v7032_v14 }
 0x44c   :  { %4831 = vmatpush1.bf16.msra.mxu0 %v7027_v15  ;;  %4933 = vmatpush1.bf16.msra.mxu1 %v7030_v16 }
 0x44d   :  { %4832 = vmatprep.subr.bf16.mxu0 %v7035_v17  ;;  %4934 = vmatprep.subr.bf16.mxu1 %v7038_v19 }
 0x450   :  { %4833 = vmatpush1.bf16.msra.mxu0 %v7033_v20  ;;  %4935 = vmatpush1.bf16.msra.mxu1 %v7036_v22 }
 0x451   :  { %4834 = vmatprep.subr.bf16.mxu0 %v7041_v23  ;;  %4936 = vmatprep.subr.bf16.mxu1 %v7044_v24 }
 0x454   :  { %4835 = vmatpush1.bf16.msra.mxu0 %v7039_v25  ;;  %4937 = vmatpush1.bf16.msra.mxu1 %v7042_v26 }
 0x455   :  { %4836 = vmatprep.subr.bf16.mxu0 %v7047_v27  ;;  %4938 = vmatprep.subr.bf16.mxu1 %v7050_v28 }
 0x458   :  { %4837 = vmatpush1.bf16.msra.mxu0 %v7045_v30  ;;  %4939 = vmatpush1.bf16.msra.mxu1 %v7048_v31 }
 0x459   :  { %4838 = vmatprep.subr.bf16.mxu0 %v7053_v32  ;;  %4940 = vmatprep.subr.bf16.mxu1 %v7056_v35 }
 0x45c   :  { %4839 = vmatpush1.bf16.msra.mxu0 %v7051_v36  ;;  %4941 = vmatpush1.bf16.msra.mxu1 %v7054_v37 }
 0x45d   :  { %4840 = vmatprep.subr.bf16.mxu0 %v7059_v40  ;;  %4942 = vmatprep.subr.bf16.mxu1 %v7062_v41 }
 0x460   :  { %4841 = vmatpush1.bf16.msra.mxu0 %v7057_v42  ;;  %4943 = vmatpush1.bf16.msra.mxu1 %v7060_v43 }
 0x461   :  { %4842 = vmatprep.subr.bf16.mxu0 %v7065_v45  ;;  %4944 = vmatprep.subr.bf16.mxu1 %v7068_v46  ;;  %v7099_v46 = vld [vmem:[#allocation9 + $0xe00] ss:$16 sps:$4 sm:$0xff]  }
 0x464   :  { %4843 = vmatpush1.bf16.msra.mxu0 %v7063_v47  ;;  %4945 = vmatpush1.bf16.msra.mxu1 %v7066_v48  ;;  %v7102_v47 = vld [vmem:[#allocation9 + $0xe08] ss:$16 sps:$4 sm:$0xff]  }
 0x465   :  { %4844 = vmatprep.subr.bf16.mxu0 %v7071_v50  ;;  %4946 = vmatprep.subr.bf16.mxu1 %v7074_v52 }
 0x468   :  { %4845 = vmatpush1.bf16.msra.mxu0 %v7069_v53  ;;  %4947 = vmatpush1.bf16.msra.mxu1 %v7072_v55  ;;  %v7107_v53 = vld [vmem:[#allocation9 + $0xe24] ss:$16 sps:$4 sm:$0xff]   ;;  %v7110_v55 = vld [vmem:[#allocation9 + $0xe2c] ss:$16 sps:$4 sm:$0xff]  }
 0x469   :  { %4846 = vmatprep.subr.bf16.mxu0 %v7077_v57  ;;  %4948 = vmatprep.subr.bf16.mxu1 %v7080_v59 }
 0x46c   :  { %4847 = vmatpush1.bf16.msra.mxu0 %v7075_v21  ;;  %4949 = vmatpush1.bf16.msra.mxu1 %v7078_v54 }
 0x46d   :  { %4848 = vmatprep.subr.bf16.mxu0 %v7083_v60  ;;  %4950 = vmatprep.subr.bf16.mxu1 %v7086_v61 }
 0x470   :  { %4849 = vmatpush1.bf16.msra.mxu0 %v7081_v62  ;;  %4951 = vmatpush1.bf16.msra.mxu1 %v7084_v18  ;;  %v7105_v62 = vld [vmem:[#allocation9 + $0xe20] ss:$16 sps:$4 sm:$0xff]   ;;  %v7108_v18 = vld [vmem:[#allocation9 + $0xe28] ss:$16 sps:$4 sm:$0xff]  }
 0x471   :  { %4850 = vmatprep.subr.bf16.mxu0 %v7089_v0  ;;  %4952 = vmatprep.subr.bf16.mxu1 %v7092_v38 }
 0x474   :  { %4851 = vmatpush1.bf16.msra.mxu0 %v7087_v63  ;;  %4953 = vmatpush1.bf16.msra.mxu1 %v7090_v1  ;;  %v7113_v63 = vld [vmem:[#allocation9 + $0xe44] ss:$16 sps:$4 sm:$0xff]   ;;  %v7116_v1 = vld [vmem:[#allocation9 + $0xe4c] ss:$16 sps:$4 sm:$0xff]  }
 0x475   :  { %4852 = vmatprep.subr.bf16.mxu0 %v7095_v2  ;;  %4954 = vmatprep.subr.bf16.mxu1 %v7098_v51  ;;  %v7111_v2 = vld [vmem:[#allocation9 + $0xe40] ss:$16 sps:$4 sm:$0xff]   ;;  %v7114_v51 = vld [vmem:[#allocation9 + $0xe48] ss:$16 sps:$4 sm:$0xff]  }
 0x478   :  { %4853 = vmatpush1.bf16.msra.mxu0 %v7093_v3  ;;  %4955 = vmatpush1.bf16.msra.mxu1 %v7096_v44  ;;  %v7119_v44 = vld [vmem:[#allocation9 + $0xe64] ss:$16 sps:$4 sm:$0xff]  }
 0x479   :  { %4873 = vmatprep.subr.bf16.mxu0 %v7101_v49  ;;  %4975 = vmatprep.subr.bf16.mxu1 %v7104_v4  ;;  %v7122_v49 = vld [vmem:[#allocation9 + $0xe6c] ss:$16 sps:$4 sm:$0xff]   ;;  %v7117_v4 = vld [vmem:[#allocation9 + $0xe60] ss:$16 sps:$4 sm:$0xff]  }
 0x50d   :  { %v3891_v9 = vpop.f32.mrb[24].mxu0  ;;  %v3993_v10 = vpop.f32.mrb[24].mxu1 }
 0x50e   :  { %v6161_v34 = vadd.f32 %v3891_v9, %v3149_v33  ;;  %v6167_v11 = vadd.f32 %v3993_v10, %v7670_v39  ;;  %v3893_v12 = vpop.f32.mrb[25].mxu0  ;;  %v3995_v13 = vpop.f32.mrb[25].mxu1  ;;  %v7123_v9 = vld [vmem:[#allocation9 + $0xe80] ss:$16 sps:$4 sm:$0xff]   ;;  %v7126_v10 = vld [vmem:[#allocation9 + $0xe88] ss:$16 sps:$4 sm:$0xff]  }
 0x50f   :  { %v6162_v14 = vadd.f32 %v3893_v12, %v3153_v29  ;;  %v6168_v15 = vadd.f32 %v3995_v13, %v7674_v8  ;;  %v3895_v16 = vpop.f32.mrb[26].mxu0  ;;  %v3997_v17 = vpop.f32.mrb[26].mxu1  ;;  %v7129_v12 = vld [vmem:[#allocation9 + $0xea0] ss:$16 sps:$4 sm:$0xff]   ;;  %v7132_v13 = vld [vmem:[#allocation9 + $0xea8] ss:$16 sps:$4 sm:$0xff]  }
 0x510   :  { %v6163_v19 = vadd.f32 %v3895_v16, %v3149_v33  ;;  %v6169_v20 = vadd.f32 %v3997_v17, %v7670_v39  ;;  %v3897_v22 = vpop.f32.mrb[27].mxu0  ;;  %v3999_v23 = vpop.f32.mrb[27].mxu1  ;;  %v4010_v26 = vmax.f32 %v6161_v34, 0.0  ;;  %v4012_v27 = vmax.f32 %v6167_v11, 0.0  ;;  %v7131_v34 = vld [vmem:[#allocation9 + $0xea4] ss:$16 sps:$4 sm:$0xff]  }
 0x511   :  { %v6164_v24 = vadd.f32 %v3897_v22, %v3153_v29  ;;  %v6170_v25 = vadd.f32 %v3999_v23, %v7674_v8  ;;  %v4011_v31 = vmax.f32 %v6162_v14, 0.0  ;;  %v4013_v32 = vmax.f32 %v6168_v15, 0.0  ;;  %v7134_v11 = vld [vmem:[#allocation9 + $0xeac] ss:$16 sps:$4 sm:$0xff]   ;;  %v7137_v14 = vld [vmem:[#allocation9 + $0xec4] ss:$16 sps:$4 sm:$0xff]  }
 0x512   :  { %v4014_v28 = vmax.f32 %v6163_v19, 0.0  ;;  %v4016_v30 = vmax.f32 %v6169_v20, 0.0  ;;  %v7140_v15 = vld [vmem:[#allocation9 + $0xecc] ss:$16 sps:$4 sm:$0xff]   ;;  %v7135_v16 = vld [vmem:[#allocation9 + $0xec0] ss:$16 sps:$4 sm:$0xff]  }
 0x513   :  { %v4015_v35 = vmax.f32 %v6164_v24, 0.0  ;;  %v4017_v36 = vmax.f32 %v6170_v25, 0.0  ;;  %v7138_v17 = vld [vmem:[#allocation9 + $0xec8] ss:$16 sps:$4 sm:$0xff]   ;;  %v7143_v19 = vld [vmem:[#allocation9 + $0xee4] ss:$16 sps:$4 sm:$0xff]  }
 0x514   :  { %v4022_v37 = vpack.c.bf16 %v4014_v28, %v4010_v26  ;;  %v7680_v40 = vpack.c.bf16 %v4016_v30, %v4012_v27  ;;  %v7146_v20 = vld [vmem:[#allocation9 + $0xeec] ss:$16 sps:$4 sm:$0xff]   ;;  %v7141_v22 = vld [vmem:[#allocation9 + $0xee0] ss:$16 sps:$4 sm:$0xff]   ;;  %v7144_v23 = vld [vmem:[#allocation9 + $0xee8] ss:$16 sps:$4 sm:$0xff]  }
 0x515   :  { %v4023_v41 = vpack.c.bf16 %v4015_v35, %v4011_v31  ;;  %v4025_v42 = vpack.c.bf16 %v4017_v36, %v4013_v32  ;;  %v3901_v43 = vpop.f32.mrb[28].mxu0  ;;  %v7682_v45 = vpop.f32.mrb[28].mxu1  ;;  %v7149_v24 = vld [vmem:[#allocation9 + $0xf04] ss:$16 sps:$4 sm:$0xff]   ;;  %v7152_v25 = vld [vmem:[#allocation9 + $0xf0c] ss:$16 sps:$4 sm:$0xff]  }
 0x516   :  { %v6165_v48 = vadd.f32 %v3901_v43, %v3149_v33  ;;  %v3903_v50 = vpop.f32.mrb[29].mxu0  ;;  %v7684_v52 = vpop.f32.mrb[29].mxu1  ;;  %v7125_v33 = vld [vmem:[#allocation9 + $0xe84] ss:$16 sps:$4 sm:$0xff]   ;;  %v7147_v26 = vld [vmem:[#allocation9 + $0xf00] ss:$16 sps:$4 sm:$0xff]  }
 0x517   :  { %v6166_v57 = vadd.f32 %v3903_v50, %v3153_v29  ;;  %v3905_v59 = vpop.f32.mrb[30].mxu0  ;;  %v4007_v21 = vpop.f32.mrb[30].mxu1  ;;  %4854 = vmatprep.mubr.bf16.mxu0 %v4023_v41  ;;  %4956 = vmatprep.mubr.bf16.mxu1 %v4023_v41  ;;  %v7128_v29 = vld [vmem:[#allocation9 + $0xe8c] ss:$16 sps:$4 sm:$0xff]   ;;  %v7150_v27 = vld [vmem:[#allocation9 + $0xf08] ss:$16 sps:$4 sm:$0xff]  }
 0x518   :  { %v3906_v54 = vpop.f32.mrb[31].mxu0  ;;  %v4008_v60 = vpop.f32.mrb[31].mxu1  ;;  %4855 = vmatmul.mubr.bf16.vlgmr.msra.gmra.mrb[32].mxu0 %v4022_v37  ;;  %4957 = vmatmul.mubr.bf16.vlgmr.msra.gmra.mrb[32].mxu1 %v4022_v37  ;;  %v4018_v0 = vmax.f32 %v6165_v48, 0.0  ;;  %v7155_v28 = vld [vmem:[#allocation9 + $0xf24] ss:$16 sps:$4 sm:$0xff]  }
 0x519   :  { %v4019_v61 = vmax.f32 %v6166_v57, 0.0  ;;  %4874 = vmatpush1.bf16.msra.mxu0 %v7099_v46  ;;  %4976 = vmatpush1.bf16.msra.mxu1 %v7102_v47  ;;  %v7158_v30 = vld [vmem:[#allocation9 + $0xf2c] ss:$16 sps:$4 sm:$0xff]   ;;  %v7153_v31 = vld [vmem:[#allocation9 + $0xf20] ss:$16 sps:$4 sm:$0xff]  }
 0x51a   :  { %4875 = vmatprep.subr.bf16.mxu0 %v7107_v53  ;;  %4977 = vmatprep.subr.bf16.mxu1 %v7110_v55  ;;  %v4026_v3 = vpack.c.bf16 %v4018_v0, %v4018_v0  ;;  %v7156_v32 = vld [vmem:[#allocation9 + $0xf28] ss:$16 sps:$4 sm:$0xff]   ;;  %v7161_v35 = vld [vmem:[#allocation9 + $0xf44] ss:$16 sps:$4 sm:$0xff]   ;;  %v7164_v36 = vld [vmem:[#allocation9 + $0xf4c] ss:$16 sps:$4 sm:$0xff]  }
 0x51b   :  { %v4027_v38 = vpack.c.bf16 %v4019_v61, %v4019_v61  ;;  %v7159_v37 = vld [vmem:[#allocation9 + $0xf40] ss:$16 sps:$4 sm:$0xff]   ;;  %v7162_v41 = vld [vmem:[#allocation9 + $0xf48] ss:$16 sps:$4 sm:$0xff]   ;;  %v7170_v43 = vld [vmem:[#allocation9 + $0xf6c] ss:$16 sps:$4 sm:$0xff]  }
 0x51c   :  { %v7165_v46 = vld [vmem:[#allocation9 + $0xf60] ss:$16 sps:$4 sm:$0xff]   ;;  %v7168_v47 = vld [vmem:[#allocation9 + $0xf68] ss:$16 sps:$4 sm:$0xff]   ;;  %v7173_v48 = vld [vmem:[#allocation9 + $0xf84] ss:$16 sps:$4 sm:$0xff]  }
 0x51d   :  { %4876 = vmatpush1.bf16.msra.mxu0 %v7105_v62  ;;  %4978 = vmatpush1.bf16.msra.mxu1 %v7108_v18  ;;  %v7176_v50 = vld [vmem:[#allocation9 + $0xf8c] ss:$16 sps:$4 sm:$0xff]   ;;  %v7171_v53 = vld [vmem:[#allocation9 + $0xf80] ss:$16 sps:$4 sm:$0xff]   ;;  %v7174_v55 = vld [vmem:[#allocation9 + $0xf88] ss:$16 sps:$4 sm:$0xff]  }
 0x51e   :  { %4864 = vmatprep.mubr.bf16.mxu0 %v4027_v38  ;;  %4966 = vmatprep.mubr.bf16.mxu1 %v4027_v38  ;;  %v7179_v57 = vld [vmem:[#allocation9 + $0xfa4] ss:$16 sps:$4 sm:$0xff]   ;;  %v7182_v59 = vld [vmem:[#allocation9 + $0xfac] ss:$16 sps:$4 sm:$0xff]   ;;  %v7177_v21 = vld [vmem:[#allocation9 + $0xfa0] ss:$16 sps:$4 sm:$0xff]  }
 0x51f   :  { %4877 = vmatprep.subr.bf16.mxu0 %v7113_v63  ;;  %4979 = vmatprep.subr.bf16.mxu1 %v7116_v1  ;;  %v7180_v54 = vld [vmem:[#allocation9 + $0xfa8] ss:$16 sps:$4 sm:$0xff]   ;;  %v7185_v60 = vld [vmem:[#allocation9 + $0xfc4] ss:$16 sps:$4 sm:$0xff]   ;;  %v7188_v61 = vld [vmem:[#allocation9 + $0xfcc] ss:$16 sps:$4 sm:$0xff]   ;;  %v6172_v63 = vadd.f32 %v7684_v52, %v7674_v8 }
 0x520   :  { %4865 = vmatmul.mubr.bf16.gmra.mrb[36].mxu0 %v4026_v3  ;;  %4967 = vmatmul.mubr.bf16.gmra.mrb[36].mxu1 %v4026_v3  ;;  %v7183_v62 = vld [vmem:[#allocation9 + $0xfc0] ss:$16 sps:$4 sm:$0xff]   ;;  %v7186_v18 = vld [vmem:[#allocation9 + $0xfc8] ss:$16 sps:$4 sm:$0xff]   ;;  %v7191_v0 = vld [vmem:[#allocation9 + $0xfe4] ss:$16 sps:$4 sm:$0xff]  }
 0x521   :  { %4878 = vmatpush1.bf16.msra.mxu0 %v7111_v2  ;;  %4980 = vmatpush1.bf16.msra.mxu1 %v7114_v51  ;;  %v7194_v38 = vld [vmem:[#allocation9 + $0xfec] ss:$16 sps:$4 sm:$0xff]   ;;  %v7189_v1 = vld [vmem:[#allocation9 + $0xfe0] ss:$16 sps:$4 sm:$0xff]   ;;  %v7192_v2 = vld [vmem:[#allocation9 + $0xfe8] ss:$16 sps:$4 sm:$0xff]  }
 0x522   :  { %4905 = vmatprep.mubr.bf16.mxu0 %v4025_v42  ;;  %5007 = vmatprep.mubr.bf16.mxu1 %v4025_v42  ;;  %v7167_v42 = vld [vmem:[#allocation9 + $0xf64] ss:$16 sps:$4 sm:$0xff]   ;;  %v7199_v8 = vld [vmem:[#allocation12 + $0x48] sm:$0xff]  }
 0x523   :  { %4879 = vmatprep.subr.bf16.mxu0 %v7119_v44  ;;  %4981 = vmatprep.subr.bf16.mxu1 %v7122_v49  ;;  %v7195_v51 = vld [vmem:[#allocation12 + $0x40] sm:$0xff]   ;;  %v4021_v44 = vmax.f32 %v6172_v63, 0.0  ;;  %v6171_v49 = vadd.f32 %v7682_v45, %v7670_v39  ;;  %v7200_v52 = vld [vmem:[#allocation12 + $0xc8] sm:$0xff]   ;;  %v7203_v39 = vld [vmem:[#allocation12 + $0x50] sm:$0xff]  }
 0x524   :  { %v7196_v3 = vld [vmem:[#allocation12 + $0xc0] sm:$0xff]   ;;  %v7204_v45 = vld [vmem:[#allocation12 + $0xd0] sm:$0xff]  }
 0x525   :  { %4880 = vmatpush1.bf16.msra.mxu0 %v7117_v4  ;;  %4982 = vmatpush1.bf16.msra.mxu1 %v7120_v7  ;;  %v7197_v4 = vld [vmem:[#allocation12] sm:$0xff]  }
 0x526   :  { %4881 = vmatprep.subr.bf16.mxu0 %v7125_v33  ;;  %4983 = vmatprep.subr.bf16.mxu1 %v7128_v29  ;;  %v7198_v7 = vld [vmem:[#allocation12 + $0x80] sm:$0xff]   ;;  %v4029_v33 = vpack.c.bf16 %v4021_v44, %v4021_v44  ;;  %v4020_v29 = vmax.f32 %v6171_v49, 0.0 }
 0x529   :  { %4882 = vmatpush1.bf16.msra.mxu0 %v7123_v9  ;;  %4984 = vmatpush1.bf16.msra.mxu1 %v7126_v10  ;;  %v7201_v9 = vld [vmem:[#allocation12 + $0x8] sm:$0xff]  }
 0x52a   :  { %4883 = vmatprep.subr.bf16.mxu0 %v7131_v34  ;;  %4985 = vmatprep.subr.bf16.mxu1 %v7134_v11  ;;  %v7202_v10 = vld [vmem:[#allocation12 + $0x88] sm:$0xff]   ;;  %v4028_v34 = vpack.c.bf16 %v4020_v29, %v4020_v29  ;;  %v7205_v11 = vld [vmem:[#allocation12 + $0x10] sm:$0xff]  }
 0x52d   :  { %4884 = vmatpush1.bf16.msra.mxu0 %v7129_v12  ;;  %4986 = vmatpush1.bf16.msra.mxu1 %v7132_v13  ;;  %v7206_v12 = vld [vmem:[#allocation12 + $0x90] sm:$0xff]   ;;  %v7207_v13 = vld [vmem:[#allocation12 + $0x58] sm:$0xff]  }
 0x52e   :  { %4885 = vmatprep.subr.bf16.mxu0 %v7137_v14  ;;  %4987 = vmatprep.subr.bf16.mxu1 %v7140_v15  ;;  %v7209_v14 = vld [vmem:[#allocation12 + $0x18] sm:$0xff]  }
 0x52f   :  { %v7210_v15 = vld [vmem:[#allocation12 + $0x98] sm:$0xff]  }
 0x531   :  { %4886 = vmatpush1.bf16.msra.mxu0 %v7135_v16  ;;  %4988 = vmatpush1.bf16.msra.mxu1 %v7138_v17  ;;  %v7211_v16 = vld [vmem:[#allocation12 + $0x60] sm:$0xff]  }
 0x532   :  { %4887 = vmatprep.subr.bf16.mxu0 %v7143_v19  ;;  %4989 = vmatprep.subr.bf16.mxu1 %v7146_v20  ;;  %v7212_v17 = vld [vmem:[#allocation12 + $0xe0] sm:$0xff]  }
 0x533   :  { %v7213_v19 = vld [vmem:[#allocation12 + $0x20] sm:$0xff]  }
 0x534   :  { %v7214_v20 = vld [vmem:[#allocation12 + $0xa0] sm:$0xff]  }
 0x535   :  { %4888 = vmatpush1.bf16.msra.mxu0 %v7141_v22  ;;  %4990 = vmatpush1.bf16.msra.mxu1 %v7144_v23  ;;  %v7215_v22 = vld [vmem:[#allocation12 + $0x68] sm:$0xff]  }
 0x536   :  { %4889 = vmatprep.subr.bf16.mxu0 %v7149_v24  ;;  %4991 = vmatprep.subr.bf16.mxu1 %v7152_v25  ;;  %v7216_v23 = vld [vmem:[#allocation12 + $0xe8] sm:$0xff]  }
 0x537   :  { %v7217_v24 = vld [vmem:[#allocation12 + $0x28] sm:$0xff]  }
 0x538   :  { %v7218_v25 = vld [vmem:[#allocation12 + $0xa8] sm:$0xff]  }
 0x539   :  { %4890 = vmatpush1.bf16.msra.mxu0 %v7147_v26  ;;  %4992 = vmatpush1.bf16.msra.mxu1 %v7150_v27  ;;  %v7219_v26 = vld [vmem:[#allocation12 + $0x70] sm:$0xff]  }
 0x53a   :  { %4891 = vmatprep.subr.bf16.mxu0 %v7155_v28  ;;  %4993 = vmatprep.subr.bf16.mxu1 %v7158_v30  ;;  %v7220_v27 = vld [vmem:[#allocation12 + $0xf0] sm:$0xff]  }
 0x53b   :  { %v7221_v28 = vld [vmem:[#allocation12 + $0x30] sm:$0xff]  }
 0x53c   :  { %v7222_v30 = vld [vmem:[#allocation12 + $0xb0] sm:$0xff]  }
 0x53d   :  { %4892 = vmatpush1.bf16.msra.mxu0 %v7153_v31  ;;  %4994 = vmatpush1.bf16.msra.mxu1 %v7156_v32  ;;  %v7223_v31 = vld [vmem:[#allocation12 + $0x78] sm:$0xff]  }
 0x53e   :  { %4893 = vmatprep.subr.bf16.mxu0 %v7161_v35  ;;  %4995 = vmatprep.subr.bf16.mxu1 %v7164_v36  ;;  %v7224_v32 = vld [vmem:[#allocation12 + $0xf8] sm:$0xff]  }
 0x53f   :  { %v7225_v35 = vld [vmem:[#allocation12 + $0x38] sm:$0xff]  }
 0x540   :  { %v7226_v36 = vld [vmem:[#allocation12 + $0xb8] sm:$0xff]  }
 0x541   :  { %4894 = vmatpush1.bf16.msra.mxu0 %v7159_v37  ;;  %4996 = vmatpush1.bf16.msra.mxu1 %v7162_v41  ;;  %v4160_v37 = vld [vmem:[#allocation11 + $0xc] sm:$0xf] }
 0x542   :  { %4895 = vmatprep.subr.bf16.mxu0 %v7167_v42  ;;  %4997 = vmatprep.subr.bf16.mxu1 %v7170_v43  ;;  %v4165_v41 = vrot.slane %v4160_v37, %v7588_v56  ;;  %v4173_v42 = vrot.slane %v4160_v37, %v7594_v5  ;;  %v4169_v43 = vrot.slane %v4160_v37, %v7590_v58 }
 0x545   :  { %4896 = vmatpush1.bf16.msra.mxu0 %v7165_v46  ;;  %4998 = vmatpush1.bf16.msra.mxu1 %v7168_v47  ;;  %v4177_v46 = vrot.slane %v4160_v37, %v7596_v6 }
 0x546   :  { %4897 = vmatprep.subr.bf16.mxu0 %v7173_v48  ;;  %4999 = vmatprep.subr.bf16.mxu1 %v7176_v50 }
 0x549   :  { %4898 = vmatpush1.bf16.msra.mxu0 %v7171_v53  ;;  %5000 = vmatpush1.bf16.msra.mxu1 %v7174_v55 }
 0x54a   :  { %4899 = vmatprep.subr.bf16.mxu0 %v7179_v57  ;;  %5001 = vmatprep.subr.bf16.mxu1 %v7182_v59 }
 0x54d   :  { %4900 = vmatpush1.bf16.msra.mxu0 %v7177_v21  ;;  %5002 = vmatpush1.bf16.msra.mxu1 %v7180_v54 }
 0x54e   :  { %4901 = vmatprep.subr.bf16.mxu0 %v7185_v60  ;;  %5003 = vmatprep.subr.bf16.mxu1 %v7188_v61 }
 0x551   :  { %4902 = vmatpush1.bf16.msra.mxu0 %v7183_v62  ;;  %5004 = vmatpush1.bf16.msra.mxu1 %v7186_v18 }
 0x552   :  { %4903 = vmatprep.subr.bf16.mxu0 %v7191_v0  ;;  %5005 = vmatprep.subr.bf16.mxu1 %v7194_v38 }
 0x555   :  { %4904 = vmatpush1.bf16.msra.mxu0 %v7189_v1  ;;  %5006 = vmatpush1.bf16.msra.mxu1 %v7192_v2 }
 0x556   :  { %6069 = vmatprep.subr.bf16.mxu0 %v7195_v51  ;;  %6097 = vmatprep.subr.bf16.mxu1 %v7196_v3 }
 0x558   :  { %4906 = vmatmul.mubr.bf16.vlgmr.msra.gmra.mrb[32].mxu0 %v7680_v40  ;;  %5008 = vmatmul.mubr.bf16.vlgmr.msra.gmra.mrb[32].mxu1 %v7680_v40  ;;  %v7208_v40 = vld [vmem:[#allocation12 + $0xd8] sm:$0xff]  }
 0x559   :  { %4915 = vmatprep.mubr.bf16.mxu0 %v4029_v33  ;;  %5017 = vmatprep.mubr.bf16.mxu1 %v4029_v33 }
 0x55a   :  { %6070 = vmatpush3.bf16.msra.mxu0 %v7197_v4  ;;  %6098 = vmatpush3.bf16.msra.mxu1 %v7198_v7 }
 0x55b   :  { %6071 = vmatprep.subr.bf16.mxu0 %v7199_v8  ;;  %6099 = vmatprep.subr.bf16.mxu1 %v7200_v52 }
 0x55e   :  { %6072 = vmatpush3.bf16.msra.mxu0 %v7201_v9  ;;  %6100 = vmatpush3.bf16.msra.mxu1 %v7202_v10 }
 0x55f   :  { %6073 = vmatprep.subr.bf16.mxu0 %v7203_v39  ;;  %6101 = vmatprep.subr.bf16.mxu1 %v7204_v45 }
 0x560   :  { %4916 = vmatmul.mubr.bf16.gmra.mrb[36].mxu0 %v4028_v34  ;;  %5018 = vmatmul.mubr.bf16.gmra.mrb[36].mxu1 %v4028_v34 }
 0x562   :  { %6074 = vmatpush3.bf16.msra.mxu0 %v7205_v11  ;;  %6102 = vmatpush3.bf16.msra.mxu1 %v7206_v12 }
 0x563   :  { %6075 = vmatprep.subr.bf16.mxu0 %v7207_v13  ;;  %6103 = vmatprep.subr.bf16.mxu1 %v7208_v40 }
 0x566   :  { %6076 = vmatpush3.bf16.msra.mxu0 %v7209_v14  ;;  %6104 = vmatpush3.bf16.msra.mxu1 %v7210_v15 }
 0x567   :  { %6077 = vmatprep.subr.bf16.mxu0 %v7211_v16  ;;  %6105 = vmatprep.subr.bf16.mxu1 %v7212_v17 }
 0x56a   :  { %6078 = vmatpush3.bf16.msra.mxu0 %v7213_v19  ;;  %6106 = vmatpush3.bf16.msra.mxu1 %v7214_v20 }
 0x56b   :  { %6079 = vmatprep.subr.bf16.mxu0 %v7215_v22  ;;  %6107 = vmatprep.subr.bf16.mxu1 %v7216_v23 }
 0x56e   :  { %6080 = vmatpush3.bf16.msra.mxu0 %v7217_v24  ;;  %6108 = vmatpush3.bf16.msra.mxu1 %v7218_v25  ;;  %v6036_v25 = vld [vmem:[#allocation14] ss:$0 sm:$0xff] }
 0x56f   :  { %6081 = vmatprep.subr.bf16.mxu0 %v7219_v26  ;;  %6109 = vmatprep.subr.bf16.mxu1 %v7220_v27 }
 0x572   :  { %6082 = vmatpush3.bf16.msra.mxu0 %v7221_v28  ;;  %6110 = vmatpush3.bf16.msra.mxu1 %v7222_v30 }
 0x573   :  { %6083 = vmatprep.subr.bf16.mxu0 %v7223_v31  ;;  %6111 = vmatprep.subr.bf16.mxu1 %v7224_v32 }
 0x576   :  { %6084 = vmatpush3.bf16.msra.mxu0 %v7225_v35  ;;  %6112 = vmatpush3.bf16.msra.mxu1 %v7226_v36 }
 0x62b   :  { %v4907_v47 = vpop.f32.mrb[32].mxu0  ;;  %v5009_v48 = vpop.f32.mrb[32].mxu1 }
 0x62c   :  { %v6173_v50 = vadd.f32 %v4907_v47, %v4165_v41  ;;  %v6179_v53 = vadd.f32 %v5009_v48, %v4173_v42  ;;  %v4909_v55 = vpop.f32.mrb[33].mxu0  ;;  %v5011_v57 = vpop.f32.mrb[33].mxu1 }
 0x62d   :  { %v6174_v59 = vadd.f32 %v4909_v55, %v4169_v43  ;;  %v6180_v21 = vadd.f32 %v5011_v57, %v4177_v46  ;;  %v4911_v54 = vpop.f32.mrb[34].mxu0  ;;  %v5013_v60 = vpop.f32.mrb[34].mxu1 }
 0x62e   :  { %v6175_v61 = vadd.f32 %v4911_v54, %v4165_v41  ;;  %v6181_v62 = vadd.f32 %v5013_v60, %v4173_v42  ;;  %v4913_v18 = vpop.f32.mrb[35].mxu0  ;;  %v5015_v56 = vpop.f32.mrb[35].mxu1  ;;  %v5026_v38 = vmax.f32 %v6173_v50, 0.0  ;;  %v5028_v58 = vmax.f32 %v6179_v53, 0.0 }
 0x62f   :  { %v6176_v0 = vadd.f32 %v4913_v18, %v4169_v43  ;;  %v6182_v5 = vadd.f32 %v5015_v56, %v4177_v46  ;;  %v5027_v1 = vmax.f32 %v6174_v59, 0.0  ;;  %v5029_v2 = vmax.f32 %v6180_v21, 0.0 }
 0x630   :  { %v5030_v63 = vmax.f32 %v6175_v61, 0.0  ;;  %v5032_v6 = vmax.f32 %v6181_v62, 0.0 }
 0x631   :  { %v5031_v51 = vmax.f32 %v6176_v0, 0.0  ;;  %v5033_v3 = vmax.f32 %v6182_v5, 0.0 }
 0x632   :  { %v5038_v44 = vpack.c.bf16 %v5030_v63, %v5026_v38  ;;  %v5040_v49 = vpack.c.bf16 %v5032_v6, %v5028_v58 }
 0x633   :  { %v5039_v4 = vpack.c.bf16 %v5031_v51, %v5027_v1  ;;  %v5041_v7 = vpack.c.bf16 %v5033_v3, %v5029_v2  ;;  %v4917_v33 = vpop.f32.mrb[36].mxu0  ;;  %v5019_v8 = vpop.f32.mrb[36].mxu1 }
 0x634   :  { %v6177_v52 = vadd.f32 %v4917_v33, %v4165_v41  ;;  %v6183_v29 = vadd.f32 %v5019_v8, %v4173_v42  ;;  %v4919_v9 = vpop.f32.mrb[37].mxu0  ;;  %v5021_v10 = vpop.f32.mrb[37].mxu1 }
 0x635   :  { %v6178_v39 = vadd.f32 %v4919_v9, %v4169_v43  ;;  %v6184_v45 = vadd.f32 %v5021_v10, %v4177_v46  ;;  %v4921_v34 = vpop.f32.mrb[38].mxu0  ;;  %v5023_v11 = vpop.f32.mrb[38].mxu1  ;;  %5341 = vmatprep.mubr.bf16.mxu0 %v5039_v4  ;;  %5389 = vmatprep.mubr.bf16.mxu1 %v5041_v7 }
 0x636   :  { %v4922_v12 = vpop.f32.mrb[39].mxu0  ;;  %v5024_v13 = vpop.f32.mrb[39].mxu1  ;;  %5342 = vmatmul.mubr.bf16.vlgmr.msra.gmra.mrb[40].mxu0 %v5038_v44  ;;  %5390 = vmatmul.mubr.bf16.vlgmr.msra.gmra.mrb[40].mxu1 %v5040_v49  ;;  %v5034_v15 = vmax.f32 %v6177_v52, 0.0  ;;  %v5036_v16 = vmax.f32 %v6183_v29, 0.0 }
 0x637   :  { %v5035_v40 = vmax.f32 %v6178_v39, 0.0  ;;  %v5037_v14 = vmax.f32 %v6184_v45, 0.0 }
 0x638   :  { %v5042_v20 = vpack.c.bf16 %v5034_v15, %v5034_v15  ;;  %v5044_v22 = vpack.c.bf16 %v5036_v16, %v5036_v16 }
 0x639   :  { %v5043_v17 = vpack.c.bf16 %v5035_v40, %v5035_v40  ;;  %v5045_v19 = vpack.c.bf16 %v5037_v14, %v5037_v14 }
 0x63b   :  { %5349 = vmatprep.mubr.bf16.mxu0 %v5043_v17  ;;  %5397 = vmatprep.mubr.bf16.mxu1 %v5045_v19 }
 0x63e   :  { %5350 = vmatmul.mubr.bf16.gmra.mrb[44].mxu0 %v5042_v20  ;;  %5398 = vmatmul.mubr.bf16.gmra.mrb[44].mxu1 %v5044_v22 }
 0x709   :  { %v6085_v23 = vpop.f32.mrb[40].mxu0  ;;  %v6113_v24 = vpop.f32.mrb[40].mxu1 }
 0x70a   :  { %v6086_v26 = vpop.f32.mrb[41].mxu0  ;;  %v6114_v27 = vpop.f32.mrb[41].mxu1 }
 0x70b   :  { %v6087_v28 = vadd.f32 %v6086_v26, %v6085_v23  ;;  %v6115_v30 = vadd.f32 %v6114_v27, %v6113_v24  ;;  %v6088_v31 = vpop.f32.mrb[42].mxu0  ;;  %v6116_v32 = vpop.f32.mrb[42].mxu1 }
 0x70c   :  { %v6089_v35 = vpop.f32.mrb[43].mxu0  ;;  %v6117_v36 = vpop.f32.mrb[43].mxu1 }
 0x70d   :  { %v5344_v37 = vadd.f32 %v6087_v28, %v6036_v25  ;;  %v6090_v41 = vadd.f32 %v6089_v35, %v6088_v31  ;;  %v6118_v42 = vadd.f32 %v6117_v36, %v6116_v32 }
 0x70f   :  { %v5392_v43 = vadd.f32 %v6115_v30, %v5344_v37  ;;  %v5347_v46 = vadd.f32 %v6090_v41, %v6036_v25 }
 0x711   :  { %5405 = vst [vmem:[#allocation15] sm:$0xff] %v5392_v43  ;;  %v5395_v47 = vadd.f32 %v6118_v42, %v5347_v46  ;;  %v6091_v48 = vpop.f32.mrb[44].mxu0  ;;  %v6119_v50 = vpop.f32.mrb[44].mxu1 }
 0x712   :  { %v6092_v53 = vpop.f32.mrb[45].mxu0  ;;  %v6120_v55 = vpop.f32.mrb[45].mxu1 }
 0x713   :  { %5406 = vst [vmem:[#allocation15 + $0x8] sm:$0xff] %v5395_v47  ;;  %v6093_v57 = vadd.f32 %v6092_v53, %v6091_v48  ;;  %v6121_v59 = vadd.f32 %v6120_v55, %v6119_v50  ;;  %v6094_v21 = vpop.f32.mrb[46].mxu0  ;;  %v6122_v54 = vpop.f32.mrb[46].mxu1 }
 0x714   :  { %v6095_v60 = vpop.f32.mrb[47].mxu0  ;;  %v6123_v61 = vpop.f32.mrb[47].mxu1 }
 0x715   :  { %v5352_v62 = vadd.f32 %v6093_v57, %v6036_v25 }
 0x717   :  { %v5400_v18 = vadd.f32 %v6121_v59, %v5352_v62 }
 0x719   :  { %5407 = vst [vmem:[#allocation15 + $0x10] sm:$0xff] %v5400_v18 }
 0x71a   :  { %7392 = shalt.err (!%p7389_p4)
}
 0x71b   :  { %s7393_s29 = scalar_lea.hbm %s7715_s7, 384 }
 0x71c   :  { %p7394_p5 = scmp.ne.s32.totalorder %s7715_s7, %s7393_s29  ;;  %p7397_p6 = scmp.lt.u32.totalorder %s7393_s29, %s7715_s7 }
 0x71e   :  { %p7399_p7 = pnand %p7397_p6, %p7394_p5 }
 0x720   :  { %7402 = shalt.err (!%p7399_p7)
}
 0x721   :  { %s7429_s22 = smov 128   ;;  %s7430_s23 = smov 8  }
 0x722   :  { %5419 = dma.vmem_to_hbm [thread:$0]  %s5414_s9, 384, %s7715_s7, [#allocation5], %s7429_s22, %s7429_s22, %s7430_s23  }
 0x723   :  { %7411 = dma.done.wait [#allocation5], 384  }
 0x724   :  { %7412 = vsyncadd [#allocation5], 4294966912 }
 0x725   :  { %5423 = vsyncpa [#allocation4], 1 }
 0x726   :  { %5424 = vsyncpa [#allocation7], 1 }
 0x727   :  { %5425 = vsyncpa [#allocation10], 1 }
 0x728   :  { %5426 = vsyncpa [#allocation13], 1 }
 0x729   :  { %5427 = vsyncpa [#allocation5], 1 }

</bundles_post_ra>
